<compile_context>
chip_gen: v6e
topology: v6e:2x2x1
jax: 0.10.0
libtpu: 0.0.40
codegen_flags: <defaults>
</compile_context>

<pallas_src>
import functools

import jax
import jax.numpy as jnp
from jax import lax
from jax.experimental import pallas as pl
from jax.experimental.pallas import tpu as pltpu

EPS = 1e-5  # nn.BatchNorm2d default eps


def _round_up(x, m):
    return (x + m - 1) // m * m


def conv_stats_kernel(x_ref, w_ref, conv_ref, mean_ref, m2_ref, *,
                      K, Ho, Wo, stride, th):
    """Pass 1: implicit-GEMM conv for one (image, Cout-block) tile.

    For each ~128-row sub-tile of the output: K*K shifted bf16 matmuls into an
    f32 accumulator, a bf16 store of the conv tile, and a Chan-style running
    per-channel (mean, M2) update for the BatchNorm statistics.
    """
    tco = w_ref.shape[-1]
    n_run = 0
    mean_run = None
    m2_run = None
    for h0 in range(0, Ho, th):                      # static, unrolled
        rows = min(th, Ho - h0)
        nc = rows * Wo
        acc = jnp.zeros((nc, tco), jnp.float32)
        for kh in range(K):
            r0 = h0 * stride + kh
            for kw in range(K):
                if stride == 1:
                    xs = x_ref[0, r0:r0 + rows, kw:kw + Wo, :]
                else:
                    xs = x_ref[0, pl.ds(r0, rows, stride),
                               pl.ds(kw, Wo, stride), :]
                lhs = xs.reshape(nc, xs.shape[-1])
                acc = acc + jnp.dot(lhs, w_ref[kh, kw],
                                    preferred_element_type=jnp.float32)
        conv_ref[0, h0 * Wo:h0 * Wo + nc, :] = acc.astype(conv_ref.dtype)

        # Running per-channel mean / M2 (Chan parallel-variance combine).
        mean_c = jnp.sum(acc, axis=0, keepdims=True) * (1.0 / nc)
        m2_c = jnp.sum((acc - mean_c) ** 2, axis=0, keepdims=True)
        if n_run == 0:
            n_run, mean_run, m2_run = nc, mean_c, m2_c
        else:
            n_new = n_run + nc
            delta = mean_c - mean_run
            mean_run = mean_run + delta * (nc / n_new)
            m2_run = m2_run + m2_c + delta * delta * (n_run * nc / n_new)
            n_run = n_new
    mean_ref[0] = mean_run
    m2_ref[0] = m2_run


def bn_apply_kernel(conv_ref, scale_ref, shift_ref, out_ref, *, rows_per_chunk):
    """Pass 2: out = conv * scale + shift (per channel), chunked row-wise so the
    f32 working set stays in vregs while the DMA blocks stay large."""
    s = scale_ref[...]
    b = shift_ref[...]
    total = conv_ref.shape[1]
    for r0 in range(0, total, rows_per_chunk):       # static, unrolled
        r1 = min(total, r0 + rows_per_chunk)
        out_ref[0, r0:r1, :] = conv_ref[0, r0:r1, :].astype(jnp.float32) * s + b


def convbn_forward(x_nchw, weight, gamma, beta, stride=1, padding=1,
                   compute_dtype=jnp.bfloat16):
    """ConvbnBlock forward: Conv2d(bias=False, padding) + BatchNorm2d in
    training mode (batch statistics, biased variance).  Returns NCHW float32.

    compute_dtype picks the MXU operand precision (bf16 default; pass
    jnp.float32 for a closer match to PyTorch's f32 conv at reduced MXU rate).
    TODO(synk): running_mean / running_var buffer updates (a PyTorch training
    side effect) are not produced here.
    """
    N, Cin, H, W = x_nchw.shape
    Cout, _, K, _ = weight.shape
    Ho = (H + 2 * padding - K) // stride + 1
    Wo = (W + 2 * padding - K) // stride + 1
    Hp, Wp = H + 2 * padding, W + 2 * padding
    M = N * Ho * Wo

    # Cout blocking: full-dim blocks for narrow layers (no zero lanes written
    # to HBM); 128/256-wide channel blocks for wide layers.
    if Cout % 256 == 0:
        tco = 256
    elif Cout % 128 == 0:
        tco = 128
    else:
        tco = Cout
    n_co = Cout // tco

    # Sublane-aligned contraction; zero channels don't change the conv.
    Cin_p = _round_up(Cin, 8)
    inter_dtype = jnp.bfloat16 if compute_dtype == jnp.bfloat16 else jnp.float32

    # NCHW -> NHWC (+ spatial & channel zero pad) so channels sit on lanes.
    # TODO(synk): skip this transpose when the producer is already NHWC.
    x = jnp.transpose(x_nchw, (0, 2, 3, 1)).astype(compute_dtype)
    xp = jnp.pad(x, ((0, 0), (padding, padding), (padding, padding),
                     (0, Cin_p - Cin)))

    # weight (Cout, Cin, K, K) -> (K, K, Cin_p, Cout)
    w4 = jnp.transpose(weight, (2, 3, 1, 0)).astype(compute_dtype)
    w4 = jnp.pad(w4, ((0, 0), (0, 0), (0, Cin_p - Cin), (0, 0)))

    # ~128 output positions per in-kernel sub-tile (bounds live f32 vregs).
    th = max(1, min(Ho, max(1, 128 // Wo)))
    # TODO(synk): for very large Ho*Wo*Cin images add a row-block grid axis with
    # halo (Element/manual DMA) to bound the per-step VMEM footprint on v7x.

    kernel1 = functools.partial(conv_stats_kernel, K=K, Ho=Ho, Wo=Wo,
                                stride=stride, th=th)
    conv_flat, means, m2s = pl.pallas_call(
        kernel1,
        out_shape=(jax.ShapeDtypeStruct((N, Ho * Wo, Cout), inter_dtype),
                   jax.ShapeDtypeStruct((N, 1, Cout), jnp.float32),
                   jax.ShapeDtypeStruct((N, 1, Cout), jnp.float32)),
        grid=(N, n_co),
        in_specs=[
            pl.BlockSpec((1, Hp, Wp, Cin_p), lambda n, c: (n, 0, 0, 0)),
            pl.BlockSpec((K, K, Cin_p, tco), lambda n, c: (0, 0, 0, c)),
        ],
        out_specs=(
            pl.BlockSpec((1, Ho * Wo, tco), lambda n, c: (n, 0, c)),
            pl.BlockSpec((1, 1, tco), lambda n, c: (n, 0, c)),
            pl.BlockSpec((1, 1, tco), lambda n, c: (n, 0, c)),
        ),
        compiler_params=pltpu.CompilerParams(
            dimension_semantics=("parallel", "parallel")),
    )(xp, w4)

    # ---- tiny per-channel finalize: Chan combine across images, fold BN ----
    n_img = Ho * Wo
    mean_i = means[:, 0, :]                                  # (N, Cout)
    m2_i = m2s[:, 0, :]
    mean = jnp.mean(mean_i, axis=0)                          # equal group sizes
    m2 = jnp.sum(m2_i, axis=0) + n_img * jnp.sum((mean_i - mean) ** 2, axis=0)
    var = jnp.maximum(m2 / M, 0.0)                           # biased (training)
    scale = gamma.astype(jnp.float32) * lax.rsqrt(var + EPS)
    shift = beta.astype(jnp.float32) - mean * scale

    # ---- pass 2: stream conv * scale + shift, f32 out ----
    kernel2 = functools.partial(bn_apply_kernel, rows_per_chunk=512)
    out_flat = pl.pallas_call(
        kernel2,
        out_shape=jax.ShapeDtypeStruct((N, Ho * Wo, Cout), jnp.float32),
        grid=(N, n_co),
        in_specs=[
            pl.BlockSpec((1, Ho * Wo, tco), lambda n, c: (n, 0, c)),
            pl.BlockSpec((1, tco), lambda n, c: (0, c)),
            pl.BlockSpec((1, tco), lambda n, c: (0, c)),
        ],
        out_specs=pl.BlockSpec((1, Ho * Wo, tco), lambda n, c: (n, 0, c)),
        compiler_params=pltpu.CompilerParams(
            dimension_semantics=("parallel", "parallel")),
    )(conv_flat, scale.reshape(1, Cout), shift.reshape(1, Cout))

    out = out_flat.reshape(N, Ho, Wo, Cout)
    # TODO(synk): skip the NHWC->NCHW transpose if the consumer accepts NHWC.
    return jnp.transpose(out, (0, 3, 1, 2))


if __name__ == "__main__":
    # ConvbnBlock(in_channels=4, out_channels=8, kernel_size=3, stride=1)
    N, Cin, H, W = 2, 4, 16, 16
    Cout, K, stride = 8, 3, 1

    key = jax.random.PRNGKey(0)
    kx, kw = jax.random.split(key)
    x = jax.random.normal(kx, (N, Cin, H, W), dtype=jnp.float32)
    weight = jax.random.normal(kw, (Cout, Cin, K, K), dtype=jnp.float32) * 0.1
    gamma = jnp.ones((Cout,), dtype=jnp.float32)   # BatchNorm2d default init
    beta = jnp.zeros((Cout,), dtype=jnp.float32)   # BatchNorm2d default init

    fwd = jax.jit(convbn_forward)                  # stride=1, padding=1 defaults
    y = fwd(x, weight, gamma, beta)
    jax.block_until_ready(y)

    # Sanity check vs. a pure-JAX reference mirroring the kernel's dataflow
    # (bf16-rounded operands, f32 stats, normalization of the bf16 conv tile).
    xr = x.astype(jnp.bfloat16).astype(jnp.float32)
    wr = weight.astype(jnp.bfloat16).astype(jnp.float32)
    conv = lax.conv_general_dilated(
        xr, wr, window_strides=(stride, stride),
        padding=((1, 1), (1, 1)),
        dimension_numbers=("NCHW", "OIHW", "NCHW"))
    m = conv.mean(axis=(0, 2, 3), keepdims=True)
    v = conv.var(axis=(0, 2, 3), keepdims=True)
    conv_q = conv.astype(jnp.bfloat16).astype(jnp.float32)
    ref = (conv_q - m) * lax.rsqrt(v + EPS) * gamma.reshape(1, -1, 1, 1) \
        + beta.reshape(1, -1, 1, 1)
    assert y.shape == (N, Cout, H, W)
    assert jnp.allclose(y, ref, atol=5e-3, rtol=5e-3), float(
        jnp.max(jnp.abs(y - ref)))
    print("KERNEL_OK")
</pallas_src>

<mosaic_0001>
module attributes {stable_mosaic.version = 11 : i64} {
  func.func @bn_apply_kernel(%arg0: i32, %arg1: i32, %arg2: memref<1x256x8xbf16, #tpu.memory_space<vmem>>, %arg3: memref<1x8xf32, #tpu.memory_space<vmem>>, %arg4: memref<1x8xf32, #tpu.memory_space<vmem>>, %arg5: memref<1x256x8xf32, #tpu.memory_space<vmem>>) attributes {dimension_semantics = [#tpu.dimension_semantics<parallel>, #tpu.dimension_semantics<parallel>], iteration_bounds = array<i64: 2, 1>, scalar_prefetch = 0 : i64, scratch_operands = 0 : i64, tpu.core_type = #tpu.core_type<tc>, window_params = [{transform_indices = @transform_0, window_bounds = array<i64: 1, 256, 8>}, {transform_indices = @transform_1, window_bounds = array<i64: 1, 8>}, {transform_indices = @transform_2, window_bounds = array<i64: 1, 8>}, {transform_indices = @transform_3, window_bounds = array<i64: 1, 256, 8>}]} {
    %c0 = arith.constant 0 : index
    %c0_0 = arith.constant 0 : index
    %0 = vector.load %arg3[%c0, %c0_0] : memref<1x8xf32, #tpu.memory_space<vmem>>, vector<1x8xf32>
    %c0_1 = arith.constant 0 : index
    %c0_2 = arith.constant 0 : index
    %1 = vector.load %arg4[%c0_1, %c0_2] : memref<1x8xf32, #tpu.memory_space<vmem>>, vector<1x8xf32>
    %c0_3 = arith.constant 0 : index
    %c0_4 = arith.constant 0 : index
    %c0_5 = arith.constant 0 : index
    %2 = vector.load %arg2[%c0_3, %c0_4, %c0_5] : memref<1x256x8xbf16, #tpu.memory_space<vmem>>, vector<1x256x8xbf16>
    %3 = vector.shape_cast %2 : vector<1x256x8xbf16> to vector<256x8xbf16>
    %4 = arith.extf %3 : vector<256x8xbf16> to vector<256x8xf32>
    %5 = vector.broadcast %0 : vector<1x8xf32> to vector<256x8xf32>
    %6 = arith.mulf %4, %5 : vector<256x8xf32>
    %7 = vector.broadcast %1 : vector<1x8xf32> to vector<256x8xf32>
    %8 = arith.addf %6, %7 : vector<256x8xf32>
    %c0_6 = arith.constant 0 : index
    %c0_7 = arith.constant 0 : index
    %c0_8 = arith.constant 0 : index
    %9 = vector.load %arg5[%c0_6, %c0_7, %c0_8] : memref<1x256x8xf32, #tpu.memory_space<vmem>>, vector<1x256x8xf32>
    %10 = vector.shape_cast %9 : vector<1x256x8xf32> to vector<256x8xf32>
    %11 = vector.shape_cast %8 : vector<256x8xf32> to vector<1x256x8xf32>
    tpu.vector_store %arg5[%c0_6, %c0_7, %c0_8], %11 {strides = array<i32>} : memref<1x256x8xf32, #tpu.memory_space<vmem>>, vector<1x256x8xf32>,
    return
  }
  func.func @transform_0(%arg0: i32, %arg1: i32) -> (i32, i32, i32) {
    %c0_i32 = arith.constant 0 : i32
    %c0_i32_0 = arith.constant 0 : i32
    return %arg0, %c0_i32, %arg1 : i32, i32, i32
  }
  func.func @transform_1(%arg0: i32, %arg1: i32) -> (i32, i32) {
    %c0_i32 = arith.constant 0 : i32
    %c0_i32_0 = arith.constant 0 : i32
    return %c0_i32, %arg1 : i32, i32
  }
  func.func @transform_2(%arg0: i32, %arg1: i32) -> (i32, i32) {
    %c0_i32 = arith.constant 0 : i32
    %c0_i32_0 = arith.constant 0 : i32
    return %c0_i32, %arg1 : i32, i32
  }
  func.func @transform_3(%arg0: i32, %arg1: i32) -> (i32, i32, i32) {
    %c0_i32 = arith.constant 0 : i32
    %c0_i32_0 = arith.constant 0 : i32
    return %arg0, %c0_i32, %arg1 : i32, i32, i32
  }
}

module attributes {stable_mosaic.version = 11 : i64} {
  func.func @conv_stats_kernel(%arg0: i32, %arg1: i32, %arg2: memref<1x18x18x8xbf16, #tpu.memory_space<vmem>>, %arg3: memref<3x3x8x8xbf16, #tpu.memory_space<vmem>>, %arg4: memref<1x256x8xbf16, #tpu.memory_space<vmem>>, %arg5: memref<1x1x8xf32, #tpu.memory_space<vmem>>, %arg6: memref<1x1x8xf32, #tpu.memory_space<vmem>>) attributes {dimension_semantics = [#tpu.dimension_semantics<parallel>, #tpu.dimension_semantics<parallel>], iteration_bounds = array<i64: 2, 1>, scalar_prefetch = 0 : i64, scratch_operands = 0 : i64, tpu.core_type = #tpu.core_type<tc>, window_params = [{transform_indices = @transform_0, window_bounds = array<i64: 1, 18, 18, 8>}, {transform_indices = @transform_1, window_bounds = array<i64: 3, 3, 8, 8>}, {transform_indices = @transform_2, window_bounds = array<i64: 1, 256, 8>}, {transform_indices = @transform_3, window_bounds = array<i64: 1, 1, 8>}, {transform_indices = @transform_4, window_bounds = array<i64: 1, 1, 8>}]} {
    %cst = arith.constant 0.000000e+00 : f32
    %0 = vector.broadcast %cst : f32 to vector<128x8xf32>
    %c0 = arith.constant 0 : index
    %c0_0 = arith.constant 0 : index
    %c0_1 = arith.constant 0 : index
    %c0_2 = arith.constant 0 : index
    %1 = vector.load %arg2[%c0, %c0_0, %c0_1, %c0_2] : memref<1x18x18x8xbf16, #tpu.memory_space<vmem>>, vector<1x8x16x8xbf16>
    %2 = vector.shape_cast %1 : vector<1x8x16x8xbf16> to vector<8x16x8xbf16>
    %3 = vector.shape_cast %2 : vector<8x16x8xbf16> to vector<128x8xbf16>
    %c0_3 = arith.constant 0 : index
    %c0_4 = arith.constant 0 : index
    %c0_5 = arith.constant 0 : index
    %c0_6 = arith.constant 0 : index
    %4 = vector.load %arg3[%c0_3, %c0_4, %c0_5, %c0_6] : memref<3x3x8x8xbf16, #tpu.memory_space<vmem>>, vector<1x1x8x8xbf16>
    %5 = vector.shape_cast %4 : vector<1x1x8x8xbf16> to vector<8x8xbf16>
    %cst_7 = arith.constant dense<0.000000e+00> : vector<128x8xf32>
    %6 = tpu.matmul %3, %5, %cst_7 {dimension_numbers = #tpu.dot_dimension_numbers<[1], [0], [0], [1], [0, 0, 1, 1], [], []>} : vector<128x8xbf16>, vector<8x8xbf16>, vector<128x8xf32> -> vector<128x8xf32>
    %7 = arith.addf %0, %6 : vector<128x8xf32>
    %c0_8 = arith.constant 0 : index
    %c0_9 = arith.constant 0 : index
    %c1 = arith.constant 1 : index
    %c0_10 = arith.constant 0 : index
    %8 = vector.load %arg2[%c0_8, %c0_9, %c1, %c0_10] : memref<1x18x18x8xbf16, #tpu.memory_space<vmem>>, vector<1x8x16x8xbf16>
    %9 = vector.shape_cast %8 : vector<1x8x16x8xbf16> to vector<8x16x8xbf16>
    %10 = vector.shape_cast %9 : vector<8x16x8xbf16> to vector<128x8xbf16>
    %c0_11 = arith.constant 0 : index
    %c1_12 = arith.constant 1 : index
    %c0_13 = arith.constant 0 : index
    %c0_14 = arith.constant 0 : index
    %11 = vector.load %arg3[%c0_11, %c1_12, %c0_13, %c0_14] : memref<3x3x8x8xbf16, #tpu.memory_space<vmem>>, vector<1x1x8x8xbf16>
    %12 = vector.shape_cast %11 : vector<1x1x8x8xbf16> to vector<8x8xbf16>
    %cst_15 = arith.constant dense<0.000000e+00> : vector<128x8xf32>
    %13 = tpu.matmul %10, %12, %cst_15 {dimension_numbers = #tpu.dot_dimension_numbers<[1], [0], [0], [1], [0, 0, 1, 1], [], []>} : vector<128x8xbf16>, vector<8x8xbf16>, vector<128x8xf32> -> vector<128x8xf32>
    %14 = arith.addf %7, %13 : vector<128x8xf32>
    %c0_16 = arith.constant 0 : index
    %c0_17 = arith.constant 0 : index
    %c2 = arith.constant 2 : index
    %c0_18 = arith.constant 0 : index
    %15 = vector.load %arg2[%c0_16, %c0_17, %c2, %c0_18] : memref<1x18x18x8xbf16, #tpu.memory_space<vmem>>, vector<1x8x16x8xbf16>
    %16 = vector.shape_cast %15 : vector<1x8x16x8xbf16> to vector<8x16x8xbf16>
    %17 = vector.shape_cast %16 : vector<8x16x8xbf16> to vector<128x8xbf16>
    %c0_19 = arith.constant 0 : index
    %c2_20 = arith.constant 2 : index
    %c0_21 = arith.constant 0 : index
    %c0_22 = arith.constant 0 : index
    %18 = vector.load %arg3[%c0_19, %c2_20, %c0_21, %c0_22] : memref<3x3x8x8xbf16, #tpu.memory_space<vmem>>, vector<1x1x8x8xbf16>
    %19 = vector.shape_cast %18 : vector<1x1x8x8xbf16> to vector<8x8xbf16>
    %cst_23 = arith.constant dense<0.000000e+00> : vector<128x8xf32>
    %20 = tpu.matmul %17, %19, %cst_23 {dimension_numbers = #tpu.dot_dimension_numbers<[1], [0], [0], [1], [0, 0, 1, 1], [], []>} : vector<128x8xbf16>, vector<8x8xbf16>, vector<128x8xf32> -> vector<128x8xf32>
    %21 = arith.addf %14, %20 : vector<128x8xf32>
    %c0_24 = arith.constant 0 : index
    %c1_25 = arith.constant 1 : index
    %c0_26 = arith.constant 0 : index
    %c0_27 = arith.constant 0 : index
    %22 = vector.load %arg2[%c0_24, %c1_25, %c0_26, %c0_27] : memref<1x18x18x8xbf16, #tpu.memory_space<vmem>>, vector<1x8x16x8xbf16>
    %23 = vector.shape_cast %22 : vector<1x8x16x8xbf16> to vector<8x16x8xbf16>
    %24 = vector.shape_cast %23 : vector<8x16x8xbf16> to vector<128x8xbf16>
    %c1_28 = arith.constant 1 : index
    %c0_29 = arith.constant 0 : index
    %c0_30 = arith.constant 0 : index
    %c0_31 = arith.constant 0 : index
    %25 = vector.load %arg3[%c1_28, %c0_29, %c0_30, %c0_31] : memref<3x3x8x8xbf16, #tpu.memory_space<vmem>>, vector<1x1x8x8xbf16>
    %26 = vector.shape_cast %25 : vector<1x1x8x8xbf16> to vector<8x8xbf16>
    %cst_32 = arith.constant dense<0.000000e+00> : vector<128x8xf32>
    %27 = tpu.matmul %24, %26, %cst_32 {dimension_numbers = #tpu.dot_dimension_numbers<[1], [0], [0], [1], [0, 0, 1, 1], [], []>} : vector<128x8xbf16>, vector<8x8xbf16>, vector<128x8xf32> -> vector<128x8xf32>
    %28 = arith.addf %21, %27 : vector<128x8xf32>
    %c0_33 = arith.constant 0 : index
    %c1_34 = arith.constant 1 : index
    %c1_35 = arith.constant 1 : index
    %c0_36 = arith.constant 0 : index
    %29 = vector.load %arg2[%c0_33, %c1_34, %c1_35, %c0_36] : memref<1x18x18x8xbf16, #tpu.memory_space<vmem>>, vector<1x8x16x8xbf16>
    %30 = vector.shape_cast %29 : vector<1x8x16x8xbf16> to vector<8x16x8xbf16>
    %31 = vector.shape_cast %30 : vector<8x16x8xbf16> to vector<128x8xbf16>
    %c1_37 = arith.constant 1 : index
    %c1_38 = arith.constant 1 : index
    %c0_39 = arith.constant 0 : index
    %c0_40 = arith.constant 0 : index
    %32 = vector.load %arg3[%c1_37, %c1_38, %c0_39, %c0_40] : memref<3x3x8x8xbf16, #tpu.memory_space<vmem>>, vector<1x1x8x8xbf16>
    %33 = vector.shape_cast %32 : vector<1x1x8x8xbf16> to vector<8x8xbf16>
    %cst_41 = arith.constant dense<0.000000e+00> : vector<128x8xf32>
    %34 = tpu.matmul %31, %33, %cst_41 {dimension_numbers = #tpu.dot_dimension_numbers<[1], [0], [0], [1], [0, 0, 1, 1], [], []>} : vector<128x8xbf16>, vector<8x8xbf16>, vector<128x8xf32> -> vector<128x8xf32>
    %35 = arith.addf %28, %34 : vector<128x8xf32>
    %c0_42 = arith.constant 0 : index
    %c1_43 = arith.constant 1 : index
    %c2_44 = arith.constant 2 : index
    %c0_45 = arith.constant 0 : index
    %36 = vector.load %arg2[%c0_42, %c1_43, %c2_44, %c0_45] : memref<1x18x18x8xbf16, #tpu.memory_space<vmem>>, vector<1x8x16x8xbf16>
    %37 = vector.shape_cast %36 : vector<1x8x16x8xbf16> to vector<8x16x8xbf16>
    %38 = vector.shape_cast %37 : vector<8x16x8xbf16> to vector<128x8xbf16>
    %c1_46 = arith.constant 1 : index
    %c2_47 = arith.constant 2 : index
    %c0_48 = arith.constant 0 : index
    %c0_49 = arith.constant 0 : index
    %39 = vector.load %arg3[%c1_46, %c2_47, %c0_48, %c0_49] : memref<3x3x8x8xbf16, #tpu.memory_space<vmem>>, vector<1x1x8x8xbf16>
    %40 = vector.shape_cast %39 : vector<1x1x8x8xbf16> to vector<8x8xbf16>
    %cst_50 = arith.constant dense<0.000000e+00> : vector<128x8xf32>
    %41 = tpu.matmul %38, %40, %cst_50 {dimension_numbers = #tpu.dot_dimension_numbers<[1], [0], [0], [1], [0, 0, 1, 1], [], []>} : vector<128x8xbf16>, vector<8x8xbf16>, vector<128x8xf32> -> vector<128x8xf32>
    %42 = arith.addf %35, %41 : vector<128x8xf32>
    %c0_51 = arith.constant 0 : index
    %c2_52 = arith.constant 2 : index
    %c0_53 = arith.constant 0 : index
    %c0_54 = arith.constant 0 : index
    %43 = vector.load %arg2[%c0_51, %c2_52, %c0_53, %c0_54] : memref<1x18x18x8xbf16, #tpu.memory_space<vmem>>, vector<1x8x16x8xbf16>
    %44 = vector.shape_cast %43 : vector<1x8x16x8xbf16> to vector<8x16x8xbf16>
    %45 = vector.shape_cast %44 : vector<8x16x8xbf16> to vector<128x8xbf16>
    %c2_55 = arith.constant 2 : index
    %c0_56 = arith.constant 0 : index
    %c0_57 = arith.constant 0 : index
    %c0_58 = arith.constant 0 : index
    %46 = vector.load %arg3[%c2_55, %c0_56, %c0_57, %c0_58] : memref<3x3x8x8xbf16, #tpu.memory_space<vmem>>, vector<1x1x8x8xbf16>
    %47 = vector.shape_cast %46 : vector<1x1x8x8xbf16> to vector<8x8xbf16>
    %cst_59 = arith.constant dense<0.000000e+00> : vector<128x8xf32>
    %48 = tpu.matmul %45, %47, %cst_59 {dimension_numbers = #tpu.dot_dimension_numbers<[1], [0], [0], [1], [0, 0, 1, 1], [], []>} : vector<128x8xbf16>, vector<8x8xbf16>, vector<128x8xf32> -> vector<128x8xf32>
    %49 = arith.addf %42, %48 : vector<128x8xf32>
    %c0_60 = arith.constant 0 : index
    %c2_61 = arith.constant 2 : index
    %c1_62 = arith.constant 1 : index
    %c0_63 = arith.constant 0 : index
    %50 = vector.load %arg2[%c0_60, %c2_61, %c1_62, %c0_63] : memref<1x18x18x8xbf16, #tpu.memory_space<vmem>>, vector<1x8x16x8xbf16>
    %51 = vector.shape_cast %50 : vector<1x8x16x8xbf16> to vector<8x16x8xbf16>
    %52 = vector.shape_cast %51 : vector<8x16x8xbf16> to vector<128x8xbf16>
    %c2_64 = arith.constant 2 : index
    %c1_65 = arith.constant 1 : index
    %c0_66 = arith.constant 0 : index
    %c0_67 = arith.constant 0 : index
    %53 = vector.load %arg3[%c2_64, %c1_65, %c0_66, %c0_67] : memref<3x3x8x8xbf16, #tpu.memory_space<vmem>>, vector<1x1x8x8xbf16>
    %54 = vector.shape_cast %53 : vector<1x1x8x8xbf16> to vector<8x8xbf16>
    %cst_68 = arith.constant dense<0.000000e+00> : vector<128x8xf32>
    %55 = tpu.matmul %52, %54, %cst_68 {dimension_numbers = #tpu.dot_dimension_numbers<[1], [0], [0], [1], [0, 0, 1, 1], [], []>} : vector<128x8xbf16>, vector<8x8xbf16>, vector<128x8xf32> -> vector<128x8xf32>
    %56 = arith.addf %49, %55 : vector<128x8xf32>
    %c0_69 = arith.constant 0 : index
    %c2_70 = arith.constant 2 : index
    %c2_71 = arith.constant 2 : index
    %c0_72 = arith.constant 0 : index
    %57 = vector.load %arg2[%c0_69, %c2_70, %c2_71, %c0_72] : memref<1x18x18x8xbf16, #tpu.memory_space<vmem>>, vector<1x8x16x8xbf16>
    %58 = vector.shape_cast %57 : vector<1x8x16x8xbf16> to vector<8x16x8xbf16>
    %59 = vector.shape_cast %58 : vector<8x16x8xbf16> to vector<128x8xbf16>
    %c2_73 = arith.constant 2 : index
    %c2_74 = arith.constant 2 : index
    %c0_75 = arith.constant 0 : index
    %c0_76 = arith.constant 0 : index
    %60 = vector.load %arg3[%c2_73, %c2_74, %c0_75, %c0_76] : memref<3x3x8x8xbf16, #tpu.memory_space<vmem>>, vector<1x1x8x8xbf16>
    %61 = vector.shape_cast %60 : vector<1x1x8x8xbf16> to vector<8x8xbf16>
    %cst_77 = arith.constant dense<0.000000e+00> : vector<128x8xf32>
    %62 = tpu.matmul %59, %61, %cst_77 {dimension_numbers = #tpu.dot_dimension_numbers<[1], [0], [0], [1], [0, 0, 1, 1], [], []>} : vector<128x8xbf16>, vector<8x8xbf16>, vector<128x8xf32> -> vector<128x8xf32>
    %63 = arith.addf %56, %62 : vector<128x8xf32>
    %64 = arith.truncf %63 : vector<128x8xf32> to vector<128x8xbf16>
    %c0_78 = arith.constant 0 : index
    %c0_79 = arith.constant 0 : index
    %c0_80 = arith.constant 0 : index
    %65 = vector.load %arg4[%c0_78, %c0_79, %c0_80] : memref<1x256x8xbf16, #tpu.memory_space<vmem>>, vector<1x128x8xbf16>
    %66 = vector.shape_cast %65 : vector<1x128x8xbf16> to vector<128x8xbf16>
    %67 = vector.shape_cast %64 : vector<128x8xbf16> to vector<1x128x8xbf16>
    tpu.vector_store %arg4[%c0_78, %c0_79, %c0_80], %67 {strides = array<i32>} : memref<1x256x8xbf16, #tpu.memory_space<vmem>>, vector<1x128x8xbf16>,
    %cst_81 = arith.constant dense<0.000000e+00> : vector<8xf32>
    %68 = vector.multi_reduction <add>, %63, %cst_81 [0] : vector<128x8xf32> to vector<8xf32>
    %69 = vector.shape_cast %68 : vector<8xf32> to vector<1x8xf32>
    %cst_82 = arith.constant 7.812500e-03 : f32
    %70 = vector.broadcast %cst_82 : f32 to vector<1x8xf32>
    %71 = arith.mulf %69, %70 : vector<1x8xf32>
    %72 = vector.broadcast %71 : vector<1x8xf32> to vector<128x8xf32>
    %73 = arith.subf %63, %72 : vector<128x8xf32>
    %74 = arith.mulf %73, %73 : vector<128x8xf32>
    %cst_83 = arith.constant dense<0.000000e+00> : vector<8xf32>
    %75 = vector.multi_reduction <add>, %74, %cst_83 [0] : vector<128x8xf32> to vector<8xf32>
    %76 = vector.shape_cast %75 : vector<8xf32> to vector<1x8xf32>
    %cst_84 = arith.constant 0.000000e+00 : f32
    %77 = vector.broadcast %cst_84 : f32 to vector<128x8xf32>
    %c0_85 = arith.constant 0 : index
    %c8 = arith.constant 8 : index
    %c0_86 = arith.constant 0 : index
    %c0_87 = arith.constant 0 : index
    %78 = vector.load %arg2[%c0_85, %c8, %c0_86, %c0_87] : memref<1x18x18x8xbf16, #tpu.memory_space<vmem>>, vector<1x8x16x8xbf16>
    %79 = vector.shape_cast %78 : vector<1x8x16x8xbf16> to vector<8x16x8xbf16>
    %80 = vector.shape_cast %79 : vector<8x16x8xbf16> to vector<128x8xbf16>
    %c0_88 = arith.constant 0 : index
    %c0_89 = arith.constant 0 : index
    %c0_90 = arith.constant 0 : index
    %c0_91 = arith.constant 0 : index
    %81 = vector.load %arg3[%c0_88, %c0_89, %c0_90, %c0_91] : memref<3x3x8x8xbf16, #tpu.memory_space<vmem>>, vector<1x1x8x8xbf16>
    %82 = vector.shape_cast %81 : vector<1x1x8x8xbf16> to vector<8x8xbf16>
    %cst_92 = arith.constant dense<0.000000e+00> : vector<128x8xf32>
    %83 = tpu.matmul %80, %82, %cst_92 {dimension_numbers = #tpu.dot_dimension_numbers<[1], [0], [0], [1], [0, 0, 1, 1], [], []>} : vector<128x8xbf16>, vector<8x8xbf16>, vector<128x8xf32> -> vector<128x8xf32>
    %84 = arith.addf %77, %83 : vector<128x8xf32>
    %c0_93 = arith.constant 0 : index
    %c8_94 = arith.constant 8 : index
    %c1_95 = arith.constant 1 : index
    %c0_96 = arith.constant 0 : index
    %85 = vector.load %arg2[%c0_93, %c8_94, %c1_95, %c0_96] : memref<1x18x18x8xbf16, #tpu.memory_space<vmem>>, vector<1x8x16x8xbf16>
    %86 = vector.shape_cast %85 : vector<1x8x16x8xbf16> to vector<8x16x8xbf16>
    %87 = vector.shape_cast %86 : vector<8x16x8xbf16> to vector<128x8xbf16>
    %c0_97 = arith.constant 0 : index
    %c1_98 = arith.constant 1 : index
    %c0_99 = arith.constant 0 : index
    %c0_100 = arith.constant 0 : index
    %88 = vector.load %arg3[%c0_97, %c1_98, %c0_99, %c0_100] : memref<3x3x8x8xbf16, #tpu.memory_space<vmem>>, vector<1x1x8x8xbf16>
    %89 = vector.shape_cast %88 : vector<1x1x8x8xbf16> to vector<8x8xbf16>
    %cst_101 = arith.constant dense<0.000000e+00> : vector<128x8xf32>
    %90 = tpu.matmul %87, %89, %cst_101 {dimension_numbers = #tpu.dot_dimension_numbers<[1], [0], [0], [1], [0, 0, 1, 1], [], []>} : vector<128x8xbf16>, vector<8x8xbf16>, vector<128x8xf32> -> vector<128x8xf32>
    %91 = arith.addf %84, %90 : vector<128x8xf32>
    %c0_102 = arith.constant 0 : index
    %c8_103 = arith.constant 8 : index
    %c2_104 = arith.constant 2 : index
    %c0_105 = arith.constant 0 : index
    %92 = vector.load %arg2[%c0_102, %c8_103, %c2_104, %c0_105] : memref<1x18x18x8xbf16, #tpu.memory_space<vmem>>, vector<1x8x16x8xbf16>
    %93 = vector.shape_cast %92 : vector<1x8x16x8xbf16> to vector<8x16x8xbf16>
    %94 = vector.shape_cast %93 : vector<8x16x8xbf16> to vector<128x8xbf16>
    %c0_106 = arith.constant 0 : index
    %c2_107 = arith.constant 2 : index
    %c0_108 = arith.constant 0 : index
    %c0_109 = arith.constant 0 : index
    %95 = vector.load %arg3[%c0_106, %c2_107, %c0_108, %c0_109] : memref<3x3x8x8xbf16, #tpu.memory_space<vmem>>, vector<1x1x8x8xbf16>
    %96 = vector.shape_cast %95 : vector<1x1x8x8xbf16> to vector<8x8xbf16>
    %cst_110 = arith.constant dense<0.000000e+00> : vector<128x8xf32>
    %97 = tpu.matmul %94, %96, %cst_110 {dimension_numbers = #tpu.dot_dimension_numbers<[1], [0], [0], [1], [0, 0, 1, 1], [], []>} : vector<128x8xbf16>, vector<8x8xbf16>, vector<128x8xf32> -> vector<128x8xf32>
    %98 = arith.addf %91, %97 : vector<128x8xf32>
    %c0_111 = arith.constant 0 : index
    %c9 = arith.constant 9 : index
    %c0_112 = arith.constant 0 : index
    %c0_113 = arith.constant 0 : index
    %99 = vector.load %arg2[%c0_111, %c9, %c0_112, %c0_113] : memref<1x18x18x8xbf16, #tpu.memory_space<vmem>>, vector<1x8x16x8xbf16>
    %100 = vector.shape_cast %99 : vector<1x8x16x8xbf16> to vector<8x16x8xbf16>
    %101 = vector.shape_cast %100 : vector<8x16x8xbf16> to vector<128x8xbf16>
    %c1_114 = arith.constant 1 : index
    %c0_115 = arith.constant 0 : index
    %c0_116 = arith.constant 0 : index
    %c0_117 = arith.constant 0 : index
    %102 = vector.load %arg3[%c1_114, %c0_115, %c0_116, %c0_117] : memref<3x3x8x8xbf16, #tpu.memory_space<vmem>>, vector<1x1x8x8xbf16>
    %103 = vector.shape_cast %102 : vector<1x1x8x8xbf16> to vector<8x8xbf16>
    %cst_118 = arith.constant dense<0.000000e+00> : vector<128x8xf32>
    %104 = tpu.matmul %101, %103, %cst_118 {dimension_numbers = #tpu.dot_dimension_numbers<[1], [0], [0], [1], [0, 0, 1, 1], [], []>} : vector<128x8xbf16>, vector<8x8xbf16>, vector<128x8xf32> -> vector<128x8xf32>
    %105 = arith.addf %98, %104 : vector<128x8xf32>
    %c0_119 = arith.constant 0 : index
    %c9_120 = arith.constant 9 : index
    %c1_121 = arith.constant 1 : index
    %c0_122 = arith.constant 0 : index
    %106 = vector.load %arg2[%c0_119, %c9_120, %c1_121, %c0_122] : memref<1x18x18x8xbf16, #tpu.memory_space<vmem>>, vector<1x8x16x8xbf16>
    %107 = vector.shape_cast %106 : vector<1x8x16x8xbf16> to vector<8x16x8xbf16>
    %108 = vector.shape_cast %107 : vector<8x16x8xbf16> to vector<128x8xbf16>
    %c1_123 = arith.constant 1 : index
    %c1_124 = arith.constant 1 : index
    %c0_125 = arith.constant 0 : index
    %c0_126 = arith.constant 0 : index
    %109 = vector.load %arg3[%c1_123, %c1_124, %c0_125, %c0_126] : memref<3x3x8x8xbf16, #tpu.memory_space<vmem>>, vector<1x1x8x8xbf16>
    %110 = vector.shape_cast %109 : vector<1x1x8x8xbf16> to vector<8x8xbf16>
    %cst_127 = arith.constant dense<0.000000e+00> : vector<128x8xf32>
    %111 = tpu.matmul %108, %110, %cst_127 {dimension_numbers = #tpu.dot_dimension_numbers<[1], [0], [0], [1], [0, 0, 1, 1], [], []>} : vector<128x8xbf16>, vector<8x8xbf16>, vector<128x8xf32> -> vector<128x8xf32>
    %112 = arith.addf %105, %111 : vector<128x8xf32>
    %c0_128 = arith.constant 0 : index
    %c9_129 = arith.constant 9 : index
    %c2_130 = arith.constant 2 : index
    %c0_131 = arith.constant 0 : index
    %113 = vector.load %arg2[%c0_128, %c9_129, %c2_130, %c0_131] : memref<1x18x18x8xbf16, #tpu.memory_space<vmem>>, vector<1x8x16x8xbf16>
    %114 = vector.shape_cast %113 : vector<1x8x16x8xbf16> to vector<8x16x8xbf16>
    %115 = vector.shape_cast %114 : vector<8x16x8xbf16> to vector<128x8xbf16>
    %c1_132 = arith.constant 1 : index
    %c2_133 = arith.constant 2 : index
    %c0_134 = arith.constant 0 : index
    %c0_135 = arith.constant 0 : index
    %116 = vector.load %arg3[%c1_132, %c2_133, %c0_134, %c0_135] : memref<3x3x8x8xbf16, #tpu.memory_space<vmem>>, vector<1x1x8x8xbf16>
    %117 = vector.shape_cast %116 : vector<1x1x8x8xbf16> to vector<8x8xbf16>
    %cst_136 = arith.constant dense<0.000000e+00> : vector<128x8xf32>
    %118 = tpu.matmul %115, %117, %cst_136 {dimension_numbers = #tpu.dot_dimension_numbers<[1], [0], [0], [1], [0, 0, 1, 1], [], []>} : vector<128x8xbf16>, vector<8x8xbf16>, vector<128x8xf32> -> vector<128x8xf32>
    %119 = arith.addf %112, %118 : vector<128x8xf32>
    %c0_137 = arith.constant 0 : index
    %c10 = arith.constant 10 : index
    %c0_138 = arith.constant 0 : index
    %c0_139 = arith.constant 0 : index
    %120 = vector.load %arg2[%c0_137, %c10, %c0_138, %c0_139] : memref<1x18x18x8xbf16, #tpu.memory_space<vmem>>, vector<1x8x16x8xbf16>
    %121 = vector.shape_cast %120 : vector<1x8x16x8xbf16> to vector<8x16x8xbf16>
    %122 = vector.shape_cast %121 : vector<8x16x8xbf16> to vector<128x8xbf16>
    %c2_140 = arith.constant 2 : index
    %c0_141 = arith.constant 0 : index
    %c0_142 = arith.constant 0 : index
    %c0_143 = arith.constant 0 : index
    %123 = vector.load %arg3[%c2_140, %c0_141, %c0_142, %c0_143] : memref<3x3x8x8xbf16, #tpu.memory_space<vmem>>, vector<1x1x8x8xbf16>
    %124 = vector.shape_cast %123 : vector<1x1x8x8xbf16> to vector<8x8xbf16>
    %cst_144 = arith.constant dense<0.000000e+00> : vector<128x8xf32>
    %125 = tpu.matmul %122, %124, %cst_144 {dimension_numbers = #tpu.dot_dimension_numbers<[1], [0], [0], [1], [0, 0, 1, 1], [], []>} : vector<128x8xbf16>, vector<8x8xbf16>, vector<128x8xf32> -> vector<128x8xf32>
    %126 = arith.addf %119, %125 : vector<128x8xf32>
    %c0_145 = arith.constant 0 : index
    %c10_146 = arith.constant 10 : index
    %c1_147 = arith.constant 1 : index
    %c0_148 = arith.constant 0 : index
    %127 = vector.load %arg2[%c0_145, %c10_146, %c1_147, %c0_148] : memref<1x18x18x8xbf16, #tpu.memory_space<vmem>>, vector<1x8x16x8xbf16>
    %128 = vector.shape_cast %127 : vector<1x8x16x8xbf16> to vector<8x16x8xbf16>
    %129 = vector.shape_cast %128 : vector<8x16x8xbf16> to vector<128x8xbf16>
    %c2_149 = arith.constant 2 : index
    %c1_150 = arith.constant 1 : index
    %c0_151 = arith.constant 0 : index
    %c0_152 = arith.constant 0 : index
    %130 = vector.load %arg3[%c2_149, %c1_150, %c0_151, %c0_152] : memref<3x3x8x8xbf16, #tpu.memory_space<vmem>>, vector<1x1x8x8xbf16>
    %131 = vector.shape_cast %130 : vector<1x1x8x8xbf16> to vector<8x8xbf16>
    %cst_153 = arith.constant dense<0.000000e+00> : vector<128x8xf32>
    %132 = tpu.matmul %129, %131, %cst_153 {dimension_numbers = #tpu.dot_dimension_numbers<[1], [0], [0], [1], [0, 0, 1, 1], [], []>} : vector<128x8xbf16>, vector<8x8xbf16>, vector<128x8xf32> -> vector<128x8xf32>
    %133 = arith.addf %126, %132 : vector<128x8xf32>
    %c0_154 = arith.constant 0 : index
    %c10_155 = arith.constant 10 : index
    %c2_156 = arith.constant 2 : index
    %c0_157 = arith.constant 0 : index
    %134 = vector.load %arg2[%c0_154, %c10_155, %c2_156, %c0_157] : memref<1x18x18x8xbf16, #tpu.memory_space<vmem>>, vector<1x8x16x8xbf16>
    %135 = vector.shape_cast %134 : vector<1x8x16x8xbf16> to vector<8x16x8xbf16>
    %136 = vector.shape_cast %135 : vector<8x16x8xbf16> to vector<128x8xbf16>
    %c2_158 = arith.constant 2 : index
    %c2_159 = arith.constant 2 : index
    %c0_160 = arith.constant 0 : index
    %c0_161 = arith.constant 0 : index
    %137 = vector.load %arg3[%c2_158, %c2_159, %c0_160, %c0_161] : memref<3x3x8x8xbf16, #tpu.memory_space<vmem>>, vector<1x1x8x8xbf16>
    %138 = vector.shape_cast %137 : vector<1x1x8x8xbf16> to vector<8x8xbf16>
    %cst_162 = arith.constant dense<0.000000e+00> : vector<128x8xf32>
    %139 = tpu.matmul %136, %138, %cst_162 {dimension_numbers = #tpu.dot_dimension_numbers<[1], [0], [0], [1], [0, 0, 1, 1], [], []>} : vector<128x8xbf16>, vector<8x8xbf16>, vector<128x8xf32> -> vector<128x8xf32>
    %140 = arith.addf %133, %139 : vector<128x8xf32>
    %141 = arith.truncf %140 : vector<128x8xf32> to vector<128x8xbf16>
    %c0_163 = arith.constant 0 : index
    %c128 = arith.constant 128 : index
    %c0_164 = arith.constant 0 : index
    %142 = vector.load %arg4[%c0_163, %c128, %c0_164] : memref<1x256x8xbf16, #tpu.memory_space<vmem>>, vector<1x128x8xbf16>
    %143 = vector.shape_cast %142 : vector<1x128x8xbf16> to vector<128x8xbf16>
    %144 = vector.shape_cast %141 : vector<128x8xbf16> to vector<1x128x8xbf16>
    tpu.vector_store %arg4[%c0_163, %c128, %c0_164], %144 {strides = array<i32>} : memref<1x256x8xbf16, #tpu.memory_space<vmem>>, vector<1x128x8xbf16>,
    %cst_165 = arith.constant dense<0.000000e+00> : vector<8xf32>
    %145 = vector.multi_reduction <add>, %140, %cst_165 [0] : vector<128x8xf32> to vector<8xf32>
    %146 = vector.shape_cast %145 : vector<8xf32> to vector<1x8xf32>
    %cst_166 = arith.constant 7.812500e-03 : f32
    %147 = vector.broadcast %cst_166 : f32 to vector<1x8xf32>
    %148 = arith.mulf %146, %147 : vector<1x8xf32>
    %149 = vector.broadcast %148 : vector<1x8xf32> to vector<128x8xf32>
    %150 = arith.subf %140, %149 : vector<128x8xf32>
    %151 = arith.mulf %150, %150 : vector<128x8xf32>
    %cst_167 = arith.constant dense<0.000000e+00> : vector<8xf32>
    %152 = vector.multi_reduction <add>, %151, %cst_167 [0] : vector<128x8xf32> to vector<8xf32>
    %153 = vector.shape_cast %152 : vector<8xf32> to vector<1x8xf32>
    %154 = arith.subf %148, %71 : vector<1x8xf32>
    %cst_168 = arith.constant 5.000000e-01 : f32
    %155 = vector.broadcast %cst_168 : f32 to vector<1x8xf32>
    %156 = arith.mulf %154, %155 : vector<1x8xf32>
    %157 = arith.addf %71, %156 : vector<1x8xf32>
    %158 = arith.addf %76, %153 : vector<1x8xf32>
    %159 = arith.mulf %154, %154 : vector<1x8xf32>
    %cst_169 = arith.constant 6.400000e+01 : f32
    %160 = vector.broadcast %cst_169 : f32 to vector<1x8xf32>
    %161 = arith.mulf %159, %160 : vector<1x8xf32>
    %162 = arith.addf %158, %161 : vector<1x8xf32>
    %c0_170 = arith.constant 0 : index
    %c0_171 = arith.constant 0 : index
    %c0_172 = arith.constant 0 : index
    %163 = vector.load %arg5[%c0_170, %c0_171, %c0_172] : memref<1x1x8xf32, #tpu.memory_space<vmem>>, vector<1x1x8xf32>
    %164 = vector.shape_cast %163 : vector<1x1x8xf32> to vector<1x8xf32>
    %165 = vector.shape_cast %157 : vector<1x8xf32> to vector<1x1x8xf32>
    tpu.vector_store %arg5[%c0_170, %c0_171, %c0_172], %165 {strides = array<i32>} : memref<1x1x8xf32, #tpu.memory_space<vmem>>, vector<1x1x8xf32>,
    %c0_173 = arith.constant 0 : index
    %c0_174 = arith.constant 0 : index
    %c0_175 = arith.constant 0 : index
    %166 = vector.load %arg6[%c0_173, %c0_174, %c0_175] : memref<1x1x8xf32, #tpu.memory_space<vmem>>, vector<1x1x8xf32>
    %167 = vector.shape_cast %166 : vector<1x1x8xf32> to vector<1x8xf32>
    %168 = vector.shape_cast %162 : vector<1x8xf32> to vector<1x1x8xf32>
    tpu.vector_store %arg6[%c0_173, %c0_174, %c0_175], %168 {strides = array<i32>} : memref<1x1x8xf32, #tpu.memory_space<vmem>>, vector<1x1x8xf32>,
    return
  }
  func.func @transform_0(%arg0: i32, %arg1: i32) -> (i32, i32, i32, i32) {
    %c0_i32 = arith.constant 0 : i32
    %c0_i32_0 = arith.constant 0 : i32
    %c0_i32_1 = arith.constant 0 : i32
    %c0_i32_2 = arith.constant 0 : i32
    return %arg0, %c0_i32, %c0_i32_0, %c0_i32_1 : i32, i32, i32, i32
  }
  func.func @transform_1(%arg0: i32, %arg1: i32) -> (i32, i32, i32, i32) {
    %c0_i32 = arith.constant 0 : i32
    %c0_i32_0 = arith.constant 0 : i32
    %c0_i32_1 = arith.constant 0 : i32
    %c0_i32_2 = arith.constant 0 : i32
    return %c0_i32, %c0_i32_0, %c0_i32_1, %arg1 : i32, i32, i32, i32
  }
  func.func @transform_2(%arg0: i32, %arg1: i32) -> (i32, i32, i32) {
    %c0_i32 = arith.constant 0 : i32
    %c0_i32_0 = arith.constant 0 : i32
    return %arg0, %c0_i32, %arg1 : i32, i32, i32
  }
  func.func @transform_3(%arg0: i32, %arg1: i32) -> (i32, i32, i32) {
    %c0_i32 = arith.constant 0 : i32
    %c0_i32_0 = arith.constant 0 : i32
    return %arg0, %c0_i32, %arg1 : i32, i32, i32
  }
  func.func @transform_4(%arg0: i32, %arg1: i32) -> (i32, i32, i32) {
    %c0_i32 = arith.constant 0 : i32
    %c0_i32_0 = arith.constant 0 : i32
    return %arg0, %c0_i32, %arg1 : i32, i32, i32
  }
}

</mosaic_0001>

<bundles_post_ra>
// kernel: convbn_forward.3
= control target key start
LH: loop header
LB: loop body
LE: loop exit
PB: predicated region body
PF: predicated region fallthrough
CT: control target
= control target key end

     0   :  { %s677_s12 = smov 0   ;;  %s679_s13 = smov 0   ;;  %s868_s0 = inlined_call_operand.vmem [shape: bf16[2,256,8], index: 0, kind: input, shape index: {}]   ;;  %s869_s1 = inlined_call_operand.vmem [shape: f32[1,8], index: 1, kind: input, shape index: {}]   ;;  %s870_s2 = inlined_call_operand.vmem [shape: f32[1,8], index: 2, kind: input, shape index: {}]   ;;  %s871_s3 = inlined_call_operand.vmem [shape: f32[2,256,8], index: 3, kind: output, shape index: {}]  }
   0x1   :  { %s681_s14 = smov 0  }
   0x2 LB: > { %s25_s15 = sadd.s32 1, %s651_s13  ;;  %p519_p0 = scmp.ge.s32.totalorder %s655_s14, 1  ;;  %s655_s14 = sphi %s681_s14, %s13_s14   ;;  %s651_s13 = sphi %s679_s13, %s873_s13   ;;  %s647_s12 = sphi %s677_s12, %s872_s12  }
   0x3   : > { %p27_p1 = scmp.ge.s32.totalorder %s25_s15, 2  ;;  %p172_p2 = scmp.lt.s32.totalorder %s655_s14, 3 }
   0x5   : > { %s875_s15 = smov (%p27_p1, %s25_s15), 0  ;;  %p173_p3 = pnand %p519_p0, %p172_p2 }
   0x6   : > { %p208_p4 = scmp.lt.s32.totalorder (!%p173_p3), %s647_s12, 1 }
   0x7   : > { %176 = sbr.rel (%p173_p3) target bundleno = 44 (0x2c), region = 32 }
   0xc   : > { %s877_s12 = smov (!%p208_p4, %s647_s12), 1  ;;  %v703_v0 = vld [vmem:[%s869_s1] ss:$0 sm:$0xff]  ;;  %vm372_vm0 = vcmask 64512  }
   0xd   : > { %s528_s16 = sshll.u32 %s877_s12, 7  ;;  %s529_s22 = sshll.u32 %s877_s12, 8  ;;  %v712_v9 = vld [vmem:[%s870_s2] ss:$0 sm:$0xff] }
   0xe   : > { %s698_s19 = scalar_lea.vmem %s868_s0, %s528_s16  ;;  %s721_s27 = scalar_lea.vmem %s871_s3, %s529_s22 }
   0xf   : > { %v531_v1 = vld [vmem:[%s698_s19] sm:$0xff]   ;;  %v594_v2 = vld [vmem:[%s698_s19 + $0x8] sm:$0xff]   ;;  %v595_v3 = vld [vmem:[%s698_s19 + $0x10] sm:$0xff]  }
  0x10   : > { %v532_v4 = vunpack.c.l.bf16 %v531_v1  ;;  %v533_v5 = vunpack.c.h.bf16 %v531_v1  ;;  %v536_v6 = vunpack.c.l.bf16 %v594_v2  ;;  %v537_v7 = vunpack.c.h.bf16 %v594_v2  ;;  %v596_v8 = vld [vmem:[%s698_s19 + $0x18] sm:$0xff]   ;;  %v597_v22 = vld [vmem:[%s698_s19 + $0x20] sm:$0xff]   ;;  %v598_v23 = vld [vmem:[%s698_s19 + $0x28] sm:$0xff]  }
  0x11   : > { %v540_v10 = vunpack.c.l.bf16 %v595_v3  ;;  %v541_v11 = vunpack.c.h.bf16 %v595_v3  ;;  %v544_v12 = vunpack.c.l.bf16 %v596_v8  ;;  %v545_v13 = vunpack.c.h.bf16 %v596_v8  ;;  %v599_v28 = vld [vmem:[%s698_s19 + $0x30] sm:$0xff]   ;;  %v600_v29 = vld [vmem:[%s698_s19 + $0x38] sm:$0xff]   ;;  %v601_v50 = vld [vmem:[%s698_s19 + $0x40] sm:$0xff]  }
  0x12   : > { %v302_v14 = vmul.f32 %v532_v4, %v703_v0  ;;  %v303_v15 = vmul.f32 %v533_v5, %v703_v0  ;;  %v304_v16 = vmul.f32 %v536_v6, %v703_v0  ;;  %v305_v17 = vmul.f32 %v537_v7, %v703_v0  ;;  %v602_v51 = vld [vmem:[%s698_s19 + $0x48] sm:$0xff]   ;;  %v603_v56 = vld [vmem:[%s698_s19 + $0x50] sm:$0xff]   ;;  %v604_v57 = vld [vmem:[%s698_s19 + $0x58] sm:$0xff]  }
  0x13   : > { %v306_v18 = vmul.f32 %v540_v10, %v703_v0  ;;  %v307_v19 = vmul.f32 %v541_v11, %v703_v0  ;;  %v308_v20 = vmul.f32 %v544_v12, %v703_v0  ;;  %v309_v21 = vmul.f32 %v545_v13, %v703_v0 }
  0x14   : > { %v340_v24 = vadd.f32 %v712_v9, %v302_v14  ;;  %v341_v25 = vadd.f32 %v712_v9, %v303_v15  ;;  %v342_v26 = vadd.f32 %v712_v9, %v304_v16  ;;  %v343_v27 = vadd.f32 %v712_v9, %v305_v17  ;;  %v605_v16 = vld [vmem:[%s698_s19 + $0x60] sm:$0xff]   ;;  %v606_v17 = vld [vmem:[%s698_s19 + $0x68] sm:$0xff]  }
  0x15   : > { %v344_v30 = vadd.f32 %v712_v9, %v306_v18  ;;  %v345_v31 = vadd.f32 %v712_v9, %v307_v19  ;;  %v346_v32 = vadd.f32 %v712_v9, %v308_v20  ;;  %v347_v33 = vadd.f32 %v712_v9, %v309_v21 }
  0x16   : > { %373 = vst.msk [vmem:[%s721_s27] sm:$0xff] %vm372_vm0, %v340_v24  ;;  %374 = vst.msk [vmem:[%s721_s27 + $0x8] sm:$0xff] %vm372_vm0, %v341_v25  ;;  %v548_v34 = vunpack.c.l.bf16 %v597_v22  ;;  %v549_v35 = vunpack.c.h.bf16 %v597_v22  ;;  %v552_v36 = vunpack.c.l.bf16 %v598_v23  ;;  %v553_v37 = vunpack.c.h.bf16 %v598_v23  ;;  %v607_v22 = vld [vmem:[%s698_s19 + $0x70] sm:$0xff]   ;;  %v608_v23 = vld [vmem:[%s698_s19 + $0x78] sm:$0xff]  }
  0x17   : > { %375 = vst.msk [vmem:[%s721_s27 + $0x10] sm:$0xff] %vm372_vm0, %v342_v26  ;;  %376 = vst.msk [vmem:[%s721_s27 + $0x18] sm:$0xff] %vm372_vm0, %v343_v27  ;;  %v556_v38 = vunpack.c.l.bf16 %v599_v28  ;;  %v557_v39 = vunpack.c.h.bf16 %v599_v28  ;;  %v560_v40 = vunpack.c.l.bf16 %v600_v29  ;;  %v561_v41 = vunpack.c.h.bf16 %v600_v29 }
  0x18   : > { %377 = vst.msk [vmem:[%s721_s27 + $0x20] sm:$0xff] %vm372_vm0, %v344_v30  ;;  %378 = vst.msk [vmem:[%s721_s27 + $0x28] sm:$0xff] %vm372_vm0, %v345_v31  ;;  %v310_v42 = vmul.f32 %v548_v34, %v703_v0  ;;  %v311_v43 = vmul.f32 %v549_v35, %v703_v0  ;;  %v312_v44 = vmul.f32 %v552_v36, %v703_v0  ;;  %v564_v62 = vunpack.c.l.bf16 %v601_v50 }
  0x19   : > { %379 = vst.msk [vmem:[%s721_s27 + $0x30] sm:$0xff] %vm372_vm0, %v346_v32  ;;  %380 = vst.msk [vmem:[%s721_s27 + $0x38] sm:$0xff] %vm372_vm0, %v347_v33  ;;  %v313_v45 = vmul.f32 %v553_v37, %v703_v0  ;;  %v314_v46 = vmul.f32 %v556_v38, %v703_v0  ;;  %v315_v47 = vmul.f32 %v557_v39, %v703_v0  ;;  %v565_v63 = vunpack.c.h.bf16 %v601_v50 }
  0x1a   : > { %v316_v48 = vmul.f32 %v560_v40, %v703_v0  ;;  %v317_v49 = vmul.f32 %v561_v41, %v703_v0  ;;  %v348_v52 = vadd.f32 %v712_v9, %v310_v42  ;;  %v349_v53 = vadd.f32 %v712_v9, %v311_v43 }
  0x1b   : > { %v350_v54 = vadd.f32 %v712_v9, %v312_v44  ;;  %v351_v55 = vadd.f32 %v712_v9, %v313_v45  ;;  %v352_v58 = vadd.f32 %v712_v9, %v314_v46  ;;  %v353_v59 = vadd.f32 %v712_v9, %v315_v47 }
  0x1c   : > { %v354_v60 = vadd.f32 %v712_v9, %v316_v48  ;;  %v355_v61 = vadd.f32 %v712_v9, %v317_v49  ;;  %381 = vst.msk [vmem:[%s721_s27 + $0x40] sm:$0xff] %vm372_vm0, %v348_v52  ;;  %382 = vst.msk [vmem:[%s721_s27 + $0x48] sm:$0xff] %vm372_vm0, %v349_v53  ;;  %v568_v1 = vunpack.c.l.bf16 %v602_v51  ;;  %v569_v2 = vunpack.c.h.bf16 %v602_v51 }
  0x1d   : > { %383 = vst.msk [vmem:[%s721_s27 + $0x50] sm:$0xff] %vm372_vm0, %v350_v54  ;;  %384 = vst.msk [vmem:[%s721_s27 + $0x58] sm:$0xff] %vm372_vm0, %v351_v55  ;;  %v572_v3 = vunpack.c.l.bf16 %v603_v56  ;;  %v573_v4 = vunpack.c.h.bf16 %v603_v56  ;;  %v576_v5 = vunpack.c.l.bf16 %v604_v57  ;;  %v577_v6 = vunpack.c.h.bf16 %v604_v57 }
  0x1e   : > { %385 = vst.msk [vmem:[%s721_s27 + $0x60] sm:$0xff] %vm372_vm0, %v352_v58  ;;  %386 = vst.msk [vmem:[%s721_s27 + $0x68] sm:$0xff] %vm372_vm0, %v353_v59  ;;  %v318_v7 = vmul.f32 %v564_v62, %v703_v0  ;;  %v319_v8 = vmul.f32 %v565_v63, %v703_v0  ;;  %v320_v10 = vmul.f32 %v568_v1, %v703_v0  ;;  %v580_v28 = vunpack.c.l.bf16 %v605_v16 }
  0x1f   : > { %387 = vst.msk [vmem:[%s721_s27 + $0x70] sm:$0xff] %vm372_vm0, %v354_v60  ;;  %388 = vst.msk [vmem:[%s721_s27 + $0x78] sm:$0xff] %vm372_vm0, %v355_v61  ;;  %v321_v11 = vmul.f32 %v569_v2, %v703_v0  ;;  %v322_v12 = vmul.f32 %v572_v3, %v703_v0  ;;  %v323_v13 = vmul.f32 %v573_v4, %v703_v0  ;;  %v581_v29 = vunpack.c.h.bf16 %v605_v16 }
  0x20   : > { %v324_v14 = vmul.f32 %v576_v5, %v703_v0  ;;  %v325_v15 = vmul.f32 %v577_v6, %v703_v0  ;;  %v356_v18 = vadd.f32 %v712_v9, %v318_v7  ;;  %v357_v19 = vadd.f32 %v712_v9, %v319_v8 }
  0x21   : > { %v358_v20 = vadd.f32 %v712_v9, %v320_v10  ;;  %v359_v21 = vadd.f32 %v712_v9, %v321_v11  ;;  %v360_v24 = vadd.f32 %v712_v9, %v322_v12  ;;  %v361_v25 = vadd.f32 %v712_v9, %v323_v13 }
  0x22   : > { %v362_v26 = vadd.f32 %v712_v9, %v324_v14  ;;  %v363_v27 = vadd.f32 %v712_v9, %v325_v15  ;;  %389 = vst.msk [vmem:[%s721_s27 + $0x80] sm:$0xff] %vm372_vm0, %v356_v18  ;;  %390 = vst.msk [vmem:[%s721_s27 + $0x88] sm:$0xff] %vm372_vm0, %v357_v19  ;;  %v584_v30 = vunpack.c.l.bf16 %v606_v17  ;;  %v585_v31 = vunpack.c.h.bf16 %v606_v17 }
  0x23   : > { %391 = vst.msk [vmem:[%s721_s27 + $0x90] sm:$0xff] %vm372_vm0, %v358_v20  ;;  %392 = vst.msk [vmem:[%s721_s27 + $0x98] sm:$0xff] %vm372_vm0, %v359_v21  ;;  %v588_v32 = vunpack.c.l.bf16 %v607_v22  ;;  %v589_v33 = vunpack.c.h.bf16 %v607_v22  ;;  %v592_v34 = vunpack.c.l.bf16 %v608_v23  ;;  %v593_v35 = vunpack.c.h.bf16 %v608_v23 }
  0x24   : > { %393 = vst.msk [vmem:[%s721_s27 + $0xa0] sm:$0xff] %vm372_vm0, %v360_v24  ;;  %394 = vst.msk [vmem:[%s721_s27 + $0xa8] sm:$0xff] %vm372_vm0, %v361_v25  ;;  %v326_v36 = vmul.f32 %v580_v28, %v703_v0  ;;  %v327_v37 = vmul.f32 %v581_v29, %v703_v0  ;;  %v328_v38 = vmul.f32 %v584_v30, %v703_v0 }
  0x25   : > { %395 = vst.msk [vmem:[%s721_s27 + $0xb0] sm:$0xff] %vm372_vm0, %v362_v26  ;;  %396 = vst.msk [vmem:[%s721_s27 + $0xb8] sm:$0xff] %vm372_vm0, %v363_v27  ;;  %v329_v39 = vmul.f32 %v585_v31, %v703_v0  ;;  %v330_v40 = vmul.f32 %v588_v32, %v703_v0  ;;  %v331_v41 = vmul.f32 %v589_v33, %v703_v0 }
  0x26   : > { %v332_v42 = vmul.f32 %v592_v34, %v703_v0  ;;  %v333_v43 = vmul.f32 %v593_v35, %v703_v0  ;;  %v364_v44 = vadd.f32 %v712_v9, %v326_v36  ;;  %v365_v45 = vadd.f32 %v712_v9, %v327_v37 }
  0x27   : > { %v366_v46 = vadd.f32 %v712_v9, %v328_v38  ;;  %v367_v47 = vadd.f32 %v712_v9, %v329_v39  ;;  %v368_v48 = vadd.f32 %v712_v9, %v330_v40  ;;  %v369_v49 = vadd.f32 %v712_v9, %v331_v41 }
  0x28   : > { %v370_v50 = vadd.f32 %v712_v9, %v332_v42  ;;  %v371_v51 = vadd.f32 %v712_v9, %v333_v43  ;;  %397 = vst.msk [vmem:[%s721_s27 + $0xc0] sm:$0xff] %vm372_vm0, %v364_v44  ;;  %398 = vst.msk [vmem:[%s721_s27 + $0xc8] sm:$0xff] %vm372_vm0, %v365_v45 }
  0x29   : > { %399 = vst.msk [vmem:[%s721_s27 + $0xd0] sm:$0xff] %vm372_vm0, %v366_v46  ;;  %400 = vst.msk [vmem:[%s721_s27 + $0xd8] sm:$0xff] %vm372_vm0, %v367_v47 }
  0x2a   : > { %401 = vst.msk [vmem:[%s721_s27 + $0xe0] sm:$0xff] %vm372_vm0, %v368_v48  ;;  %402 = vst.msk [vmem:[%s721_s27 + $0xe8] sm:$0xff] %vm372_vm0, %v369_v49 }
  0x2b   : > { %403 = vst.msk [vmem:[%s721_s27 + $0xf0] sm:$0xff] %vm372_vm0, %v370_v50  ;;  %404 = vst.msk [vmem:[%s721_s27 + $0xf8] sm:$0xff] %vm372_vm0, %v371_v51 }
  0x2c PF: > { %s13_s14 = sadd.s32 1, %s655_s14   ;;  %s872_s12 = smov %s651_s13 }
  0x2d   : > { %p10_p5 = scmp.ge.s32.totalorder %s13_s14, 4   ;;  %s873_s13 = smov %s875_s15 }
  0x2f   :  { %12 = sbr.rel (!%p10_p5) target bundleno = 2 (0x2), region = 68 }

// kernel: convbn_forward.2
= control target key start
LH: loop header
LB: loop body
LE: loop exit
PB: predicated region body
PF: predicated region fallthrough
CT: control target
= control target key end

     0   :  { %s6990_s15 = smov 0   ;;  %s6992_s16 = smov 0   ;;  %s9692_s0 = inlined_call_operand.vmem [shape: bf16[2,18,18,8], index: 0, kind: input, shape index: {}]   ;;  %s9693_s1 = inlined_call_operand.vmem [shape: bf16[3,3,8,8], index: 1, kind: input, shape index: {}]   ;;  %s9694_s2 = inlined_call_operand.vmem [shape: bf16[2,256,8], index: 2, kind: output, shape index: {0}]   ;;  %s9695_s3 = inlined_call_operand.vmem [shape: f32[2,1,8], index: 3, kind: output, shape index: {1}]   ;;  %s9696_s4 = inlined_call_operand.vmem [shape: f32[2,1,8], index: 4, kind: output, shape index: {2}]  }
   0x1   :  { %s6994_s17 = smov 0  }
   0x2 LB: > { %s27_s18 = sadd.s32 1, %s6959_s16  ;;  %p5717_p0 = scmp.ge.s32.totalorder %s6963_s17, 1  ;;  %s6963_s17 = sphi %s6994_s17, %s15_s17   ;;  %s6959_s16 = sphi %s6992_s16, %s9804_s16   ;;  %s6955_s15 = sphi %s6990_s15, %s9803_s15  }
   0x3   : > { %p29_p1 = scmp.ge.s32.totalorder %s27_s18, 2  ;;  %p194_p2 = scmp.lt.s32.totalorder %s6963_s17, 3 }
   0x5   : > { %s9806_s18 = smov (%p29_p1, %s27_s18), 0  ;;  %p195_p3 = pnand %p5717_p0, %p194_p2 }
   0x7   : > { %198 = sbr.rel (%p195_p3) target bundleno = 613 (0x265), region = 28 }
   0xc   : > { %v285_v0 = vld [vmem:[%s9693_s1] sm:$0xf]  ;;  %vm540_vm0 = vcmask 1043456   ;;  %v5721_v1 = vld [vmem:[%s9693_s1 + $0x4] sm:$0xf]  ;;  %p239_p4 = scmp.lt.s32.totalorder %s6955_s15, 1 }
   0xd   : > { %6851 = vmatprep.subr.msk.bf16.mxu1 %vm540_vm0, %v285_v0  ;;  %v706_v2 = vsel %vm540_vm0, %v285_v0, 0  ;;  %6850 = vmatprep.subr.msk.bf16.mxu0 %vm540_vm0, %v5721_v1  ;;  %v542_v3 = vsel %vm540_vm0, %v5721_v1, 0  ;;  %v5762_v4 = vld [vmem:[%s9693_s1 + $0x8] sm:$0xf]  ;;  %vm294_vm1 = vsmask.f32 3328 }
   0xe   : > { %6545 = vmatpush3.bf16.msra.mxu1 %v706_v2  ;;  %s9808_s15 = smov (!%p239_p4, %s6955_s15), 1  ;;  %6527 = vmatpush3.bf16.msra.mxu0 %v542_v3  ;;  %v5795_v5 = vld [vmem:[%s9693_s1 + $0xc] sm:$0xf]  ;;  %v7030_v6 = vld [vmem:[%s9693_s1 + $0x10] sm:$0xf]  ;;  %vm515_vm2 = vcmask 64512  }
   0xf   : > { %6852 = vmatprep.subr.msk.bf16.mxu0 %vm540_vm0, %v5762_v4  ;;  %s6868_s29 = smul.u32 216, %s9808_s15  ;;  %vm295_vm3 = vsmask.f32 7440  ;;  %6853 = vmatprep.subr.msk.bf16.mxu1 %vm540_vm0, %v5795_v5  ;;  %v5869_v7 = vld [vmem:[%s9693_s1 + $0x14] sm:$0xf]  ;;  %v7038_v8 = vsel %vm540_vm0, %v5762_v4, 0  ;;  %s261_s21 = scalar_lea.vmem %s9695_s3, %s9808_s15 }
  0x10   : > { %v1138_v9 = vsel %vm540_vm0, %v5795_v5, 0  ;;  %v7044_v10 = vld [vmem:[%s9693_s1 + $0x18] sm:$0xf]  ;;  %v7049_v11 = vld [vmem:[%s9693_s1 + $0x1c] sm:$0xf]  ;;  %v7058_v12 = vsel %vm540_vm0, %v7030_v6, 0  ;;  %vm7105_vm4 = vmor %vm294_vm1, %vm295_vm3  ;;  %s267_s24 = scalar_lea.vmem %s9696_s4, %s9808_s15 }
  0x11   : > { %s7054_s12 = scalar_lea.vmem %s9692_s0, %s6868_s29  ;;  %v7061_v13 = vsel %vm540_vm0, %v5869_v7, 0  ;;  %v7065_v14 = vsel %vm540_vm0, %v7044_v10, 0  ;;  %v7069_v15 = vsel %vm540_vm0, %v7049_v11, 0  ;;  %vm829_vm5 = vcmask 1042432   ;;  %s6331_s11 = sshll.u32 %s9808_s15, 7 }
  0x12   : > { %v269_v16 = vld [vmem:[%s7054_s12] sm:$0xf]  ;;  %v7073_v17 = vld [vmem:[%s7054_s12 + $0x4] sm:$0xf]  ;;  %v271_v18 = vld [vmem:[%s7054_s12 + $0xc] sm:$0xf]  ;;  %s9031_s14 = scalar_lea.vmem %s9694_s2, %s6331_s11 }
  0x13   : > { %v298_v19 = vshrl.u32 %v269_v16, 16  ;;  %v301_v20 = vshll.u32 %v269_v16, 16  ;;  %v311_v21 = vshrl.u32 %v7073_v17, 16  ;;  %v5738_v22 = vcombine.low %v269_v16, %v7073_v17  ;;  %v7079_v23 = vld [vmem:[%s7054_s12 + $0x10] sm:$0xf] }
  0x14   : > { %v834_v24 = vrot.slane %v7073_v17, 5  ;;  %v322_v25 = vshrl.u32 %v271_v18, 16  ;;  %v325_v26 = vshll.u32 %v271_v18, 16  ;;  %v335_v27 = vshrl.u32 %v7079_v23, 16  ;;  %v7084_v28 = vld [vmem:[%s7054_s12 + $0x8] sm:$0x1] }
  0x15   : > { %v300_v29 = vrot.slane %v298_v19, 4  ;;  %v303_v30 = vrot.slane %v301_v20, 5  ;;  %6546 = vmatprep.mubr.msk.bf16.mxu1 %vm515_vm2, %v5738_v22  ;;  %v5739_v31 = vcombine.low %v271_v18, %v7079_v23  ;;  %v841_v32 = vrot.slane %v7079_v23, 5  ;;  %v7095_v37 = vld [vmem:[%s7054_s12 + $0x14] sm:$0x1] }
  0x16   : > { %v7091_v33 = vrot.slane %v834_v24, 4  ;;  %v324_v34 = vrot.slane %v322_v25, 4  ;;  %v327_v35 = vrot.slane %v325_v26, 5  ;;  %v307_v36 = vshll.u32 %v7073_v17, 16  ;;  %v273_v47 = vld [vmem:[%s7054_s12 + $0x18] sm:$0xf] }
  0x17   : > { %6547 = vmatmul.mubr.msk.bf16.vlgmr.msra.gmra.mxu1 %vm515_vm2, %v5739_v31  ;;  %v7100_v38 = vrot.slane %v841_v32, 4  ;;  %v304_v39 = vor.u32 %v303_v30, %v300_v29  ;;  %v313_v40 = vrot.slane %v311_v21, 4  ;;  %v317_v41 = vshll.u32 %v7084_v28, 16  ;;  %v7114_v52 = vld [vmem:[%s7054_s12 + $0x1c] sm:$0xf] }
  0x18   : > { %v309_v43 = vrot.slane %v307_v36, 5  ;;  %v837_v44 = vrot.slane %v7084_v28, 5  ;;  %v328_v45 = vor.u32 %v327_v35, %v324_v34  ;;  %v331_v46 = vshll.u32 %v7079_v23, 16  ;;  %6581 = vmatpush3.bf16.msra.mxu1 %v1138_v9  ;;  %v275_v57 = vld [vmem:[%s7054_s12 + $0x24] sm:$0xf] }
  0x19   : > { %v305_v48 = vrot.slane %v304_v39, 4  ;;  %v319_v49 = vrot.slane %v317_v41, 5  ;;  %v337_v50 = vrot.slane %v335_v27, 4  ;;  %v341_v51 = vshll.u32 %v7095_v37, 16  ;;  %6855 = vmatprep.subr.msk.bf16.mxu1 %vm540_vm0, %v5869_v7  ;;  %v7122_v62 = vld [vmem:[%s7054_s12 + $0x28] sm:$0xf] }
  0x1a   : > { %v314_v53 = vor.u32 %v313_v40, %v309_v43  ;;  %v329_v54 = vrot.slane %v328_v45, 4  ;;  %v333_v55 = vrot.slane %v331_v46, 5  ;;  %v844_v56 = vrot.slane %v7095_v37, 5  ;;  %v7132_v20 = vld [vmem:[%s7054_s12 + $0x20] sm:$0x1] }
  0x1b   : > { %v310_v58 = vsel %vm7105_vm4, %v305_v48, %v309_v43  ;;  %v343_v59 = vrot.slane %v341_v51, 5  ;;  %v346_v60 = vshrl.u32 %v273_v47, 16  ;;  %v349_v61 = vshll.u32 %v273_v47, 16  ;;  %v7137_v27 = vld [vmem:[%s7054_s12 + $0x2c] sm:$0x1] }
  0x1c   : > { %v315_v63 = vrot.slane %v314_v53, 4  ;;  %v334_v0 = vsel %vm7105_vm4, %v329_v54, %v333_v55  ;;  %v338_v1 = vor.u32 %v337_v50, %v333_v55  ;;  %v359_v2 = vshrl.u32 %v7114_v52, 16  ;;  %v277_v35 = vld [vmem:[%s7054_s12 + $0x30] sm:$0xf]  ;;  %v7149_v48 = vld [vmem:[%s7054_s12 + $0x34] sm:$0xf] }
  0x1d   : > { %v348_v3 = vrot.slane %v346_v60, 4  ;;  %v351_v4 = vrot.slane %v349_v61, 5  ;;  %v5740_v5 = vcombine.low %v273_v47, %v7114_v52  ;;  %v370_v7 = vshrl.u32 %v275_v57, 16  ;;  %v279_v54 = vld [vmem:[%s7054_s12 + $0x3c] sm:$0xf] }
  0x1e   : > { %v320_v9 = vsel %vm7105_vm4, %v315_v63, %v319_v49  ;;  %v339_v16 = vrot.slane %v338_v1, 4  ;;  %v373_v18 = vshll.u32 %v275_v57, 16  ;;  %v383_v19 = vshrl.u32 %v7122_v62, 16  ;;  %v7157_v60 = vld [vmem:[%s7054_s12 + $0x40] sm:$0xf] }
  0x1f   : > { %v5722_v21 = vcombine.low %v310_v58, %v320_v9  ;;  %6550 = vmatprep.mubr.msk.bf16.mxu1 %vm515_vm2, %v5740_v5  ;;  %v372_v22 = vrot.slane %v370_v7, 4  ;;  %v5741_v25 = vcombine.low %v275_v57, %v7122_v62  ;;  %v352_v26 = vor.u32 %v351_v4, %v348_v3 }
  0x20   : > { %v344_v29 = vsel %vm7105_vm4, %v339_v16, %v343_v59  ;;  %v375_v30 = vrot.slane %v373_v18, 5  ;;  %v355_v31 = vshll.u32 %v7114_v52, 16  ;;  %v361_v34 = vrot.slane %v359_v2, 4  ;;  %v7161_v2 = vld [vmem:[%s7054_s12 + $0x38] sm:$0x1] }
  0x21   : > { %6528 = vmatprep.mubr.msk.bf16.mxu0 %vm515_vm2, %v5722_v21  ;;  %v5723_v36 = vcombine.low %v334_v0, %v344_v29  ;;  %6551 = vmatmul.mubr.msk.bf16.gmra.mxu1 %vm515_vm2, %v5741_v25  ;;  %v353_v39 = vrot.slane %v352_v26, 4  ;;  %v365_v40 = vshll.u32 %v7132_v20, 16  ;;  %v379_v41 = vshll.u32 %v7122_v62, 16  ;;  %v7175_v25 = vld [vmem:[%s7054_s12 + $0x44] sm:$0x1] }
  0x22   : > { %v357_v43 = vrot.slane %v355_v31, 5  ;;  %v376_v45 = vor.u32 %v375_v30, %v372_v22  ;;  %v385_v46 = vrot.slane %v383_v19, 4  ;;  %v389_v47 = vshll.u32 %v7137_v27, 16  ;;  %v281_v26 = vld [vmem:[%s7054_s12 + $0x48] sm:$0xf] }
  0x23   : > { %6529 = vmatmul.mubr.msk.bf16.vlgmr.msra.gmra.mxu0 %vm515_vm2, %v5723_v36  ;;  %v367_v49 = vrot.slane %v365_v40, 5  ;;  %v381_v50 = vrot.slane %v379_v41, 5  ;;  %v394_v51 = vshrl.u32 %v277_v35, 16  ;;  %v397_v53 = vshll.u32 %v277_v35, 16 }
  0x24   : > { %6563 = vmatpush3.bf16.msra.mxu0 %v7038_v8  ;;  %v358_v55 = vsel %vm7105_vm4, %v353_v39, %v357_v43  ;;  %v362_v57 = vor.u32 %v361_v34, %v357_v43  ;;  %v377_v58 = vrot.slane %v376_v45, 4  ;;  %v391_v59 = vrot.slane %v389_v47, 5 }
  0x25   : > { %v386_v61 = vor.u32 %v385_v46, %v381_v50  ;;  %v396_v63 = vrot.slane %v394_v51, 4  ;;  %v399_v0 = vrot.slane %v397_v53, 5  ;;  %v407_v1 = vshrl.u32 %v7149_v48, 16  ;;  %6854 = vmatprep.subr.msk.bf16.mxu0 %vm540_vm0, %v7030_v6 }
  0x26   : > { %v363_v8 = vrot.slane %v362_v57, 4  ;;  %v382_v3 = vsel %vm7105_vm4, %v377_v58, %v381_v50  ;;  %v5742_v4 = vcombine.low %v277_v35, %v7149_v48  ;;  %v418_v5 = vshrl.u32 %v279_v54, 16  ;;  %v7182_v35 = vld [vmem:[%s7054_s12 + $0x4c] sm:$0xf] }
  0x27   : > { %v387_v7 = vrot.slane %v386_v61, 4  ;;  %v421_v9 = vshll.u32 %v279_v54, 16  ;;  %v431_v16 = vshrl.u32 %v7157_v60, 16  ;;  %v5743_v18 = vcombine.low %v279_v54, %v7157_v60  ;;  %v283_v54 = vld [vmem:[%s7054_s12 + $0x54] sm:$0xf] }
  0x28   : > { %vm830_vm6 = vcmask 1046532   ;;  %v368_v6 = vsel %vm7105_vm4, %v363_v8, %v367_v49  ;;  %6554 = vmatprep.mubr.msk.bf16.mxu1 %vm515_vm2, %v5742_v4  ;;  %v420_v19 = vrot.slane %v418_v5, 4  ;;  %v400_v21 = vor.u32 %v399_v0, %v396_v63  ;;  %v7196_v63 = vld [vmem:[%s7054_s12 + $0x50] sm:$0x1] }
  0x29   : > { %v403_v22 = vshll.u32 %v7149_v48, 16  ;;  %v5724_v29 = vcombine.low %v358_v55, %v368_v6  ;;  %v392_v30 = vsel %vm7105_vm4, %v387_v7, %v391_v59  ;;  %v423_v31 = vrot.slane %v421_v9, 5  ;;  %6555 = vmatmul.mubr.msk.bf16.gmra.mxu1 %vm515_vm2, %v5743_v18  ;;  %v7193_v55 = vld [vmem:[%s7054_s12 + $0x58] sm:$0xf]  ;;  %v6901_v4 = vld [vmem:[%s7054_s12 + $0xc] sm:$0xff]   ;;  %vm7218_vm7 = vmor %vm829_vm5, %vm830_vm6 }
  0x2a   : > { %v409_v34 = vrot.slane %v407_v1, 4  ;;  %v5725_v36 = vcombine.low %v382_v3, %v392_v30  ;;  %v401_v39 = vrot.slane %v400_v21, 4  ;;  %v413_v41 = vshll.u32 %v7161_v2, 16 }
  0x2b   : > { %v405_v40 = vrot.slane %v403_v22, 5  ;;  %6532 = vmatprep.mubr.msk.bf16.mxu0 %vm515_vm2, %v5724_v29  ;;  %v424_v43 = vor.u32 %v423_v31, %v420_v19  ;;  %v427_v45 = vshll.u32 %v7157_v60, 16  ;;  %v433_v46 = vrot.slane %v431_v16, 4  ;;  %v7209_v22 = vld [vmem:[%s7054_s12 + $0x5c] sm:$0x1] }
  0x2c   : > { %v437_v47 = vshll.u32 %v7175_v25, 16  ;;  %6533 = vmatmul.mubr.msk.bf16.gmra.mxu0 %vm515_vm2, %v5725_v36  ;;  %v415_v51 = vrot.slane %v413_v41, 5  ;;  %v442_v53 = vshrl.u32 %v281_v26, 16  ;;  %v445_v61 = vshll.u32 %v281_v26, 16  ;;  %v806_v36 = vld [vmem:[%s7054_s12 + $0xc] sm:$0xe] }
  0x2d   : > { %v406_v49 = vsel %vm7105_vm4, %v401_v39, %v405_v40  ;;  %v410_v50 = vor.u32 %v409_v34, %v405_v40  ;;  %v425_v57 = vrot.slane %v424_v43, 4  ;;  %v429_v58 = vrot.slane %v427_v45, 5 }
  0x2e   : > { %v439_v59 = vrot.slane %v437_v47, 5  ;;  %v444_v1 = vrot.slane %v442_v53, 4  ;;  %v455_v8 = vshrl.u32 %v7182_v35, 16  ;;  %v5744_v3 = vcombine.low %v281_v26, %v7182_v35  ;;  %v805_v26 = vld [vmem:[%s7054_s12] sm:$0xe] }
  0x2f   : > { %v411_v0 = vrot.slane %v410_v50, 4  ;;  %v430_v5 = vsel %vm7105_vm4, %v425_v57, %v429_v58  ;;  %v434_v7 = vor.u32 %v433_v46, %v429_v58  ;;  %v447_v9 = vrot.slane %v445_v61, 5 }
  0x30   : > { %v466_v16 = vshrl.u32 %v283_v54, 16  ;;  %6558 = vmatprep.mubr.msk.bf16.mxu1 %vm515_vm2, %v5744_v3  ;;  %v469_v6 = vshll.u32 %v283_v54, 16  ;;  %v479_v19 = vshrl.u32 %v7193_v55, 16  ;;  %v5745_v21 = vcombine.low %v283_v54, %v7193_v55 }
  0x31   : > { %v416_v18 = vsel %vm7105_vm4, %v411_v0, %v415_v51  ;;  %v435_v30 = vrot.slane %v434_v7, 4  ;;  %v448_v34 = vor.u32 %v447_v9, %v444_v1  ;;  %v451_v40 = vshll.u32 %v7182_v35, 16  ;;  %v807_v7 = vld [vmem:[%s7054_s12 + $0x18] sm:$0xe] }
  0x32   : > { %v5726_v29 = vcombine.low %v406_v49, %v416_v18  ;;  %v468_v31 = vrot.slane %v466_v16, 4  ;;  %v471_v39 = vrot.slane %v469_v6, 5  ;;  %6559 = vmatmul.mubr.msk.bf16.gmra.mxu1 %vm515_vm2, %v5745_v21  ;;  %v457_v41 = vrot.slane %v455_v8, 4  ;;  %v808_v18 = vld [vmem:[%s7054_s12 + $0x24] sm:$0xe] }
  0x33   : > { %v461_v43 = vshll.u32 %v7196_v63, 16  ;;  %v440_v46 = vsel %vm7105_vm4, %v435_v30, %v439_v59  ;;  %v449_v47 = vrot.slane %v448_v34, 4  ;;  %v475_v49 = vshll.u32 %v7193_v55, 16  ;;  %6582 = vmatprep.mubr.msk.bf16.mxu1 %vm515_vm2, %v6901_v4  ;;  %v6902_v4 = vld [vmem:[%s7054_s12 + $0x18] sm:$0xff]  }
  0x34   : > { %6536 = vmatprep.mubr.msk.bf16.mxu0 %vm515_vm2, %v5726_v29  ;;  %v481_v50 = vrot.slane %v479_v19, 4  ;;  %v5727_v51 = vcombine.low %v430_v5, %v440_v46  ;;  %v453_v53 = vrot.slane %v451_v40, 5  ;;  %v472_v57 = vor.u32 %v471_v39, %v468_v31 }
  0x35   : > { %v463_v54 = vrot.slane %v461_v43, 5  ;;  %v477_v58 = vrot.slane %v475_v49, 5  ;;  %v485_v61 = vshll.u32 %v7209_v22, 16  ;;  %v5754_v0 = vrot.slane %v805_v26, 9  ;;  %v811_v49 = vld [vmem:[%s7054_s12 + $0x48] sm:$0xe] }
  0x36   : > { %v838_v59 = vsel %vm7218_vm7, %v7091_v33, %v837_v44  ;;  %6537 = vmatmul.mubr.msk.bf16.gmra.mxu0 %vm515_vm2, %v5727_v51  ;;  %v454_v1 = vsel %vm7105_vm4, %v449_v47, %v453_v53  ;;  %v458_v8 = vor.u32 %v457_v41, %v453_v53  ;;  %v473_v3 = vrot.slane %v472_v57, 4  ;;  %v6903_v44 = vld [vmem:[%s7054_s12 + $0x24] sm:$0xff]  }
  0x37   : > { %v5755_v5 = vrot.slane %v806_v36, 9  ;;  %v482_v9 = vor.u32 %v481_v50, %v477_v58  ;;  %v487_v16 = vrot.slane %v485_v61, 5  ;;  %v835_v28 = vsel %vm7218_vm7, %v5754_v0, %v834_v24  ;;  %v6904_v50 = vld [vmem:[%s7054_s12 + $0x30] sm:$0xff]  }
  0x38   : > { %v7247_v33 = vsel %vm7218_vm7, %v7100_v38, %v844_v56  ;;  %v459_v6 = vrot.slane %v458_v8, 4  ;;  %v478_v19 = vsel %vm7105_vm4, %v473_v3, %v477_v58  ;;  %v5763_v21 = vcombine.low %v835_v28, %v838_v59  ;;  %v5813_v0 = vld [vmem:[%s7054_s12 + $0x10] sm:$0xf]  ;;  %v5814_v3 = vld [vmem:[%s7054_s12 + $0x14] sm:$0x1] }
  0x39   : > { %v7257_v17 = vsel %vm7218_vm7, %v5755_v5, %v841_v32  ;;  %v483_v24 = vrot.slane %v482_v9, 4  ;;  %v5756_v38 = vrot.slane %v807_v7, 9  ;;  %v848_v56 = vrot.slane %v7114_v52, 5  ;;  %v809_v32 = vld [vmem:[%s7054_s12 + $0x30] sm:$0xe] }
  0x3a   : > { %v5764_v37 = vcombine.low %v7257_v17, %v7247_v33  ;;  %v464_v26 = vsel %vm7105_vm4, %v459_v6, %v463_v54  ;;  %6583 = vmatmul.mubr.msk.bf16.vlgmr.msra.gmra.mxu1 %vm515_vm2, %v6902_v4  ;;  %v851_v29 = vrot.slane %v7132_v20, 5  ;;  %v5757_v23 = vrot.slane %v808_v18, 9  ;;  %v810_v20 = vld [vmem:[%s7054_s12 + $0x3c] sm:$0xe]  ;;  %v812_v54 = vld [vmem:[%s7054_s12 + $0x54] sm:$0xe] }
  0x3b   : > { %v855_v30 = vrot.slane %v7122_v62, 5  ;;  %v5728_v31 = vcombine.low %v454_v1, %v464_v26  ;;  %v488_v34 = vsel %vm7105_vm4, %v483_v24, %v487_v16  ;;  %6617 = vmatpush3.bf16.msra.mxu1 %v7061_v13  ;;  %6586 = vmatprep.mubr.msk.bf16.mxu1 %vm515_vm2, %v6903_v44  ;;  %v7274_v52 = vsel %vm7218_vm7, %v5756_v38, %v848_v56  ;;  %v5853_v9 = vld [vmem:[%s7054_s12 + $0xc] sm:$0xe]  ;;  %v7334_v44 = vld [vmem:[%s7054_s12 + $0x1c] sm:$0xf] }
  0x3c   : > { %v850_v36 = vrot.slane %v848_v56, 4  ;;  %v5729_v39 = vcombine.low %v478_v19, %v488_v34  ;;  %v858_v41 = vrot.slane %v7137_v27, 5  ;;  %6857 = vmatprep.subr.msk.bf16.mxu1 %vm540_vm0, %v7049_v11  ;;  %v5758_v43 = vrot.slane %v809_v32, 9  ;;  %v5854_v18 = vld [vmem:[%s7054_s12 + $0x18] sm:$0xe]  ;;  %v6906_v34 = vld [vmem:[%s7054_s12 + $0x48] sm:$0xff]  }
  0x3d   : > { %v7279_v62 = vsel %vm7218_vm7, %v5757_v23, %v855_v30  ;;  %v857_v40 = vrot.slane %v855_v30, 4  ;;  %6540 = vmatprep.mubr.msk.bf16.mxu0 %vm515_vm2, %v5728_v31  ;;  %v862_v46 = vrot.slane %v7149_v48, 5  ;;  %v865_v47 = vrot.slane %v7161_v2, 5  ;;  %v6905_v2 = vld [vmem:[%s7054_s12 + $0x3c] sm:$0xff]   ;;  %v5812_v23 = vld [vmem:[%s7054_s12 + $0xc] sm:$0xf] }
  0x3e   : > { %v852_v13 = vsel %vm7218_vm7, %v850_v36, %v851_v29  ;;  %6541 = vmatmul.mubr.msk.bf16.gmra.mxu0 %vm515_vm2, %v5729_v39  ;;  %v5759_v51 = vrot.slane %v810_v20, 9  ;;  %v869_v53 = vrot.slane %v7157_v60, 5  ;;  %v872_v61 = vrot.slane %v7175_v25, 5  ;;  %v5817_v24 = vld [vmem:[%s7054_s12 + $0x20] sm:$0x1] }
  0x3f   : > { %v5765_v27 = vcombine.low %v7274_v52, %v852_v13  ;;  %v7295_v11 = vsel %vm7218_vm7, %v857_v40, %v858_v41  ;;  %6564 = vmatprep.mubr.msk.bf16.mxu0 %vm515_vm2, %v5763_v21  ;;  %v7305_v57 = vsel %vm7218_vm7, %v5758_v43, %v862_v46  ;;  %v864_v58 = vrot.slane %v862_v46, 4  ;;  %v6907_v40 = vld [vmem:[%s7054_s12 + $0x54] sm:$0xff]  }
  0x40   : > { %v5766_v48 = vcombine.low %v7279_v62, %v7295_v11  ;;  %v7311_v60 = vsel %vm7218_vm7, %v5759_v51, %v869_v53  ;;  %v871_v59 = vrot.slane %v869_v53, 4  ;;  %v5760_v1 = vrot.slane %v811_v49, 9  ;;  %v5855_v53 = vld [vmem:[%s7054_s12 + $0x24] sm:$0xe] }
  0x41   : > { %v876_v8 = vrot.slane %v7182_v35, 5  ;;  %v7317_v4 = vsel %vm7218_vm7, %v864_v58, %v865_v47  ;;  %v879_v5 = vrot.slane %v7196_v63, 5  ;;  %v5761_v25 = vrot.slane %v812_v54, 9 }
  0x42   : > { %v883_v7 = vrot.slane %v7193_v55, 5  ;;  %6587 = vmatmul.mubr.msk.bf16.gmra.mxu1 %vm515_vm2, %v6904_v50  ;;  %v5767_v16 = vcombine.low %v7305_v57, %v7317_v4  ;;  %v7327_v35 = vsel %vm7218_vm7, %v871_v59, %v872_v61  ;;  %v886_v21 = vrot.slane %v7209_v22, 5  ;;  %v7391_v61 = vld [vmem:[%s7054_s12 + $0x28] sm:$0xf] }
  0x43   : > { %v7331_v28 = vsel %vm7218_vm7, %v5760_v1, %v876_v8  ;;  %v878_v63 = vrot.slane %v876_v8, 4  ;;  %6590 = vmatprep.mubr.msk.bf16.mxu1 %vm515_vm2, %v6905_v2  ;;  %v5768_v55 = vcombine.low %v7311_v60, %v7327_v35  ;;  %v5861_v56 = vrot.slane %v5853_v9, 9 }
  0x44   : > { %v7342_v6 = vsel %vm7218_vm7, %v5761_v25, %v883_v7  ;;  %v885_v19 = vrot.slane %v883_v7, 4  ;;  %v1669_v26 = vrot.slane %v5813_v0, 5  ;;  %v1672_v29 = vrot.slane %v5814_v3, 5 }
  0x45   : > { %v7348_v38 = vsel %vm7218_vm7, %v878_v63, %v879_v5  ;;  %v5862_v31 = vrot.slane %v5854_v18, 9  ;;  %v1676_v22 = vrot.slane %v7334_v44, 5  ;;  %v1679_v39 = vrot.slane %v5817_v24, 5  ;;  %v6908_v5 = vld [vmem:[%s7054_s12 + $0x60] sm:$0xff]   ;;  %v7399_v18 = vld [vmem:[%s7054_s12 + $0x34] sm:$0xf] }
  0x46   : > { %v5769_v30 = vcombine.low %v7331_v28, %v7348_v38  ;;  %v7355_v32 = vsel %vm7218_vm7, %v885_v19, %v886_v21  ;;  %6565 = vmatmul.mubr.msk.bf16.vlgmr.msra.gmra.mxu0 %vm515_vm2, %v5764_v37  ;;  %v7367_v36 = vsel %vm7218_vm7, %v5861_v56, %v1669_v26  ;;  %v1671_v20 = vrot.slane %v1669_v26, 4  ;;  %v5856_v19 = vld [vmem:[%s7054_s12 + $0x30] sm:$0xe] }
  0x47   : > { %v5770_v52 = vcombine.low %v7342_v6, %v7355_v32  ;;  %6599 = vmatpush3.bf16.msra.mxu0 %v7058_v12  ;;  %6568 = vmatprep.mubr.msk.bf16.mxu0 %vm515_vm2, %v5765_v27  ;;  %v7374_v33 = vsel %vm7218_vm7, %v5862_v31, %v1676_v22  ;;  %v1678_v17 = vrot.slane %v1676_v22, 4  ;;  %v1278_v37 = vshrl.u32 %v5812_v23, 16  ;;  %v5815_v12 = vld [vmem:[%s7054_s12 + $0x18] sm:$0xf] }
  0x48   : > { %v1281_v41 = vshll.u32 %v5812_v23, 16  ;;  %v1673_v13 = vsel %vm7218_vm7, %v1671_v20, %v1672_v29  ;;  %v1287_v43 = vshll.u32 %v5813_v0, 16  ;;  %v1291_v46 = vshrl.u32 %v5813_v0, 16  ;;  %6856 = vmatprep.subr.msk.bf16.mxu0 %vm540_vm0, %v7044_v10  ;;  %v7403_v23 = vld [vmem:[%s7054_s12 + $0x38] sm:$0x1] }
  0x49   : > { %v1297_v47 = vshll.u32 %v5814_v3, 16  ;;  %v5870_v49 = vcombine.low %v7367_v36, %v1673_v13  ;;  %v7384_v50 = vsel %vm7218_vm7, %v1678_v17, %v1679_v39  ;;  %v1280_v27 = vrot.slane %v1278_v37, 4  ;;  %v5820_v3 = vld [vmem:[%s7054_s12 + $0x2c] sm:$0x1] }
  0x4a   : > { %v1283_v51 = vrot.slane %v1281_v41, 5  ;;  %6591 = vmatmul.mubr.msk.bf16.gmra.mxu1 %vm515_vm2, %v6906_v34  ;;  %v5871_v54 = vcombine.low %v7374_v33, %v7384_v50  ;;  %v1289_v2 = vrot.slane %v1287_v43, 5  ;;  %v1293_v10 = vrot.slane %v1291_v46, 4 }
  0x4b   : > { %v1299_v58 = vrot.slane %v1297_v47, 5  ;;  %6594 = vmatprep.mubr.msk.bf16.mxu1 %vm515_vm2, %v6907_v40  ;;  %v1302_v59 = vshrl.u32 %v5815_v12, 16  ;;  %v1305_v1 = vshll.u32 %v5815_v12, 16  ;;  %v1311_v8 = vshll.u32 %v7334_v44, 16 }
  0x4c   : > { %v1284_v0 = vor.u32 %v1283_v51, %v1280_v27  ;;  %v1294_v25 = vor.u32 %v1293_v10, %v1289_v2  ;;  %v1315_v7 = vshrl.u32 %v7334_v44, 16  ;;  %v1321_v9 = vshll.u32 %v5817_v24, 16  ;;  %v5818_v24 = vld [vmem:[%s7054_s12 + $0x24] sm:$0xf] }
  0x4d   : > { %v5863_v63 = vrot.slane %v5855_v53, 9  ;;  %v1304_v56 = vrot.slane %v1302_v59, 4  ;;  %v1307_v26 = vrot.slane %v1305_v1, 5  ;;  %v1313_v29 = vrot.slane %v1311_v8, 5  ;;  %v5821_v53 = vld [vmem:[%s7054_s12 + $0x30] sm:$0xf] }
  0x4e   : > { %v1285_v21 = vrot.slane %v1284_v0, 4  ;;  %6569 = vmatmul.mubr.msk.bf16.gmra.mxu0 %vm515_vm2, %v5766_v48  ;;  %v1295_v31 = vrot.slane %v1294_v25, 4  ;;  %v1317_v22 = vrot.slane %v1315_v7, 4  ;;  %v1323_v34 = vrot.slane %v1321_v9, 5  ;;  %v5857_v25 = vld [vmem:[%s7054_s12 + $0x3c] sm:$0xe] }
  0x4f   : > { %v1683_v44 = vrot.slane %v7391_v61, 5  ;;  %6572 = vmatprep.mubr.msk.bf16.mxu0 %vm515_vm2, %v5767_v16  ;;  %v1308_v20 = vor.u32 %v1307_v26, %v1304_v56  ;;  %v1686_v39 = vrot.slane %v5820_v3, 5  ;;  %v5864_v40 = vrot.slane %v5856_v19, 9  ;;  %v7470_v56 = vld [vmem:[%s9693_s1 + $0x4] sm:$0xf] }
  0x50   : > { %v1290_v36 = vsel %vm7105_vm4, %v1285_v21, %v1289_v2  ;;  %v1300_v62 = vsel %vm7105_vm4, %v1295_v31, %v1299_v58  ;;  %v1318_v11 = vor.u32 %v1317_v22, %v1313_v29  ;;  %v1690_v4 = vrot.slane %v7399_v18, 5  ;;  %v7457_v21 = vld [vmem:[%s7054_s12 + $0x44] sm:$0x1] }
  0x51   : > { %v1684_v48 = vsel %vm7218_vm7, %v5863_v63, %v1683_v44  ;;  %v1685_v17 = vrot.slane %v1683_v44, 4  ;;  %v7421_v37 = vcombine.low %v1290_v36, %v1300_v62  ;;  %v1309_v57 = vrot.slane %v1308_v20, 4 }
  0x52   : > { %v1693_v16 = vrot.slane %v7403_v23, 5  ;;  %6595 = vmatmul.mubr.msk.bf16.gmra.mxu1 %vm515_vm2, %v6908_v5  ;;  %v1319_v41 = vrot.slane %v1318_v11, 4  ;;  %v1326_v43 = vshrl.u32 %v5818_v24, 16  ;;  %v1329_v46 = vshll.u32 %v5818_v24, 16  ;;  %v7447_v5 = vld [vmem:[%s7054_s12 + $0x40] sm:$0xf] }
  0x53   : > { %v1687_v13 = vsel %vm7218_vm7, %v1685_v17, %v1686_v39  ;;  %6618 = vmatprep.mubr.msk.bf16.mxu1 %vm515_vm2, %v5870_v49  ;;  %v1314_v47 = vsel %vm7105_vm4, %v1309_v57, %v1313_v29  ;;  %v7433_v27 = vsel %vm7218_vm7, %v5864_v40, %v1690_v4  ;;  %v1692_v51 = vrot.slane %v1690_v4, 4  ;;  %v7476_v24 = vld [vmem:[%s7054_s12 + $0x50] sm:$0x1]  ;;  %v5824_v39 = vld [vmem:[%s7054_s12 + $0x3c] sm:$0xf] }
  0x54   : > { %v5872_v12 = vcombine.low %v1684_v48, %v1687_v13  ;;  %v1324_v2 = vsel %vm7105_vm4, %v1319_v41, %v1323_v34  ;;  %v1328_v10 = vrot.slane %v1326_v43, 4  ;;  %v1331_v58 = vrot.slane %v1329_v46, 5  ;;  %v5827_v57 = vld [vmem:[%s7054_s12 + $0x48] sm:$0xf] }
  0x55   : > { %v1335_v0 = vshll.u32 %v7391_v61, 16  ;;  %v7439_v59 = vcombine.low %v1314_v47, %v1324_v2  ;;  %v7443_v49 = vsel %vm7218_vm7, %v1692_v51, %v1693_v16  ;;  %v1339_v1 = vshrl.u32 %v7391_v61, 16 }
  0x56   : > { %v1345_v8 = vshll.u32 %v5820_v3, 16  ;;  %6573 = vmatmul.mubr.msk.bf16.gmra.mxu0 %vm515_vm2, %v5768_v55  ;;  %v5873_v7 = vcombine.low %v7433_v27, %v7443_v49  ;;  %v1332_v9 = vor.u32 %v1331_v58, %v1328_v10  ;;  %v1350_v19 = vshrl.u32 %v5821_v53, 16  ;;  %v7465_v55 = vld [vmem:[%s7054_s12 + $0x4c] sm:$0xf]  ;;  %v7536_v27 = vld [vmem:[%s9693_s1 + $0x20] sm:$0xf] }
  0x57   : > { %v1337_v63 = vrot.slane %v1335_v0, 5  ;;  %6576 = vmatprep.mubr.msk.bf16.mxu0 %vm515_vm2, %v5769_v30  ;;  %v1341_v61 = vrot.slane %v1339_v1, 4  ;;  %v1353_v60 = vshll.u32 %v5821_v53, 16  ;;  %v1359_v35 = vshll.u32 %v7399_v18, 16  ;;  %v5858_v30 = vld [vmem:[%s7054_s12 + $0x48] sm:$0xe] }
  0x58   : > { %v1347_v3 = vrot.slane %v1345_v8, 5  ;;  %v1333_v26 = vrot.slane %v1332_v9, 4  ;;  %v1352_v29 = vrot.slane %v1350_v19, 4  ;;  %v1363_v28 = vshrl.u32 %v7399_v18, 16  ;;  %v7520_v8 = vld [vmem:[%s7054_s12 + $0x58] sm:$0xf] }
  0x59   : > { %v1369_v38 = vshll.u32 %v7403_v23, 16  ;;  %v1342_v31 = vor.u32 %v1341_v61, %v1337_v63  ;;  %v1355_v22 = vrot.slane %v1353_v60, 5  ;;  %v1361_v34 = vrot.slane %v1359_v35, 5  ;;  %v7527_v19 = vld [vmem:[%s7054_s12 + $0x5c] sm:$0x1] }
  0x5a   : > { %v5865_v44 = vrot.slane %v5857_v25, 9  ;;  %6619 = vmatmul.mubr.msk.bf16.vlgmr.msra.gmra.mxu1 %vm515_vm2, %v5871_v54  ;;  %v1338_v36 = vsel %vm7105_vm4, %v1333_v26, %v1337_v63  ;;  %v1365_v20 = vrot.slane %v1363_v28, 4  ;;  %v1697_v23 = vrot.slane %v7447_v5, 5  ;;  %v5859_v61 = vld [vmem:[%s7054_s12 + $0x54] sm:$0xe] }
  0x5b   : > { %v1371_v18 = vrot.slane %v1369_v38, 5  ;;  %6653 = vmatpush3.bf16.msra.mxu1 %v7069_v15  ;;  %6622 = vmatprep.mubr.msk.bf16.mxu1 %vm515_vm2, %v5872_v12  ;;  %v1343_v40 = vrot.slane %v1342_v31, 4  ;;  %v1356_v62 = vor.u32 %v1355_v22, %v1352_v29  ;;  %v1700_v11 = vrot.slane %v7457_v21, 5  ;;  %v5860_v26 = vld [vmem:[%s7054_s12 + $0x60] sm:$0xe] }
  0x5c   : > { %v5866_v33 = vrot.slane %v5858_v30, 9  ;;  %v1366_v50 = vor.u32 %v1365_v20, %v1361_v34  ;;  %v1698_v54 = vsel %vm7218_vm7, %v5865_v44, %v1697_v23  ;;  %v1699_v48 = vrot.slane %v1697_v23, 4  ;;  %6859 = vmatprep.subr.msk.bf16.mxu1 %vm540_vm0, %v7470_v56  ;;  %v7541_v38 = vld [vmem:[%s7054_s12 + $0x64] sm:$0xf] }
  0x5d   : > { %v1704_v17 = vrot.slane %v7465_v55, 5  ;;  %v1348_v15 = vsel %vm7105_vm4, %v1343_v40, %v1347_v3  ;;  %v1357_v4 = vrot.slane %v1356_v62, 4  ;;  %v1707_v16 = vrot.slane %v7476_v24, 5  ;;  %v5835_v40 = vld [vmem:[%s7054_s12 + $0x68] sm:$0x1] }
  0x5e   : > { %v1374_v41 = vshrl.u32 %v5824_v39, 16  ;;  %6577 = vmatmul.mubr.msk.bf16.gmra.mxu0 %vm515_vm2, %v5770_v52  ;;  %v5839_v13 = vcombine.low %v1338_v36, %v1348_v15  ;;  %v1367_v43 = vrot.slane %v1366_v50, 4  ;;  %v1701_v46 = vsel %vm7218_vm7, %v1699_v48, %v1700_v11  ;;  %v5830_v62 = vld [vmem:[%s7054_s12 + $0x54] sm:$0xf] }
  0x5f   : > { %v1705_v47 = vsel %vm7218_vm7, %v5866_v33, %v1704_v17  ;;  %6600 = vmatprep.mubr.msk.bf16.mxu0 %vm515_vm2, %v7421_v37  ;;  %v1362_v12 = vsel %vm7105_vm4, %v1357_v4, %v1361_v34  ;;  %v5874_v51 = vcombine.low %v1698_v54, %v1701_v46  ;;  %v1706_v53 = vrot.slane %v1704_v17, 4 }
  0x60   : > { %v1376_v6 = vrot.slane %v1374_v41, 4  ;;  %v1372_v32 = vsel %vm7105_vm4, %v1367_v43, %v1371_v18  ;;  %v1377_v52 = vshll.u32 %v5824_v39, 16  ;;  %v1383_v2 = vshll.u32 %v7447_v5, 16 }
  0x61   : > { %v1387_v10 = vshrl.u32 %v7447_v5, 16  ;;  %v7514_v58 = vcombine.low %v1362_v12, %v1372_v32  ;;  %v1708_v37 = vsel %vm7218_vm7, %v1706_v53, %v1707_v16  ;;  %v1393_v0 = vshll.u32 %v7457_v21, 16 }
  0x62   : > { %v1398_v1 = vshrl.u32 %v5827_v57, 16  ;;  %6623 = vmatmul.mubr.msk.bf16.gmra.mxu1 %vm515_vm2, %v5873_v7  ;;  %v5875_v25 = vcombine.low %v1705_v47, %v1708_v37  ;;  %v1379_v9 = vrot.slane %v1377_v52, 5  ;;  %v1385_v5 = vrot.slane %v1383_v2, 5  ;;  %v5833_v47 = vld [vmem:[%s7054_s12 + $0x60] sm:$0xf] }
  0x63   : > { %v1389_v63 = vrot.slane %v1387_v10, 4  ;;  %6626 = vmatprep.mubr.msk.bf16.mxu1 %vm515_vm2, %v5874_v51  ;;  %v1395_v3 = vrot.slane %v1393_v0, 5  ;;  %v1401_v60 = vshll.u32 %v5827_v57, 16  ;;  %v1407_v35 = vshll.u32 %v7465_v55, 16 }
  0x64   : > { %v1400_v21 = vrot.slane %v1398_v1, 4  ;;  %v1380_v49 = vor.u32 %v1379_v9, %v1376_v6  ;;  %v1411_v29 = vshrl.u32 %v7465_v55, 16  ;;  %v1417_v28 = vshll.u32 %v7476_v24, 16  ;;  %v5919_v9 = vld [vmem:[%s7054_s12 + $0x18] sm:$0xf] }
  0x65   : > { %v1390_v7 = vor.u32 %v1389_v63, %v1385_v5  ;;  %v1403_v30 = vrot.slane %v1401_v60, 5  ;;  %v1409_v31 = vrot.slane %v1407_v35, 5  ;;  %v5867_v22 = vrot.slane %v5859_v61, 9 }
  0x66   : > { %v1711_v34 = vrot.slane %v7520_v8, 5  ;;  %6601 = vmatmul.mubr.msk.bf16.vlgmr.msra.gmra.mxu0 %vm515_vm2, %v7439_v59  ;;  %v1381_v44 = vrot.slane %v1380_v49, 4  ;;  %v1413_v20 = vrot.slane %v1411_v29, 4  ;;  %v1419_v18 = vrot.slane %v1417_v28, 5 }
  0x67   : > { %v1391_v36 = vrot.slane %v1390_v7, 4  ;;  %6635 = vmatpush3.bf16.msra.mxu0 %v7065_v14  ;;  %6604 = vmatprep.mubr.msk.bf16.mxu0 %vm515_vm2, %v5839_v13  ;;  %v1404_v55 = vor.u32 %v1403_v30, %v1400_v21  ;;  %v1714_v39 = vrot.slane %v7527_v19, 5  ;;  %v5868_v14 = vrot.slane %v5860_v26, 9 }
  0x68   : > { %v1712_v24 = vsel %vm7218_vm7, %v5867_v22, %v1711_v34  ;;  %v1713_v23 = vrot.slane %v1711_v34, 4  ;;  %v1386_v59 = vsel %vm7105_vm4, %v1381_v44, %v1385_v5  ;;  %v1414_v33 = vor.u32 %v1413_v20, %v1409_v31  ;;  %6858 = vmatprep.subr.msk.bf16.mxu0 %vm540_vm0, %v7536_v27  ;;  %v5922_v20 = vld [vmem:[%s7054_s12 + $0x24] sm:$0xf] }
  0x69   : > { %v1396_v11 = vsel %vm7105_vm4, %v1391_v36, %v1395_v3  ;;  %v1405_v54 = vrot.slane %v1404_v55, 4  ;;  %v1718_v17 = vrot.slane %v7541_v38, 5  ;;  %v1721_v4 = vrot.slane %v5835_v40, 5 }
  0x6a   : > { %v5841_v50 = vcombine.low %v1386_v59, %v1396_v11  ;;  %v1715_v48 = vsel %vm7218_vm7, %v1713_v23, %v1714_v39  ;;  %6627 = vmatmul.mubr.msk.bf16.gmra.mxu1 %vm515_vm2, %v5875_v25  ;;  %v1415_v57 = vrot.slane %v1414_v33, 4  ;;  %v1422_v16 = vshrl.u32 %v5830_v62, 16  ;;  %v7597_v39 = vld [vmem:[%s7054_s12 + $0x28] sm:$0xf] }
  0x6b   : > { %v5876_v15 = vcombine.low %v1712_v24, %v1715_v48  ;;  %v1410_v41 = vsel %vm7105_vm4, %v1405_v54, %v1409_v31  ;;  %v1719_v13 = vsel %vm7218_vm7, %v5868_v14, %v1718_v17  ;;  %v1720_v43 = vrot.slane %v1718_v17, 4  ;;  %v7587_v31 = vld [vmem:[%s7054_s12 + $0x20] sm:$0x1] }
  0x6c   : > { %v1425_v46 = vshll.u32 %v5830_v62, 16  ;;  %v1420_v12 = vsel %vm7105_vm4, %v1415_v57, %v1419_v18  ;;  %v1424_v51 = vrot.slane %v1422_v16, 4  ;;  %v1431_v53 = vshll.u32 %v7520_v8, 16  ;;  %v7605_v57 = vld [vmem:[%s7054_s12 + $0x2c] sm:$0x1] }
  0x6d   : > { %6630 = vmatprep.mubr.msk.bf16.mxu1 %vm515_vm2, %v5876_v15  ;;  %v1435_v6 = vshrl.u32 %v7520_v8, 16  ;;  %v5842_v32 = vcombine.low %v1410_v41, %v1420_v12  ;;  %v1722_v52 = vsel %vm7218_vm7, %v1720_v43, %v1721_v4  ;;  %v1441_v10 = vshll.u32 %v7527_v19, 16 }
  0x6e   : > { %v1427_v2 = vrot.slane %v1425_v46, 5  ;;  %6605 = vmatmul.mubr.msk.bf16.gmra.mxu0 %vm515_vm2, %v7514_v58  ;;  %v5877_v37 = vcombine.low %v1719_v13, %v1722_v52  ;;  %v1433_v0 = vrot.slane %v1431_v53, 5  ;;  %v1446_v25 = vshrl.u32 %v5833_v47, 16  ;;  %v7583_v58 = vld [vmem:[%s7054_s12 + $0x1c] sm:$0xf] }
  0x6f   : > { %v1437_v1 = vrot.slane %v1435_v6, 4  ;;  %6608 = vmatprep.mubr.msk.bf16.mxu0 %vm515_vm2, %v5841_v50  ;;  %v1443_v8 = vrot.slane %v1441_v10, 5  ;;  %v1449_v63 = vshll.u32 %v5833_v47, 16  ;;  %v1455_v61 = vshll.u32 %v7541_v38, 16  ;;  %v5925_v46 = vld [vmem:[%s7054_s12 + $0x30] sm:$0xf] }
  0x70   : > { %v1428_v5 = vor.u32 %v1427_v2, %v1424_v51  ;;  %v1448_v21 = vrot.slane %v1446_v25, 4  ;;  %v1459_v19 = vshrl.u32 %v7541_v38, 16  ;;  %v1465_v60 = vshll.u32 %v5835_v40, 16  ;;  %v7613_v6 = vld [vmem:[%s7054_s12 + $0x34] sm:$0xf] }
  0x71   : > { %v1438_v3 = vor.u32 %v1437_v1, %v1433_v0  ;;  %v1451_v26 = vrot.slane %v1449_v63, 5  ;;  %v1457_v49 = vrot.slane %v1455_v61, 5  ;;  %v2113_v7 = vshrl.u32 %v5919_v9, 16  ;;  %v6909_v1 = vld [vmem:[%s7054_s12 + $0x18] sm:$0xff]  }
  0x72   : > { %v1429_v35 = vrot.slane %v1428_v5, 4  ;;  %6631 = vmatmul.mubr.msk.bf16.gmra.mxu1 %vm515_vm2, %v5877_v37  ;;  %v1461_v28 = vrot.slane %v1459_v19, 4  ;;  %v1467_v30 = vrot.slane %v1465_v60, 5  ;;  %v2116_v22 = vshll.u32 %v5919_v9, 16  ;;  %v7626_v9 = vld [vmem:[%s7054_s12 + $0x38] sm:$0x1] }
  0x73   : > { %v1439_v29 = vrot.slane %v1438_v3, 4  ;;  %v1452_v34 = vor.u32 %v1451_v26, %v1448_v21  ;;  %v2115_v44 = vrot.slane %v2113_v7, 4  ;;  %v2122_v36 = vshll.u32 %v7583_v58, 16  ;;  %v7633_v26 = vld [vmem:[%s7054_s12 + $0x40] sm:$0xf] }
  0x74   : > { %v1434_v38 = vsel %vm7105_vm4, %v1429_v35, %v1433_v0  ;;  %v1462_v55 = vor.u32 %v1461_v28, %v1457_v49  ;;  %v2118_v24 = vrot.slane %v2116_v22, 5  ;;  %v2126_v23 = vshrl.u32 %v7583_v58, 16  ;;  %v7643_v22 = vld [vmem:[%s7054_s12 + $0x44] sm:$0x1] }
  0x75   : > { %v1444_v18 = vsel %vm7105_vm4, %v1439_v29, %v1443_v8  ;;  %v1453_v62 = vrot.slane %v1452_v34, 4  ;;  %v2124_v59 = vrot.slane %v2122_v36, 5  ;;  %v2132_v11 = vshll.u32 %v7587_v31, 16 }
  0x76   : > { %v5843_v40 = vcombine.low %v1434_v38, %v1444_v18  ;;  %6609 = vmatmul.mubr.msk.bf16.gmra.mxu0 %vm515_vm2, %v5842_v32  ;;  %v1463_v33 = vrot.slane %v1462_v55, 4  ;;  %v2119_v14 = vor.u32 %v2118_v24, %v2115_v44  ;;  %v2128_v50 = vrot.slane %v2126_v23, 4  ;;  %v5931_v55 = vld [vmem:[%s7054_s12 + $0x48] sm:$0xf] }
  0x77   : > { %v2137_v54 = vshrl.u32 %v5922_v20, 16  ;;  %v1458_v48 = vsel %vm7105_vm4, %v1453_v62, %v1457_v49  ;;  %v2134_v17 = vrot.slane %v2132_v11, 5  ;;  %v2140_v15 = vshll.u32 %v5922_v20, 16 }
  0x78   : > { %6612 = vmatprep.mubr.msk.bf16.mxu0 %vm515_vm2, %v5843_v40  ;;  %v2146_v4 = vshll.u32 %v7597_v39, 16  ;;  %v1468_v16 = vsel %vm7105_vm4, %v1463_v33, %v1467_v30  ;;  %v2120_v41 = vrot.slane %v2119_v14, 4  ;;  %v2129_v13 = vor.u32 %v2128_v50, %v2124_v59  ;;  %v6910_v33 = vld [vmem:[%s7054_s12 + $0x24] sm:$0xff]  }
  0x79   : > { %v2139_v43 = vrot.slane %v2137_v54, 4  ;;  %v5844_v47 = vcombine.low %v1458_v48, %v1468_v16  ;;  %v2142_v12 = vrot.slane %v2140_v15, 5  ;;  %v2150_v53 = vshrl.u32 %v7597_v39, 16  ;;  %v7655_v48 = vld [vmem:[%s7054_s12 + $0x50] sm:$0x1] }
  0x7a   : > { %v2148_v51 = vrot.slane %v2146_v4, 5  ;;  %v2125_v32 = vsel %vm7105_vm4, %v2120_v41, %v2124_v59  ;;  %v2130_v52 = vrot.slane %v2129_v13, 4  ;;  %v2156_v2 = vshll.u32 %v7605_v57, 16  ;;  %v7651_v59 = vld [vmem:[%s7054_s12 + $0x4c] sm:$0xf]  ;;  %v6911_v16 = vld [vmem:[%s7054_s12 + $0x30] sm:$0xff]  }
  0x7b   : > { %v7620_v10 = vsel %vm540_vm0, %v7536_v27, 0  ;;  %v2143_v37 = vor.u32 %v2142_v12, %v2139_v43  ;;  %v2152_v0 = vrot.slane %v2150_v53, 4  ;;  %v3180_v25 = vsel %vm540_vm0, %v7470_v56, 0  ;;  %v5928_v27 = vld [vmem:[%s7054_s12 + $0x3c] sm:$0xf] }
  0x7c   : > { %v2161_v5 = vshrl.u32 %v5925_v46, 16  ;;  %v2135_v8 = vsel %vm7105_vm4, %v2130_v52, %v2134_v17  ;;  %v2158_v63 = vrot.slane %v2156_v2, 5  ;;  %v2164_v61 = vshll.u32 %v5925_v46, 16  ;;  %v7662_v13 = vld [vmem:[%s9693_s1 + $0x8] sm:$0xf] }
  0x7d   : > { %v2170_v3 = vshll.u32 %v7613_v6, 16  ;;  %v5944_v21 = vcombine.low %v2125_v32, %v2135_v8  ;;  %v2144_v19 = vrot.slane %v2143_v37, 4  ;;  %v2153_v60 = vor.u32 %v2152_v0, %v2148_v51  ;;  %v7672_v37 = vld [vmem:[%s9693_s1] sm:$0xf] }
  0x7e   : > { %v2163_v35 = vrot.slane %v2161_v5, 4  ;;  %6613 = vmatmul.mubr.msk.bf16.gmra.mxu0 %vm515_vm2, %v5844_v47  ;;  %v2166_v56 = vrot.slane %v2164_v61, 5  ;;  %v2174_v7 = vshrl.u32 %v7613_v6, 16  ;;  %v2180_v29 = vshll.u32 %v7626_v9, 16 }
  0x7f   : > { %v2172_v49 = vrot.slane %v2170_v3, 5  ;;  %6654 = vmatprep.mubr.msk.bf16.mxu1 %vm515_vm2, %v5944_v21  ;;  %v2149_v28 = vsel %vm7105_vm4, %v2144_v19, %v2148_v51  ;;  %v2154_v30 = vrot.slane %v2153_v60, 4  ;;  %6636 = vmatprep.mubr.msk.bf16.mxu0 %vm515_vm2, %v6909_v1  ;;  %v2185_v38 = vshrl.u32 %v5928_v27, 16  ;;  %v5934_v51 = vld [vmem:[%s7054_s12 + $0x54] sm:$0xf] }
  0x80   : > { %v2188_v34 = vshll.u32 %v5928_v27, 16  ;;  %v2167_v44 = vor.u32 %v2166_v56, %v2163_v35  ;;  %v2176_v36 = vrot.slane %v2174_v7, 4  ;;  %v2182_v20 = vrot.slane %v2180_v29, 5  ;;  %v7689_v60 = vld [vmem:[%s7054_s12 + $0x5c] sm:$0x1] }
  0x81   : > { %v2194_v18 = vshll.u32 %v7633_v26, 16  ;;  %v2159_v24 = vsel %vm7105_vm4, %v2154_v30, %v2158_v63  ;;  %v2187_v23 = vrot.slane %v2185_v38, 4  ;;  %v2198_v62 = vshrl.u32 %v7633_v26, 16  ;;  %v6912_v38 = vld [vmem:[%s7054_s12 + $0x3c] sm:$0xff]  }
  0x82   : > { %v2190_v40 = vrot.slane %v2188_v34, 5  ;;  %v5945_v11 = vcombine.low %v2149_v28, %v2159_v24  ;;  %v2168_v14 = vrot.slane %v2167_v44, 4  ;;  %v2177_v50 = vor.u32 %v2176_v36, %v2172_v49  ;;  %v5937_v28 = vld [vmem:[%s7054_s12 + $0x60] sm:$0xf] }
  0x83   : > { %v2196_v54 = vrot.slane %v2194_v18, 5  ;;  %v2200_v15 = vrot.slane %v2198_v62, 4  ;;  %v2204_v4 = vshll.u32 %v7643_v22, 16  ;;  %v2209_v41 = vshrl.u32 %v5931_v55, 16  ;;  %v7702_v18 = vld [vmem:[%s7054_s12 + $0x64] sm:$0xf] }
  0x84   : > { %v2191_v17 = vor.u32 %v2190_v40, %v2187_v23  ;;  %6655 = vmatmul.mubr.msk.bf16.vlgmr.msra.gmra.mxu1 %vm515_vm2, %v5945_v11  ;;  %v2173_v43 = vsel %vm7105_vm4, %v2168_v14, %v2172_v49  ;;  %v2178_v46 = vrot.slane %v2177_v50, 4  ;;  %v2212_v47 = vshll.u32 %v5931_v55, 16  ;;  %v7706_v62 = vld [vmem:[%s7054_s12 + $0x68] sm:$0x1] }
  0x85   : > { %v2218_v12 = vshll.u32 %v7651_v59, 16  ;;  %6689 = vmatpush3.bf16.msra.mxu1 %v3180_v25  ;;  %v2201_v32 = vor.u32 %v2200_v15, %v2196_v54  ;;  %v2206_v52 = vrot.slane %v2204_v4, 5  ;;  %v2211_v2 = vrot.slane %v2209_v41, 4  ;;  %v7679_v25 = vld [vmem:[%s7054_s12 + $0x58] sm:$0xf] }
  0x86   : > { %v2192_v53 = vrot.slane %v2191_v17, 4  ;;  %6637 = vmatmul.mubr.msk.bf16.vlgmr.msra.gmra.mxu0 %vm515_vm2, %v6910_v33  ;;  %v2183_v0 = vsel %vm7105_vm4, %v2178_v46, %v2182_v20  ;;  %v2214_v1 = vrot.slane %v2212_v47, 5  ;;  %v2222_v8 = vshrl.u32 %v7651_v59, 16  ;;  %6861 = vmatprep.subr.msk.bf16.mxu1 %vm540_vm0, %v7662_v13  ;;  %v6913_v20 = vld [vmem:[%s7054_s12 + $0x48] sm:$0xff]  }
  0x87   : > { %v2220_v5 = vrot.slane %v2218_v12, 5  ;;  %6671 = vmatpush3.bf16.msra.mxu0 %v7620_v10  ;;  %v5946_v63 = vcombine.low %v2173_v43, %v2183_v0  ;;  %v2202_v3 = vrot.slane %v2201_v32, 4  ;;  %6640 = vmatprep.mubr.msk.bf16.mxu0 %vm515_vm2, %v6911_v16  ;;  %v2228_v27 = vshll.u32 %v7655_v48, 16  ;;  %v7718_v12 = vld [vmem:[%s7054_s12 + $0x70] sm:$0xf] }
  0x88   : > { %v2197_v61 = vsel %vm7105_vm4, %v2192_v53, %v2196_v54  ;;  %v2215_v21 = vor.u32 %v2214_v1, %v2211_v2  ;;  %v2224_v19 = vrot.slane %v2222_v8, 4  ;;  %v2233_v35 = vshrl.u32 %v5934_v51, 16  ;;  %6860 = vmatprep.subr.msk.bf16.mxu0 %vm540_vm0, %v7672_v37  ;;  %v5940_v54 = vld [vmem:[%s7054_s12 + $0x6c] sm:$0xf] }
  0x89   : > { %v2236_v56 = vshll.u32 %v5934_v51, 16  ;;  %6658 = vmatprep.mubr.msk.bf16.mxu1 %vm515_vm2, %v5946_v63  ;;  %v2207_v10 = vsel %vm7105_vm4, %v2202_v3, %v2206_v52  ;;  %v2230_v49 = vrot.slane %v2228_v27, 5  ;;  %v2242_v7 = vshll.u32 %v7679_v25, 16 }
  0x8a   : > { %v2246_v29 = vshrl.u32 %v7679_v25, 16  ;;  %v5947_v30 = vcombine.low %v2197_v61, %v2207_v10  ;;  %v2216_v34 = vrot.slane %v2215_v21, 4  ;;  %v2225_v44 = vor.u32 %v2224_v19, %v2220_v5  ;;  %v7728_v61 = vld [vmem:[%s7054_s12 + $0x74] sm:$0x1]  ;;  %v7732_v21 = vld [vmem:[%s7054_s12 + $0x60] sm:$0xf] }
  0x8b   : > { %v2235_v36 = vrot.slane %v2233_v35, 4  ;;  %v2238_v55 = vrot.slane %v2236_v56, 5  ;;  %v2244_v24 = vrot.slane %v2242_v7, 5  ;;  %v2252_v40 = vshll.u32 %v7689_v60, 16  ;;  %v6914_v35 = vld [vmem:[%s7054_s12 + $0x54] sm:$0xff]   ;;  %v6915_v7 = vld [vmem:[%s7054_s12 + $0x60] sm:$0xff]  }
  0x8c   : > { %v2248_v23 = vrot.slane %v2246_v29, 4  ;;  %6659 = vmatmul.mubr.msk.bf16.gmra.mxu1 %vm515_vm2, %v5947_v30  ;;  %v2221_v11 = vsel %vm7105_vm4, %v2216_v34, %v2220_v5  ;;  %v2226_v33 = vrot.slane %v2225_v44, 4  ;;  %v2257_v14 = vshrl.u32 %v5937_v28, 16  ;;  %v7737_v29 = vld [vmem:[%s7054_s12 + $0x64] sm:$0xf] }
  0x8d   : > { %v2260_v50 = vshll.u32 %v5937_v28, 16  ;;  %v2239_v17 = vor.u32 %v2238_v55, %v2235_v36  ;;  %v2254_v4 = vrot.slane %v2252_v40, 5  ;;  %v2266_v16 = vshll.u32 %v7702_v18, 16  ;;  %v7741_v44 = vld [vmem:[%s7054_s12 + $0x68] sm:$0x1] }
  0x8e   : > { %v2249_v15 = vor.u32 %v2248_v23, %v2244_v24  ;;  %6641 = vmatmul.mubr.msk.bf16.gmra.mxu0 %vm515_vm2, %v6912_v38  ;;  %v2231_v41 = vsel %vm7105_vm4, %v2226_v33, %v2230_v49  ;;  %v2259_v43 = vrot.slane %v2257_v14, 4  ;;  %v2270_v47 = vshrl.u32 %v7702_v18, 16  ;;  %v7749_v23 = vld [vmem:[%s7054_s12 + $0x6c] sm:$0xf] }
  0x8f   : > { %v2262_v46 = vrot.slane %v2260_v50, 5  ;;  %v5948_v51 = vcombine.low %v2221_v11, %v2231_v41  ;;  %v2240_v53 = vrot.slane %v2239_v17, 4  ;;  %6644 = vmatprep.mubr.msk.bf16.mxu0 %vm515_vm2, %v6913_v20  ;;  %v2268_v52 = vrot.slane %v2266_v16, 5  ;;  %v7754_v50 = vld [vmem:[%s7054_s12 + $0x70] sm:$0xf] }
  0x90   : > { %v2250_v32 = vrot.slane %v2249_v15, 4  ;;  %v2272_v0 = vrot.slane %v2270_v47, 4  ;;  %v2276_v1 = vshll.u32 %v7706_v62, 16  ;;  %v2281_v5 = vshrl.u32 %v5940_v54, 16 }
  0x91   : > { %v2263_v2 = vor.u32 %v2262_v46, %v2259_v43  ;;  %6662 = vmatprep.mubr.msk.bf16.mxu1 %vm515_vm2, %v5948_v51  ;;  %v2245_v8 = vsel %vm7105_vm4, %v2240_v53, %v2244_v24  ;;  %v2284_v3 = vshll.u32 %v5940_v54, 16  ;;  %v2290_v27 = vshll.u32 %v7718_v12, 16 }
  0x92   : > { %v2255_v63 = vsel %vm7105_vm4, %v2250_v32, %v2254_v4  ;;  %v2273_v10 = vor.u32 %v2272_v0, %v2268_v52  ;;  %v2278_v49 = vrot.slane %v2276_v1, 5  ;;  %v2283_v28 = vrot.slane %v2281_v5, 4  ;;  %v7767_v1 = vld [vmem:[%s7054_s12 + $0x74] sm:$0x1] }
  0x93   : > { %v5949_v19 = vcombine.low %v2245_v8, %v2255_v63  ;;  %v2264_v56 = vrot.slane %v2263_v2, 4  ;;  %v2286_v30 = vrot.slane %v2284_v3, 5  ;;  %v2292_v38 = vrot.slane %v2290_v27, 5  ;;  %v6916_v8 = vld [vmem:[%s7054_s12 + $0x6c] sm:$0xff]  }
  0x94   : > { %v2294_v34 = vshrl.u32 %v7718_v12, 16  ;;  %v2274_v20 = vrot.slane %v2273_v10, 4  ;;  %v2300_v55 = vshll.u32 %v7728_v61, 16  ;;  %v2939_v24 = vshrl.u32 %v7732_v21, 16 }
  0x95   : > { %6663 = vmatmul.mubr.msk.bf16.gmra.mxu1 %vm515_vm2, %v5949_v19  ;;  %v2269_v36 = vsel %vm7105_vm4, %v2264_v56, %v2268_v52  ;;  %v2287_v40 = vor.u32 %v2286_v30, %v2283_v28  ;;  %v2942_v33 = vshll.u32 %v7732_v21, 16  ;;  %v2948_v14 = vshll.u32 %v7737_v29, 16 }
  0x96   : > { %v2296_v11 = vrot.slane %v2294_v34, 4  ;;  %6645 = vmatmul.mubr.msk.bf16.gmra.mxu0 %vm515_vm2, %v6914_v35  ;;  %v2279_v54 = vsel %vm7105_vm4, %v2274_v20, %v2278_v49  ;;  %v2302_v17 = vrot.slane %v2300_v55, 5  ;;  %v2941_v15 = vrot.slane %v2939_v24, 4  ;;  %v5960_v35 = vld [vmem:[%s7054_s12 + $0x18] sm:$0xe] }
  0x97   : > { %v2952_v4 = vshrl.u32 %v7737_v29, 16  ;;  %v5950_v16 = vcombine.low %v2269_v36, %v2279_v54  ;;  %v2288_v41 = vrot.slane %v2287_v40, 4  ;;  %6648 = vmatprep.mubr.msk.bf16.mxu0 %vm515_vm2, %v6915_v7  ;;  %v2944_v46 = vrot.slane %v2942_v33, 5  ;;  %v5961_v36 = vld [vmem:[%s7054_s12 + $0x24] sm:$0xe] }
  0x98   : > { %v2297_v43 = vor.u32 %v2296_v11, %v2292_v38  ;;  %v2950_v47 = vrot.slane %v2948_v14, 5  ;;  %v2958_v53 = vshll.u32 %v7741_v44, 16  ;;  %v2963_v32 = vshrl.u32 %v7749_v23, 16  ;;  %v7781_v11 = vld [vmem:[%s7054_s12 + $0x78] sm:$0xf] }
  0x99   : > { %v2954_v51 = vrot.slane %v2952_v4, 4  ;;  %6666 = vmatprep.mubr.msk.bf16.mxu1 %vm515_vm2, %v5950_v16  ;;  %v2293_v52 = vsel %vm7105_vm4, %v2288_v41, %v2292_v38  ;;  %v2945_v0 = vor.u32 %v2944_v46, %v2941_v15  ;;  %v2966_v5 = vshll.u32 %v7749_v23, 16 }
  0x9a   : > { %v2298_v2 = vrot.slane %v2297_v43, 4  ;;  %v2960_v3 = vrot.slane %v2958_v53, 5  ;;  %v2965_v27 = vrot.slane %v2963_v32, 4  ;;  %v2972_v19 = vshll.u32 %v7754_v50, 16  ;;  %v7794_v53 = vld [vmem:[%s7054_s12 + $0x7c] sm:$0xf] }
  0x9b   : > { %v2955_v63 = vor.u32 %v2954_v51, %v2950_v47  ;;  %v2946_v10 = vrot.slane %v2945_v0, 4  ;;  %v2968_v49 = vrot.slane %v2966_v5, 5  ;;  %v2976_v7 = vshrl.u32 %v7754_v50, 16 }
  0x9c   : > { %v2303_v56 = vsel %vm7105_vm4, %v2298_v2, %v2302_v17  ;;  %v2974_v38 = vrot.slane %v2972_v19, 5  ;;  %v2982_v34 = vshll.u32 %v7767_v1, 16  ;;  %v5968_v40 = vrot.slane %v5960_v35, 9  ;;  %v7804_v2 = vld [vmem:[%s7054_s12 + $0x80] sm:$0x1] }
  0x9d   : > { %v5951_v28 = vcombine.low %v2293_v52, %v2303_v56  ;;  %v2956_v30 = vrot.slane %v2955_v63, 4  ;;  %v2951_v20 = vsel %vm7105_vm4, %v2946_v10, %v2950_v47  ;;  %v2969_v55 = vor.u32 %v2968_v49, %v2965_v27  ;;  %v7815_v63 = vld [vmem:[%s7054_s12 + $0x88] sm:$0xf]  ;;  %v7822_v19 = vld [vmem:[%s7054_s12 + $0x8c] sm:$0x1] }
  0x9e   : > { %v2978_v24 = vrot.slane %v2976_v7, 4  ;;  %6649 = vmatmul.mubr.msk.bf16.gmra.mxu0 %vm515_vm2, %v6916_v8  ;;  %v2984_v14 = vrot.slane %v2982_v34, 5  ;;  %v2504_v54 = vrot.slane %v7583_v58, 5  ;;  %v2507_v17 = vrot.slane %v7587_v31, 5  ;;  %v7812_v8 = vld [vmem:[%s7054_s12 + $0x84] sm:$0xf] }
  0x9f   : > { %6667 = vmatmul.mubr.msk.bf16.gmra.mxu1 %vm515_vm2, %v5951_v28  ;;  %v2961_v33 = vsel %vm7105_vm4, %v2956_v30, %v2960_v3  ;;  %v2970_v4 = vrot.slane %v2969_v55, 4  ;;  %v5969_v41 = vrot.slane %v5961_v36, 9  ;;  %v2511_v47 = vrot.slane %v7597_v39, 5  ;;  %v7827_v35 = vld [vmem:[%s9693_s1 + $0x10] sm:$0xf] }
  0xa0   : > { %v6034_v15 = vcombine.low %v2951_v20, %v2961_v33  ;;  %v2979_v16 = vor.u32 %v2978_v24, %v2974_v38  ;;  %v2505_v43 = vsel %vm7218_vm7, %v5968_v40, %v2504_v54  ;;  %v2506_v46 = vrot.slane %v2504_v54, 4  ;;  %v5962_v28 = vld [vmem:[%s7054_s12 + $0x30] sm:$0xe]  ;;  %v7836_v30 = vld [vmem:[%s9693_s1 + $0xc] sm:$0xf] }
  0xa1   : > { %v2514_v51 = vrot.slane %v7605_v57, 5  ;;  %v2975_v58 = vsel %vm7105_vm4, %v2970_v4, %v2974_v38  ;;  %v3344_v32 = vsel %vm540_vm0, %v7672_v37, 0  ;;  %v3573_v52 = vsel %vm540_vm0, %v7662_v13, 0 }
  0xa2   : > { %6690 = vmatprep.mubr.msk.bf16.mxu1 %vm515_vm2, %v6034_v15  ;;  %v2980_v31 = vrot.slane %v2979_v16, 4  ;;  %v2508_v39 = vsel %vm7218_vm7, %v2506_v46, %v2507_v17  ;;  %v2512_v57 = vsel %vm7218_vm7, %v5969_v41, %v2511_v47  ;;  %v2513_v0 = vrot.slane %v2511_v47, 4 }
  0xa3   : > { %v2987_v5 = vshrl.u32 %v7781_v11, 16  ;;  %v5977_v13 = vcombine.low %v2505_v43, %v2508_v39  ;;  %v2990_v3 = vshll.u32 %v7781_v11, 16  ;;  %v2996_v27 = vshll.u32 %v7794_v53, 16 }
  0xa4   : > { %v2985_v37 = vsel %vm7105_vm4, %v2980_v31, %v2984_v14  ;;  %v2515_v10 = vsel %vm7218_vm7, %v2513_v0, %v2514_v51  ;;  %v3000_v7 = vshrl.u32 %v7794_v53, 16  ;;  %v3006_v20 = vshll.u32 %v7804_v2, 16  ;;  %v5963_v14 = vld [vmem:[%s7054_s12 + $0x3c] sm:$0xe] }
  0xa5   : > { %v6035_v56 = vcombine.low %v2975_v58, %v2985_v37  ;;  %v2989_v49 = vrot.slane %v2987_v5, 4  ;;  %6672 = vmatprep.mubr.msk.bf16.mxu0 %vm515_vm2, %v5977_v13  ;;  %v5978_v38 = vcombine.low %v2512_v57, %v2515_v10  ;;  %v2992_v34 = vrot.slane %v2990_v3, 5  ;;  %v7858_v3 = vld [vmem:[%s7054_s12 + $0x90] sm:$0xf] }
  0xa6   : > { %v2998_v36 = vrot.slane %v2996_v27, 5  ;;  %v3002_v55 = vrot.slane %v3000_v7, 4  ;;  %v3011_v24 = vshrl.u32 %v7812_v8, 16  ;;  %v3014_v40 = vshll.u32 %v7812_v8, 16 }
  0xa7   : > { %6691 = vmatmul.mubr.msk.bf16.vlgmr.msra.gmra.mxu1 %vm515_vm2, %v6035_v56  ;;  %v3020_v33 = vshll.u32 %v7815_v63, 16  ;;  %6673 = vmatmul.mubr.msk.bf16.vlgmr.msra.gmra.mxu0 %vm515_vm2, %v5978_v38  ;;  %v2993_v54 = vor.u32 %v2992_v34, %v2989_v49  ;;  %v3008_v17 = vrot.slane %v3006_v20, 5  ;;  %v3024_v15 = vshrl.u32 %v7815_v63, 16  ;;  %v7865_v49 = vld [vmem:[%s7054_s12 + $0x94] sm:$0xf] }
  0xa8   : > { %6725 = vmatpush3.bf16.msra.mxu1 %v3573_v52  ;;  %v3030_v4 = vshll.u32 %v7822_v19, 16  ;;  %6707 = vmatpush3.bf16.msra.mxu0 %v3344_v32  ;;  %v3003_v16 = vor.u32 %v3002_v55, %v2998_v36  ;;  %v3013_v41 = vrot.slane %v3011_v24, 4  ;;  %v3016_v43 = vrot.slane %v3014_v40, 5  ;;  %v7873_v34 = vld [vmem:[%s7054_s12 + $0x9c] sm:$0xf] }
  0xa9   : > { %v3022_v46 = vrot.slane %v3020_v33, 5  ;;  %6863 = vmatprep.subr.msk.bf16.mxu1 %vm540_vm0, %v7827_v35  ;;  %v2994_v47 = vrot.slane %v2993_v54, 4  ;;  %v3026_v51 = vrot.slane %v3024_v15, 4  ;;  %v5970_v31 = vrot.slane %v5962_v28, 9  ;;  %6862 = vmatprep.subr.msk.bf16.mxu0 %vm540_vm0, %v7836_v30  ;;  %v7890_v15 = vld [vmem:[%s7054_s12 + $0xa4] sm:$0x1] }
  0xaa   : > { %v3032_v58 = vrot.slane %v3030_v4, 5  ;;  %v3004_v52 = vrot.slane %v3003_v16, 4  ;;  %v3017_v39 = vor.u32 %v3016_v43, %v3013_v41  ;;  %v2518_v32 = vrot.slane %v7613_v6, 5  ;;  %v5964_v43 = vld [vmem:[%s7054_s12 + $0x48] sm:$0xe] }
  0xab   : > { %v2521_v57 = vrot.slane %v7626_v9, 5  ;;  %v2999_v0 = vsel %vm7105_vm4, %v2994_v47, %v2998_v36  ;;  %v3027_v5 = vor.u32 %v3026_v51, %v3022_v46  ;;  %v5971_v37 = vrot.slane %v5963_v14, 9  ;;  %v7868_v9 = vld [vmem:[%s7054_s12 + $0x98] sm:$0x1] }
  0xac   : > { %v2525_v13 = vrot.slane %v7633_v26, 5  ;;  %v3009_v27 = vsel %vm7105_vm4, %v3004_v52, %v3008_v17  ;;  %v3018_v56 = vrot.slane %v3017_v39, 4  ;;  %v2519_v10 = vsel %vm7218_vm7, %v5970_v31, %v2518_v32  ;;  %v7887_v17 = vld [vmem:[%s7054_s12 + $0xa0] sm:$0xf] }
  0xad   : > { %v2520_v6 = vrot.slane %v2518_v32, 4  ;;  %v6036_v7 = vcombine.low %v2999_v0, %v3009_v27  ;;  %v3028_v28 = vrot.slane %v3027_v5, 4  ;;  %v2528_v55 = vrot.slane %v7643_v22, 5 }
  0xae   : > { %v2526_v26 = vsel %vm7218_vm7, %v5971_v37, %v2525_v13  ;;  %v2527_v38 = vrot.slane %v2525_v13, 4  ;;  %v3023_v36 = vsel %vm7105_vm4, %v3018_v56, %v3022_v46  ;;  %v3035_v24 = vshrl.u32 %v7858_v3, 16 }
  0xaf   : > { %v2522_v20 = vsel %vm7218_vm7, %v2520_v6, %v2521_v57  ;;  %6694 = vmatprep.mubr.msk.bf16.mxu1 %vm515_vm2, %v6036_v7  ;;  %v3033_v40 = vsel %vm7105_vm4, %v3028_v28, %v3032_v58  ;;  %v3038_v14 = vshll.u32 %v7858_v3, 16  ;;  %v3044_v54 = vshll.u32 %v7865_v49, 16  ;;  %v5965_v6 = vld [vmem:[%s7054_s12 + $0x54] sm:$0xe] }
  0xb0   : > { %v5979_v33 = vcombine.low %v2519_v10, %v2522_v20  ;;  %v6037_v4 = vcombine.low %v3023_v36, %v3033_v40  ;;  %v2529_v22 = vsel %vm7218_vm7, %v2527_v38, %v2528_v55  ;;  %v3037_v16 = vrot.slane %v3035_v24, 4  ;;  %v7907_v36 = vld [vmem:[%s7054_s12 + $0xa8] sm:$0xf] }
  0xb1   : > { %v3048_v41 = vshrl.u32 %v7865_v49, 16  ;;  %v5980_v46 = vcombine.low %v2526_v26, %v2529_v22  ;;  %v3040_v47 = vrot.slane %v3038_v14, 5  ;;  %v3046_v51 = vrot.slane %v3044_v54, 5 }
  0xb2   : > { %6676 = vmatprep.mubr.msk.bf16.mxu0 %vm515_vm2, %v5979_v33  ;;  %v3054_v58 = vshll.u32 %v7868_v9, 16  ;;  %6695 = vmatmul.mubr.msk.bf16.gmra.mxu1 %vm515_vm2, %v6037_v4  ;;  %v3059_v52 = vshrl.u32 %v7873_v34, 16  ;;  %v3062_v39 = vshll.u32 %v7873_v34, 16  ;;  %v3068_v32 = vshll.u32 %v7887_v17, 16 }
  0xb3   : > { %v3050_v31 = vrot.slane %v3048_v41, 4  ;;  %6677 = vmatmul.mubr.msk.bf16.gmra.mxu0 %vm515_vm2, %v5980_v46  ;;  %v3041_v57 = vor.u32 %v3040_v47, %v3037_v16  ;;  %v3072_v5 = vshrl.u32 %v7887_v17, 16  ;;  %v3078_v37 = vshll.u32 %v7890_v15, 16 }
  0xb4   : > { %v3056_v0 = vrot.slane %v3054_v58, 5  ;;  %v3061_v27 = vrot.slane %v3059_v52, 4  ;;  %v3064_v56 = vrot.slane %v3062_v39, 5  ;;  %v3070_v10 = vrot.slane %v3068_v32, 5  ;;  %v7929_v52 = vld [vmem:[%s7054_s12 + $0xb0] sm:$0x1] }
  0xb5   : > { %v3051_v13 = vor.u32 %v3050_v31, %v3046_v51  ;;  %v3042_v7 = vrot.slane %v3041_v57, 4  ;;  %v3074_v28 = vrot.slane %v3072_v5, 4  ;;  %v3080_v26 = vrot.slane %v3078_v37, 5  ;;  %v7938_v37 = vld [vmem:[%s7054_s12 + $0xb4] sm:$0xf] }
  0xb6   : > { %v5972_v38 = vrot.slane %v5964_v43, 9  ;;  %v3065_v55 = vor.u32 %v3064_v56, %v3061_v27  ;;  %v2532_v24 = vrot.slane %v7651_v59, 5  ;;  %v2535_v40 = vrot.slane %v7655_v48, 5  ;;  %v7919_v59 = vld [vmem:[%s7054_s12 + $0xac] sm:$0xf] }
  0xb7   : > { %v3052_v20 = vrot.slane %v3051_v13, 4  ;;  %v3047_v33 = vsel %vm7105_vm4, %v3042_v7, %v3046_v51  ;;  %v3075_v14 = vor.u32 %v3074_v28, %v3070_v10  ;;  %v5973_v54 = vrot.slane %v5965_v6, 9  ;;  %v7941_v13 = vld [vmem:[%s7054_s12 + $0xb8] sm:$0xf]  ;;  %v7947_v6 = vld [vmem:[%s7054_s12 + $0xbc] sm:$0x1] }
  0xb8   : > { %v2539_v4 = vrot.slane %v7679_v25, 5  ;;  %v3066_v16 = vrot.slane %v3065_v55, 4  ;;  %v2533_v41 = vsel %vm7218_vm7, %v5972_v38, %v2532_v24  ;;  %v2534_v43 = vrot.slane %v2532_v24, 4 }
  0xb9   : > { %v3057_v22 = vsel %vm7105_vm4, %v3052_v20, %v3056_v0  ;;  %v3076_v46 = vrot.slane %v3075_v14, 4  ;;  %v2542_v31 = vrot.slane %v7689_v60, 5  ;;  %v3083_v39 = vshrl.u32 %v7907_v36, 16 }
  0xba   : > { %v6038_v48 = vcombine.low %v3047_v33, %v3057_v22  ;;  %v2540_v47 = vsel %vm7218_vm7, %v5973_v54, %v2539_v4  ;;  %v2541_v51 = vrot.slane %v2539_v4, 4  ;;  %v3071_v25 = vsel %vm7105_vm4, %v3066_v16, %v3070_v10  ;;  %v5966_v33 = vld [vmem:[%s7054_s12 + $0x60] sm:$0xe] }
  0xbb   : > { %v2536_v58 = vsel %vm7218_vm7, %v2534_v43, %v2535_v40  ;;  %v3081_v32 = vsel %vm7105_vm4, %v3076_v46, %v3080_v26  ;;  %v3086_v0 = vshll.u32 %v7907_v36, 16  ;;  %v3092_v5 = vshll.u32 %v7919_v59, 16  ;;  %v5967_v46 = vld [vmem:[%s7054_s12 + $0x6c] sm:$0xe] }
  0xbc   : > { %6698 = vmatprep.mubr.msk.bf16.mxu1 %vm515_vm2, %v6038_v48  ;;  %v5981_v57 = vcombine.low %v2533_v41, %v2536_v58  ;;  %v6039_v60 = vcombine.low %v3071_v25, %v3081_v32  ;;  %v2543_v27 = vsel %vm7218_vm7, %v2541_v51, %v2542_v31  ;;  %v3085_v56 = vrot.slane %v3083_v39, 4 }
  0xbd   : > { %v3096_v10 = vshrl.u32 %v7919_v59, 16  ;;  %v5982_v7 = vcombine.low %v2540_v47, %v2543_v27  ;;  %v3088_v28 = vrot.slane %v3086_v0, 5  ;;  %v3094_v26 = vrot.slane %v3092_v5, 5 }
  0xbe   : > { %6680 = vmatprep.mubr.msk.bf16.mxu0 %vm515_vm2, %v5981_v57  ;;  %v3102_v38 = vshll.u32 %v7929_v52, 16  ;;  %6699 = vmatmul.mubr.msk.bf16.gmra.mxu1 %vm515_vm2, %v6039_v60  ;;  %v3107_v55 = vshrl.u32 %v7938_v37, 16  ;;  %v3110_v24 = vshll.u32 %v7938_v37, 16  ;;  %v3116_v40 = vshll.u32 %v7941_v13, 16 }
  0xbf   : > { %v3098_v20 = vrot.slane %v3096_v10, 4  ;;  %6681 = vmatmul.mubr.msk.bf16.gmra.mxu0 %vm515_vm2, %v5982_v7  ;;  %v3089_v14 = vor.u32 %v3088_v28, %v3085_v56  ;;  %v3120_v4 = vshrl.u32 %v7941_v13, 16  ;;  %v3126_v22 = vshll.u32 %v7947_v6, 16  ;;  %v6066_v56 = vld [vmem:[%s7054_s12 + $0x60] sm:$0xe] }
  0xc0   : > { %v3104_v54 = vrot.slane %v3102_v38, 5  ;;  %v3109_v41 = vrot.slane %v3107_v55, 4  ;;  %v3112_v43 = vrot.slane %v3110_v24, 5  ;;  %v3118_v48 = vrot.slane %v3116_v40, 5  ;;  %v6067_v55 = vld [vmem:[%s7054_s12 + $0x6c] sm:$0xe] }
  0xc1   : > { %v3099_v16 = vor.u32 %v3098_v20, %v3094_v26  ;;  %v3090_v47 = vrot.slane %v3089_v14, 4  ;;  %v3122_v51 = vrot.slane %v3120_v4, 4  ;;  %v3128_v25 = vrot.slane %v3126_v22, 5 }
  0xc2   : > { %v5974_v58 = vrot.slane %v5966_v33, 9  ;;  %v3113_v39 = vor.u32 %v3112_v43, %v3109_v41  ;;  %v2546_v32 = vrot.slane %v7702_v18, 5  ;;  %v2549_v57 = vrot.slane %v7706_v62, 5 }
  0xc3   : > { %v3100_v31 = vrot.slane %v3099_v16, 4  ;;  %v3095_v0 = vsel %vm7105_vm4, %v3090_v47, %v3094_v26  ;;  %v3123_v5 = vor.u32 %v3122_v51, %v3118_v48  ;;  %v5975_v60 = vrot.slane %v5967_v46, 9 }
  0xc4   : > { %v2553_v27 = vrot.slane %v7718_v12, 5  ;;  %v3114_v7 = vrot.slane %v3113_v39, 4  ;;  %v2547_v28 = vsel %vm7218_vm7, %v5974_v58, %v2546_v32  ;;  %v2548_v38 = vrot.slane %v2546_v32, 4 }
  0xc5   : > { %v3105_v10 = vsel %vm7105_vm4, %v3100_v31, %v3104_v54  ;;  %v3124_v18 = vrot.slane %v3123_v5, 4  ;;  %v2556_v40 = vrot.slane %v7728_v61, 5  ;;  %v6074_v33 = vrot.slane %v6066_v56, 9  ;;  %v6068_v61 = vld [vmem:[%s7054_s12 + $0x78] sm:$0xe] }
  0xc6   : > { %v6040_v20 = vcombine.low %v3095_v0, %v3105_v10  ;;  %v2554_v62 = vsel %vm7218_vm7, %v5975_v60, %v2553_v27  ;;  %v2555_v26 = vrot.slane %v2553_v27, 4  ;;  %v3119_v12 = vsel %vm7105_vm4, %v3114_v7, %v3118_v48  ;;  %v6069_v31 = vld [vmem:[%s7054_s12 + $0x84] sm:$0xe]  ;;  %v6070_v60 = vld [vmem:[%s7054_s12 + $0x90] sm:$0xe] }
  0xc7   : > { %v2550_v24 = vsel %vm7218_vm7, %v2548_v38, %v2549_v57  ;;  %v3129_v14 = vsel %vm7105_vm4, %v3124_v18, %v3128_v25  ;;  %v3469_v4 = vrot.slane %v7737_v29, 5  ;;  %v3472_v22 = vrot.slane %v7741_v44, 5 }
  0xc8   : > { %6702 = vmatprep.mubr.msk.bf16.mxu1 %vm515_vm2, %v6040_v20  ;;  %v5983_v54 = vcombine.low %v2547_v28, %v2550_v24  ;;  %v6041_v16 = vcombine.low %v3119_v12, %v3129_v14  ;;  %v2557_v41 = vsel %vm7218_vm7, %v2555_v26, %v2556_v40  ;;  %v6075_v43 = vrot.slane %v6067_v55, 9  ;;  %v6072_v14 = vld [vmem:[%s7054_s12 + $0xa8] sm:$0xe] }
  0xc9   : > { %v3476_v48 = vrot.slane %v7754_v50, 5  ;;  %v5984_v46 = vcombine.low %v2554_v62, %v2557_v41  ;;  %v3470_v47 = vsel %vm7218_vm7, %v6074_v33, %v3469_v4  ;;  %v3471_v51 = vrot.slane %v3469_v4, 4 }
  0xca   : > { %6684 = vmatprep.mubr.msk.bf16.mxu0 %vm515_vm2, %v5983_v54  ;;  %v3479_v25 = vrot.slane %v7767_v1, 5  ;;  %6703 = vmatmul.mubr.msk.bf16.gmra.mxu1 %vm515_vm2, %v6041_v16  ;;  %v6050_v58 = vcombine.low %v7732_v21, %v7737_v29  ;;  %v6051_v57 = vcombine.low %v7749_v23, %v7754_v50  ;;  %v6076_v1 = vrot.slane %v6068_v61, 9  ;;  %v6071_v50 = vld [vmem:[%s7054_s12 + $0x9c] sm:$0xe] }
  0xcb   : > { %v3478_v44 = vrot.slane %v3476_v48, 4  ;;  %6685 = vmatmul.mubr.msk.bf16.gmra.mxu0 %vm515_vm2, %v5984_v46  ;;  %v3473_v39 = vsel %vm7218_vm7, %v3471_v51, %v3472_v22  ;;  %v3477_v32 = vsel %vm7218_vm7, %v6075_v43, %v3476_v48  ;;  %v3483_v21 = vrot.slane %v7794_v53, 5  ;;  %v6073_v22 = vld [vmem:[%s7054_s12 + $0xb4] sm:$0xe] }
  0xcc   : > { %v6083_v0 = vcombine.low %v3470_v47, %v3473_v39  ;;  %6708 = vmatprep.mubr.msk.bf16.mxu0 %vm515_vm2, %v6050_v58  ;;  %v3486_v29 = vrot.slane %v7804_v2, 5  ;;  %v3771_v27 = vsel %vm540_vm0, %v7836_v30, 0  ;;  %v6077_v56 = vrot.slane %v6069_v31, 9 }
  0xcd   : > { %v3480_v5 = vsel %vm7218_vm7, %v3478_v44, %v3479_v25  ;;  %v3490_v10 = vrot.slane %v7815_v63, 5  ;;  %v3493_v23 = vrot.slane %v7822_v19, 5  ;;  %v4152_v28 = vsel %vm540_vm0, %v7827_v35, 0  ;;  %v8065_v25 = vld [vmem:[%s7054_s12 + $0x70] sm:$0xf] }
  0xce   : > { %6726 = vmatprep.mubr.msk.bf16.mxu1 %vm515_vm2, %v6083_v0  ;;  %v6084_v7 = vcombine.low %v3477_v32, %v3480_v5  ;;  %v3484_v2 = vsel %vm7218_vm7, %v6076_v1, %v3483_v21  ;;  %v3485_v38 = vrot.slane %v3483_v21, 4  ;;  %v6078_v18 = vrot.slane %v6070_v60, 9  ;;  %v8089_v60 = vld [vmem:[%s7054_s12 + $0x7c] sm:$0xf] }
  0xcf   : > { %v3491_v30 = vsel %vm7218_vm7, %v6077_v56, %v3490_v10  ;;  %v3492_v20 = vrot.slane %v3490_v10, 4  ;;  %v3497_v19 = vrot.slane %v7865_v49, 5  ;;  %v3500_v26 = vrot.slane %v7868_v9, 5  ;;  %v8036_v9 = vld [vmem:[%s9693_s1 + $0x14] sm:$0xf] }
  0xd0   : > { %v3487_v62 = vsel %vm7218_vm7, %v3485_v38, %v3486_v29  ;;  %v6079_v55 = vrot.slane %v6071_v50, 9  ;;  %v3504_v35 = vrot.slane %v7887_v17, 5  ;;  %v6052_v40 = vcombine.low %v7781_v11, %v7794_v53  ;;  %v6135_v29 = vld [vmem:[%s7054_s12 + $0x78] sm:$0xf]  ;;  %v8098_v50 = vld [vmem:[%s7054_s12 + $0x80] sm:$0x1] }
  0xd1   : > { %v6085_v12 = vcombine.low %v3484_v2, %v3487_v62  ;;  %v3494_v24 = vsel %vm7218_vm7, %v3492_v20, %v3493_v23  ;;  %v3499_v33 = vrot.slane %v3497_v19, 4  ;;  %v3507_v4 = vrot.slane %v7890_v15, 5  ;;  %v8046_v15 = vld [vmem:[%s9693_s1 + $0x18] sm:$0xf] }
  0xd2   : > { %6727 = vmatmul.mubr.msk.bf16.vlgmr.msra.gmra.mxu1 %vm515_vm2, %v6084_v7  ;;  %v3506_v54 = vrot.slane %v3504_v35, 4  ;;  %v6086_v16 = vcombine.low %v3491_v30, %v3494_v24  ;;  %v6053_v11 = vcombine.low %v7812_v8, %v7815_v63  ;;  %v3498_v53 = vsel %vm7218_vm7, %v6078_v18, %v3497_v19  ;;  %v6132_v63 = vld [vmem:[%s7054_s12 + $0x6c] sm:$0xf] }
  0xd3   : > { %6709 = vmatmul.mubr.msk.bf16.vlgmr.msra.gmra.mxu0 %vm515_vm2, %v6051_v57  ;;  %6761 = vmatpush3.bf16.msra.mxu1 %v4152_v28  ;;  %v3501_v41 = vsel %vm7218_vm7, %v3499_v33, %v3500_v26  ;;  %v8053_v43 = vsel %vm7218_vm7, %v6079_v55, %v3504_v35  ;;  %v6080_v48 = vrot.slane %v6072_v14, 9  ;;  %v3511_v8 = vrot.slane %v7919_v59, 5  ;;  %v8077_v57 = vld [vmem:[%s7054_s12 + $0x74] sm:$0x1] }
  0xd4   : > { %6743 = vmatpush3.bf16.msra.mxu0 %v3771_v27  ;;  %6730 = vmatprep.mubr.msk.bf16.mxu1 %vm515_vm2, %v6085_v12  ;;  %v8060_v61 = vsel %vm7218_vm7, %v3506_v54, %v3507_v4  ;;  %v3514_v46 = vrot.slane %v7929_v52, 5  ;;  %v6081_v47 = vrot.slane %v6073_v22, 9  ;;  %v3518_v51 = vrot.slane %v7941_v13, 5  ;;  %v6138_v22 = vld [vmem:[%s7054_s12 + $0x84] sm:$0xf] }
  0xd5   : > { %6712 = vmatprep.mubr.msk.bf16.mxu0 %vm515_vm2, %v6052_v40  ;;  %6864 = vmatprep.subr.msk.bf16.mxu0 %vm540_vm0, %v8036_v9  ;;  %v6054_v44 = vcombine.low %v7858_v3, %v7865_v49  ;;  %v6055_v58 = vcombine.low %v7873_v34, %v7887_v17  ;;  %v3513_v31 = vrot.slane %v3511_v8, 4  ;;  %v3521_v39 = vrot.slane %v7947_v6, 5 }
  0xd6   : > { %6865 = vmatprep.subr.msk.bf16.mxu1 %vm540_vm0, %v8046_v15  ;;  %v6087_v52 = vcombine.low %v3498_v53, %v3501_v41  ;;  %v3520_v32 = vrot.slane %v3518_v51, 4  ;;  %v3911_v1 = vshrl.u32 %v6132_v63, 16  ;;  %v3914_v0 = vshll.u32 %v6132_v63, 16  ;;  %v8129_v53 = vld [vmem:[%s7054_s12 + $0x88] sm:$0xf] }
  0xd7   : > { %v8079_v5 = vpop.f32.mrf.mxu1  ;;  %v6088_v3 = vcombine.low %v8053_v43, %v8060_v61  ;;  %v3512_v49 = vsel %vm7218_vm7, %v6080_v48, %v3511_v8  ;;  %v3920_v6 = vshll.u32 %v8065_v25, 16  ;;  %v3924_v21 = vshrl.u32 %v8065_v25, 16  ;;  %v8132_v63 = vld [vmem:[%s7054_s12 + $0x8c] sm:$0x1] }
  0xd8   : > { %v3515_v27 = vsel %vm7218_vm7, %v3513_v31, %v3514_v46  ;;  %v8095_v56 = vsel %vm7218_vm7, %v6081_v47, %v3518_v51  ;;  %v3913_v10 = vrot.slane %v3911_v1, 4  ;;  %v3916_v23 = vrot.slane %v3914_v0, 5 }
  0xd9   : > { %v8100_v7 = vpop.f32.mrf.mxu1  ;;  %v8105_v28 = vsel %vm7218_vm7, %v3520_v32, %v3521_v39  ;;  %v8107_v2 = vrot.slane %v3920_v6, 5  ;;  %v3926_v38 = vrot.slane %v3924_v21, 4  ;;  %v3930_v30 = vshll.u32 %v8077_v57, 16 }
  0xda   : > { %6731 = vmatmul.mubr.msk.bf16.gmra.mxu1 %vm515_vm2, %v6086_v16  ;;  %v3917_v20 = vor.u32 %v3916_v23, %v3913_v10  ;;  %v3935_v18 = vshrl.u32 %v6135_v29, 16  ;;  %v3938_v19 = vshll.u32 %v6135_v29, 16  ;;  %v3944_v62 = vshll.u32 %v8089_v60, 16 }
  0xdb   : > { %6713 = vmatmul.mubr.msk.bf16.gmra.mxu0 %vm515_vm2, %v6053_v11  ;;  %6734 = vmatprep.mubr.msk.bf16.mxu1 %vm515_vm2, %v6087_v52  ;;  %v8113_v26 = vpop.f32.mrf.mxu1  ;;  %v6056_v55 = vcombine.low %v7907_v36, %v7919_v59  ;;  %v3927_v35 = vor.u32 %v3926_v38, %v8107_v2  ;;  %v3948_v12 = vshrl.u32 %v8089_v60, 16  ;;  %v3954_v24 = vshll.u32 %v8098_v50, 16 }
  0xdc   : > { %6716 = vmatprep.mubr.msk.bf16.mxu0 %vm515_vm2, %v6054_v44  ;;  %v3918_v40 = vrot.slane %v3917_v20, 4  ;;  %v3937_v33 = vrot.slane %v3935_v18, 4  ;;  %v3940_v14 = vrot.slane %v3938_v19, 5  ;;  %v3946_v54 = vrot.slane %v3944_v62, 5  ;;  %v6141_v44 = vld [vmem:[%s7054_s12 + $0x90] sm:$0xf] }
  0xdd   : > { %v8121_v4 = vpop.f32.mrf.mxu1  ;;  %v6089_v16 = vcombine.low %v3512_v49, %v3515_v27  ;;  %v6090_v11 = vcombine.low %v8095_v56, %v8105_v28  ;;  %v6057_v36 = vcombine.low %v7938_v37, %v7941_v13  ;;  %v3950_v59 = vrot.slane %v3948_v12, 4 }
  0xde   : > { %v3928_v41 = vrot.slane %v3927_v35, 4  ;;  %v3932_v43 = vrot.slane %v3930_v30, 5  ;;  %v3941_v48 = vor.u32 %v3940_v14, %v3937_v33  ;;  %v3956_v8 = vrot.slane %v3954_v24, 5  ;;  %v8169_v30 = vld [vmem:[%s7054_s12 + $0x98] sm:$0x1] }
  0xdf   : > { %v3923_v61 = vsel %vm7105_vm4, %v3918_v40, %v8107_v2  ;;  %v3951_v46 = vor.u32 %v3950_v59, %v3946_v54  ;;  %v3959_v47 = vshrl.u32 %v6138_v22, 16  ;;  %v3962_v51 = vshll.u32 %v6138_v22, 16  ;;  %v6144_v33 = vld [vmem:[%s7054_s12 + $0x9c] sm:$0xf] }
  0xe0   : > { %v3942_v31 = vrot.slane %v3941_v48, 4  ;;  %v8140_v39 = vsel %vm540_vm0, %v8046_v15, 0  ;;  %v3968_v52 = vshll.u32 %v8129_v53, 16  ;;  %v3972_v32 = vshrl.u32 %v8129_v53, 16 }
  0xe1   : > { %v8144_v1 = vpop.f32.mrf.mxu1  ;;  %v3952_v0 = vrot.slane %v3951_v46, 4  ;;  %v3961_v49 = vrot.slane %v3959_v47, 4  ;;  %v3964_v6 = vrot.slane %v3962_v51, 5  ;;  %v3978_v21 = vshll.u32 %v8132_v63, 16  ;;  %v8187_v47 = vld [vmem:[%s7054_s12 + $0xa0] sm:$0xf] }
  0xe2   : > { %6735 = vmatmul.mubr.msk.bf16.gmra.mxu1 %vm515_vm2, %v6088_v3  ;;  %v3933_v15 = vsel %vm7105_vm4, %v3928_v41, %v3932_v43  ;;  %v3970_v27 = vrot.slane %v3968_v52, 5  ;;  %v3974_v10 = vrot.slane %v3972_v32, 4  ;;  %v8156_v3 = vld [vmem:[%s7054_s12 + $0x94] sm:$0xf]  ;;  %v3983_v23 = vshrl.u32 %v6141_v44, 16 }
  0xe3   : > { %6717 = vmatmul.mubr.msk.bf16.gmra.mxu0 %vm515_vm2, %v6055_v58  ;;  %6738 = vmatprep.mubr.msk.bf16.mxu1 %vm515_vm2, %v6089_v16  ;;  %v6530_v29 = vpop.f32.mrf.mxu0  ;;  %v8158_v2 = vpop.f32.mrf.mxu1  ;;  %v3947_v34 = vsel %vm7105_vm4, %v3942_v31, %v3946_v54  ;;  %v3957_v17 = vsel %vm7105_vm4, %v3952_v0, %v3956_v8  ;;  %v3965_v38 = vor.u32 %v3964_v6, %v3961_v49  ;;  %v3980_v19 = vrot.slane %v3978_v21, 5  ;;  %v8194_v52 = vld [vmem:[%s7054_s12 + $0xa4] sm:$0x1]  ;;  %v6147_v49 = vld [vmem:[%s7054_s12 + $0xa8] sm:$0xf] }
  0xe4   : > { %6720 = vmatprep.mubr.msk.bf16.mxu0 %vm515_vm2, %v6056_v55  ;;  %v8166_v58 = vadd.f32 %v8079_v5, %v6530_v29  ;;  %v3975_v18 = vor.u32 %v3974_v10, %v3970_v27  ;;  %v3985_v62 = vrot.slane %v3983_v23, 4  ;;  %v3986_v35 = vshll.u32 %v6141_v44, 16 }
  0xe5   : > { %v578_v20 = vpop.f32.mrf.mxu0  ;;  %v8171_v55 = vpop.f32.mrf.mxu1  ;;  %v3966_v24 = vrot.slane %v3965_v38, 4  ;;  %v3992_v40 = vshll.u32 %v8156_v3, 16  ;;  %v3996_v5 = vshrl.u32 %v8156_v3, 16  ;;  %v6157_v14 = vcombine.low %v3923_v61, %v3933_v15 }
  0xe6   : > { %v8174_v12 = vadd.f32 %v8100_v7, %v578_v20  ;;  %v3976_v54 = vrot.slane %v3975_v18, 4  ;;  %v3988_v16 = vrot.slane %v3986_v35, 5  ;;  %v4002_v59 = vshll.u32 %v8169_v30, 16  ;;  %v6925_v7 = vld [vmem:[%s7054_s12 + $0x6c] sm:$0xff]  }
  0xe7   : > { %v6531_v22 = vpop.f32.mrf.mxu0  ;;  %v8180_v41 = vpop.f32.mrf.mxu1  ;;  %v6158_v43 = vcombine.low %v3947_v34, %v3957_v17  ;;  %v3994_v8 = vrot.slane %v3992_v40, 5  ;;  %v3998_v46 = vrot.slane %v3996_v5, 4  ;;  %v3971_v61 = vsel %vm7105_vm4, %v3966_v24, %v3970_v27  ;;  %v8223_v20 = vld [vmem:[%s7054_s12 + $0xac] sm:$0xf]  ;;  %v8226_v18 = vld [vmem:[%s7054_s12 + $0xb0] sm:$0x1] }
  0xe8   : > { %v8184_v48 = vadd.f32 %v8113_v26, %v6531_v22  ;;  %v3981_v51 = vsel %vm7105_vm4, %v3976_v54, %v3980_v19  ;;  %v3989_v44 = vor.u32 %v3988_v16, %v3985_v62  ;;  %v4007_v32 = vshrl.u32 %v6144_v33, 16  ;;  %v6926_v5 = vld [vmem:[%s7054_s12 + $0x78] sm:$0xff]  }
  0xe9   : > { %v581_v31 = vpop.f32.mrf.mxu0  ;;  %v8196_v0 = vpop.f32.mrf.mxu1  ;;  %v3999_v26 = vor.u32 %v3998_v46, %v3994_v8  ;;  %v4004_v6 = vrot.slane %v4002_v59, 5  ;;  %v4010_v15 = vshll.u32 %v6144_v33, 16  ;;  %v4016_v56 = vshll.u32 %v8187_v47, 16 }
  0xea   : > { %6739 = vmatmul.mubr.msk.bf16.gmra.mxu1 %vm515_vm2, %v6090_v11  ;;  %v8204_v21 = vadd.f32 %v8121_v4, %v581_v31  ;;  %v3990_v29 = vrot.slane %v3989_v44, 4  ;;  %v4009_v27 = vrot.slane %v4007_v32, 4  ;;  %v4020_v28 = vshrl.u32 %v8187_v47, 16  ;;  %v6927_v44 = vld [vmem:[%s7054_s12 + $0x84] sm:$0xff]  }
  0xeb   : > { %6721 = vmatmul.mubr.msk.bf16.gmra.mxu0 %vm515_vm2, %v6057_v36  ;;  %6762 = vmatprep.mubr.msk.bf16.mxu1 %vm515_vm2, %v6157_v14  ;;  %v8213_v11 = vpop.f32.mrf.mxu1  ;;  %v4000_v4 = vrot.slane %v3999_v26, 4  ;;  %v4012_v37 = vrot.slane %v4010_v15, 5  ;;  %v4026_v13 = vshll.u32 %v8194_v52, 16  ;;  %v4031_v36 = vshrl.u32 %v6147_v49, 16  ;;  %v8252_v26 = vld [vmem:[%s7054_s12 + $0xb8] sm:$0xf] }
  0xec   : > { %6744 = vmatprep.mubr.msk.bf16.mxu0 %vm515_vm2, %v6925_v7  ;;  %v6534_v10 = vpop.f32.mrf.mxu0  ;;  %v6159_v23 = vcombine.low %v3971_v61, %v3981_v51  ;;  %v8220_v17 = vrot.slane %v4016_v56, 5  ;;  %v4022_v38 = vrot.slane %v4020_v28, 4  ;;  %v3995_v62 = vsel %vm7105_vm4, %v3990_v29, %v3994_v8  ;;  %v6150_v51 = vld [vmem:[%s7054_s12 + $0xb4] sm:$0xf]  ;;  %v8261_v56 = vld [vmem:[%s7054_s12 + $0xbc] sm:$0x1] }
  0xed   : > { %v8218_v34 = vadd.f32 %v8144_v1, %v6534_v10  ;;  %v8228_v19 = vpop.f32.mrf.mxu1  ;;  %v4005_v35 = vsel %vm7105_vm4, %v4000_v4, %v4004_v6  ;;  %v4013_v1 = vor.u32 %v4012_v37, %v4009_v27  ;;  %v4028_v40 = vrot.slane %v4026_v13, 5  ;;  %v6153_v13 = vld [vmem:[%s7054_s12 + $0xc0] sm:$0xf] }
  0xee   : > { %v594_v24 = vpop.f32.mrf.mxu0  ;;  %v4023_v14 = vor.u32 %v4022_v38, %v8220_v17  ;;  %v4033_v54 = vrot.slane %v4031_v36, 4  ;;  %v4034_v22 = vshll.u32 %v6147_v49, 16  ;;  %v4040_v8 = vshll.u32 %v8223_v20, 16  ;;  %v8281_v36 = vld [vmem:[%s9693_s1 + $0x20] sm:$0xf] }
  0xef   : > { %v8236_v33 = vadd.f32 %v8158_v2, %v594_v24  ;;  %v8239_v16 = vpop.f32.mrf.mxu1  ;;  %v4014_v59 = vrot.slane %v4013_v1, 4  ;;  %v4044_v46 = vshrl.u32 %v8223_v20, 16  ;;  %v4050_v61 = vshll.u32 %v8226_v18, 16 }
  0xf0   : > { %v6535_v7 = vpop.f32.mrf.mxu0  ;;  %v4405_v2 = vsel %vm540_vm0, %v8036_v9, 0  ;;  %v4024_v31 = vrot.slane %v4023_v14, 4  ;;  %v4036_v49 = vrot.slane %v4034_v22, 5  ;;  %v6160_v6 = vcombine.low %v3995_v62, %v4005_v35  ;;  %v8296_v22 = vld [vmem:[%s7054_s12 + $0xc4] sm:$0xf] }
  0xf1   : > { %v8249_v32 = vadd.f32 %v8171_v55, %v6535_v7  ;;  %v4019_v15 = vsel %vm7105_vm4, %v4014_v59, %v8220_v17  ;;  %v8258_v29 = vrot.slane %v4040_v8, 5  ;;  %v4046_v27 = vrot.slane %v4044_v46, 4  ;;  %v8268_v55 = vld [vmem:[%s9693_s1 + $0x1c] sm:$0xf]  ;;  %v6928_v8 = vld [vmem:[%s7054_s12 + $0x90] sm:$0xff]  }
  0xf2   : > { %6763 = vmatmul.mubr.msk.bf16.vlgmr.msra.gmra.mxu1 %vm515_vm2, %v6158_v43  ;;  %v597_v9 = vpop.f32.mrf.mxu0  ;;  %v8263_v28 = vpop.f32.mrf.mxu1  ;;  %v4037_v43 = vor.u32 %v4036_v49, %v4033_v54  ;;  %v8272_v4 = vrot.slane %v4050_v61, 5  ;;  %v4055_v37 = vshrl.u32 %v6150_v51, 16  ;;  %v4058_v38 = vshll.u32 %v6150_v51, 16 }
  0xf3   : > { %6745 = vmatmul.mubr.msk.bf16.vlgmr.msra.gmra.mxu0 %vm515_vm2, %v6926_v5  ;;  %6797 = vmatpush3.bf16.msra.mxu1 %v8140_v39  ;;  %v8275_v10 = vadd.f32 %v8180_v41, %v597_v9  ;;  %v4029_v39 = vsel %vm7105_vm4, %v4024_v31, %v4028_v40  ;;  %v4047_v17 = vor.u32 %v4046_v27, %v8258_v29  ;;  %v4064_v41 = vshll.u32 %v8252_v26, 16  ;;  %v8311_v27 = vld [vmem:[%s7054_s12 + $0xc8] sm:$0x1] }
  0xf4   : > { %6779 = vmatpush3.bf16.msra.mxu0 %v4405_v2  ;;  %6766 = vmatprep.mubr.msk.bf16.mxu1 %vm515_vm2, %v6159_v23  ;;  %v8288_v62 = vpop.f32.mrf.mxu1  ;;  %v4038_v35 = vrot.slane %v4037_v43, 4  ;;  %v4057_v24 = vrot.slane %v4055_v37, 4  ;;  %v4068_v1 = vshrl.u32 %v8252_v26, 16  ;;  %v4074_v23 = vshll.u32 %v8261_v56, 16 }
  0xf5   : > { %6748 = vmatprep.mubr.msk.bf16.mxu0 %vm515_vm2, %v6927_v44  ;;  %6866 = vmatprep.subr.msk.bf16.mxu0 %vm540_vm0, %v8268_v55  ;;  %v4048_v40 = vrot.slane %v4047_v17, 4  ;;  %v4060_v14 = vrot.slane %v4058_v38, 5  ;;  %v4066_v54 = vrot.slane %v4064_v41, 5  ;;  %v4079_v59 = vshrl.u32 %v6153_v13, 16  ;;  %v6929_v44 = vld [vmem:[%s7054_s12 + $0x9c] sm:$0xff]  }
  0xf6   : > { %v6538_v5 = vpop.f32.mrf.mxu0  ;;  %v8298_v7 = vpop.f32.mrf.mxu1  ;;  %6867 = vmatprep.subr.msk.bf16.mxu1 %vm540_vm0, %v8281_v36  ;;  %v6161_v46 = vcombine.low %v4019_v15, %v4029_v39  ;;  %v4070_v51 = vrot.slane %v4068_v1, 4  ;;  %v4043_v2 = vsel %vm7105_vm4, %v4038_v35, %v8258_v29  ;;  %v4082_v43 = vshll.u32 %v6153_v13, 16  ;;  %v6173_v1 = vld [vmem:[%s7054_s12 + $0x6c] sm:$0xe] }
  0xf7   : > { %v8304_v61 = vadd.f32 %v8196_v0, %v6538_v5  ;;  %v4061_v49 = vor.u32 %v4060_v14, %v4057_v24  ;;  %v4081_v9 = vrot.slane %v4079_v59, 4  ;;  %v4076_v39 = vrot.slane %v4074_v23, 5 }
  0xf8   : > { %v610_v31 = vpop.f32.mrf.mxu0  ;;  %v8313_v37 = vpop.f32.mrf.mxu1  ;;  %v4071_v0 = vor.u32 %v4070_v51, %v4066_v54  ;;  %v4088_v17 = vshll.u32 %v8296_v22, 16  ;;  %v4053_v29 = vsel %vm7105_vm4, %v4048_v40, %v8272_v4  ;;  %v4084_v35 = vrot.slane %v4082_v43, 5 }
  0xf9   : > { %v8316_v15 = vadd.f32 %v8213_v11, %v610_v31  ;;  %v4062_v38 = vrot.slane %v4061_v49, 4  ;;  %v4092_v13 = vshrl.u32 %v8296_v22, 16  ;;  %v4098_v4 = vshll.u32 %v8311_v27, 16 }
  0xfa   : > { %6767 = vmatmul.mubr.msk.bf16.gmra.mxu1 %vm515_vm2, %v6160_v6  ;;  %v6539_v41 = vpop.f32.mrf.mxu0  ;;  %v8324_v24 = vpop.f32.mrf.mxu1  ;;  %v4072_v11 = vrot.slane %v4071_v0, 4  ;;  %v8332_v23 = vrot.slane %v4088_v17, 5  ;;  %v4308_v40 = vrot.slane %v8089_v60, 5  ;;  %v4085_v14 = vor.u32 %v4084_v35, %v4081_v9 }
  0xfb   : > { %6749 = vmatmul.mubr.msk.bf16.gmra.mxu0 %vm515_vm2, %v6928_v8  ;;  %6770 = vmatprep.mubr.msk.bf16.mxu1 %vm515_vm2, %v6161_v46  ;;  %v8330_v6 = vadd.f32 %v8228_v19, %v6539_v41  ;;  %v4067_v5 = vsel %vm7105_vm4, %v4062_v38, %v4066_v54  ;;  %v4094_v59 = vrot.slane %v4092_v13, 4  ;;  %v6181_v31 = vrot.slane %v6173_v1, 9  ;;  %v6930_v38 = vld [vmem:[%s7054_s12 + $0xa8] sm:$0xff]  }
  0xfc   : > { %6752 = vmatprep.mubr.msk.bf16.mxu0 %vm515_vm2, %v6929_v44  ;;  %v613_v8 = vpop.f32.mrf.mxu0  ;;  %v8339_v46 = vpop.f32.mrf.mxu1  ;;  %v4077_v19 = vsel %vm7105_vm4, %v4072_v11, %v4076_v39  ;;  %v4301_v60 = vrot.slane %v8065_v25, 5  ;;  %v6174_v44 = vld [vmem:[%s7054_s12 + $0x78] sm:$0xe]  ;;  %v6162_v49 = vcombine.low %v4043_v2, %v4053_v29  ;;  %v4086_v43 = vrot.slane %v4085_v14, 4 }
  0xfd   : > { %v8344_v51 = vadd.f32 %v8239_v16, %v613_v8  ;;  %v4095_v54 = vor.u32 %v4094_v59, %v8332_v23  ;;  %v4304_v0 = vrot.slane %v8077_v57, 5  ;;  %v6163_v39 = vcombine.low %v4067_v5, %v4077_v19  ;;  %v6931_v25 = vld [vmem:[%s7054_s12 + $0xb4] sm:$0xff]  }
  0xfe   : > { %v6542_v9 = vpop.f32.mrf.mxu0  ;;  %v8350_v17 = vpop.f32.mrf.mxu1  ;;  %v4100_v41 = vrot.slane %v4098_v4, 5  ;;  %v4303_v35 = vrot.slane %v4301_v60, 4  ;;  %v6182_v29 = vrot.slane %v6174_v44, 9  ;;  %v4311_v11 = vrot.slane %v8098_v50, 5  ;;  %v6175_v4 = vld [vmem:[%s7054_s12 + $0x84] sm:$0xe] }
  0xff   : > { %v8354_v16 = vadd.f32 %v8263_v28, %v6542_v9  ;;  %v4096_v13 = vrot.slane %v4095_v54, 4  ;;  %v8365_v5 = vsel %vm7218_vm7, %v6181_v31, %v4301_v60  ;;  %v4091_v50 = vsel %vm7105_vm4, %v4086_v43, %v8332_v23  ;;  %v6176_v31 = vld [vmem:[%s7054_s12 + $0x90] sm:$0xe]  ;;  %v6177_v43 = vld [vmem:[%s7054_s12 + $0x9c] sm:$0xe] }
 0x100   : > { %v626_v2 = vpop.f32.mrf.mxu0  ;;  %v8357_v1 = vpop.f32.mrf.mxu1  ;;  %v8369_v28 = vsel %vm7218_vm7, %v4303_v35, %v4304_v0  ;;  %v4315_v23 = vrot.slane %v8129_v53, 5  ;;  %v8396_v0 = vsel %vm7218_vm7, %v6182_v29, %v4308_v40  ;;  %v4322_v53 = vrot.slane %v8156_v3, 5  ;;  %v6933_v3 = vld [vmem:[%s7054_s12 + $0x78] sm:$0xff]  }
 0x101   : > { %v8361_v57 = vadd.f32 %v8288_v62, %v626_v2  ;;  %v4101_v60 = vsel %vm7105_vm4, %v4096_v13, %v4100_v41  ;;  %v6190_v9 = vcombine.low %v8365_v5, %v8369_v28  ;;  %v6183_v35 = vrot.slane %v6175_v4, 9  ;;  %v6932_v62 = vld [vmem:[%s7054_s12 + $0xc0] sm:$0xff]  }
 0x102   : > { %6771 = vmatmul.mubr.msk.bf16.gmra.mxu1 %vm515_vm2, %v6162_v49  ;;  %v6543_v8 = vpop.f32.mrf.mxu0  ;;  %v8379_v19 = vpop.f32.mrf.mxu1  ;;  %v4310_v49 = vrot.slane %v4308_v40, 4  ;;  %v6184_v13 = vrot.slane %v6176_v31, 9  ;;  %v6179_v40 = vld [vmem:[%s7054_s12 + $0xb4] sm:$0xe]  ;;  %v6164_v2 = vcombine.low %v4091_v50, %v4101_v60  ;;  %v4317_v5 = vrot.slane %v4315_v23, 4 }
 0x103   : > { %6753 = vmatmul.mubr.msk.bf16.gmra.mxu0 %vm515_vm2, %v6930_v38  ;;  %6774 = vmatprep.mubr.msk.bf16.mxu1 %vm515_vm2, %v6163_v39  ;;  %v8387_v44 = vadd.f32 %v8298_v7, %v6543_v8  ;;  %v8400_v7 = vsel %vm540_vm0, %v8268_v55, 0  ;;  %v6178_v39 = vld [vmem:[%s7054_s12 + $0xa8] sm:$0xe]  ;;  %v4318_v55 = vrot.slane %v8132_v63, 5  ;;  %v6185_v8 = vrot.slane %v6177_v43, 9 }
 0x104   : > { %6756 = vmatprep.mubr.msk.bf16.mxu0 %vm515_vm2, %v6931_v25  ;;  %v629_v54 = vpop.f32.mrf.mxu0  ;;  %v8402_v38 = vpop.f32.mrf.mxu1  ;;  %v4329_v25 = vrot.slane %v8187_v47, 5  ;;  %v4332_v31 = vrot.slane %v8194_v52, 5  ;;  %v8422_v47 = vsel %vm7218_vm7, %v4310_v49, %v4311_v11  ;;  %v6186_v63 = vrot.slane %v6178_v39, 9  ;;  %v6180_v49 = vld [vmem:[%s7054_s12 + $0xc0] sm:$0xe] }
 0x105   : > { %v8407_v41 = vadd.f32 %v8313_v37, %v629_v54  ;;  %v4324_v37 = vrot.slane %v4322_v53, 4  ;;  %v4336_v43 = vrot.slane %v8223_v20, 5  ;;  %v6187_v54 = vrot.slane %v6179_v40, 9 }
 0x106   : > { %v6566_v29 = vpop.f32.mrf.mxu0  ;;  %v8412_v28 = vpop.f32.mrf.mxu1  ;;  %v4331_v4 = vrot.slane %v4329_v25, 4  ;;  %v8436_v52 = vsel %vm7218_vm7, %v6184_v13, %v4322_v53  ;;  %v4343_v11 = vrot.slane %v8252_v26, 5  ;;  %v8443_v20 = vsel %vm7218_vm7, %v4317_v5, %v4318_v55  ;;  %v6280_v13 = vld [vmem:[%s7054_s12 + $0x78] sm:$0xe] }
 0x107   : > { %v8417_v59 = vadd.f32 %v6566_v29, %v8166_v58  ;;  %v8432_v58 = vsel %vm7218_vm7, %v6183_v35, %v4315_v23  ;;  %v8449_v23 = vsel %vm7218_vm7, %v6185_v8, %v4329_v25  ;;  %v4338_v35 = vrot.slane %v4336_v43, 4 }
 0x108   : > { %v975_v50 = vpop.f32.mrf.mxu0  ;;  %v8424_v60 = vpop.f32.mrf.mxu1  ;;  %v4346_v53 = vrot.slane %v8261_v56, 5  ;;  %v9704_v40 = vrot.slane %v8169_v30, 5  ;;  %v8466_v25 = vsel %vm7218_vm7, %v4331_v4, %v4332_v31  ;;  %v4345_v56 = vrot.slane %v4343_v11, 4 }
 0x109   : > { %v8428_v14 = vadd.f32 %v975_v50, %v8174_v12  ;;  %v8476_v30 = vsel %vm7218_vm7, %v6186_v63, %v4336_v43  ;;  %v9706_v5 = vrot.slane %v8226_v18, 5  ;;  %v8486_v8 = vsel %vm7218_vm7, %v6187_v54, %v4343_v11  ;;  %v8497_v18 = vld [vmem:[%s7054_s12 + $0x80] sm:$0x1]  ;;  %v6239_v50 = vld [vmem:[%s7054_s12 + $0x78] sm:$0xf]  ;;  %v6934_v63 = vld [vmem:[%s7054_s12 + $0x84] sm:$0xff]  }
 0x10a   : > { %6775 = vmatmul.mubr.msk.bf16.gmra.mxu1 %vm515_vm2, %v6164_v2  ;;  %v6567_v39 = vpop.f32.mrf.mxu0  ;;  %v8445_v12 = vpop.f32.mrf.mxu1  ;;  %v8462_v2 = vsel %vm7218_vm7, %v4324_v37, %v9704_v40  ;;  %v8493_v37 = vsel %vm7218_vm7, %v4345_v56, %v4346_v53  ;;  %v4350_v4 = vrot.slane %v8296_v22, 5  ;;  %v6288_v31 = vrot.slane %v6280_v13, 9 }
 0x10b   : > { %6757 = vmatmul.mubr.msk.bf16.gmra.mxu0 %vm515_vm2, %v6932_v62  ;;  %6798 = vmatprep.mubr.msk.bf16.mxu1 %vm515_vm2, %v6933_v3  ;;  %v8456_v26 = vadd.f32 %v6567_v39, %v8184_v48  ;;  %v8469_v62 = vld [vmem:[%s7054_s12 + $0x7c] sm:$0xf]  ;;  %v8482_v55 = vsel %vm7218_vm7, %v4338_v35, %v9706_v5  ;;  %v6188_v3 = vrot.slane %v6180_v49, 9  ;;  %v6191_v43 = vcombine.low %v8396_v0, %v8422_v47  ;;  %v8520_v47 = vld [vmem:[%s7054_s12 + $0x84] sm:$0xe] }
 0x10c   : > { %6780 = vmatprep.mubr.msk.bf16.mxu0 %vm515_vm2, %v6190_v9  ;;  %v978_v29 = vpop.f32.mrf.mxu0  ;;  %v8472_v48 = vpop.f32.mrf.mxu1  ;;  %v6192_v54 = vcombine.low %v8432_v58, %v8443_v20  ;;  %v5133_v22 = vrot.slane %v8469_v62, 5  ;;  %v6935_v58 = vld [vmem:[%s7054_s12 + $0x90] sm:$0xff]   ;;  %v4743_v40 = vshrl.u32 %v6239_v50, 16  ;;  %v4746_v56 = vshll.u32 %v6239_v50, 16  ;;  %v8540_v0 = vld [vmem:[%s7054_s12 + $0x88] sm:$0xf] }
 0x10d   : > { %9705 = vst [vmem:[#allocation2_spill] sm:$0xff] %v8472_v48  ;;  %v8489_v9 = vadd.f32 %v978_v29, %v8204_v21  ;;  %v5237_v21 = vsel %vm540_vm0, %v8281_v36, 0  ;;  %v8533_v5 = vsel %vm7218_vm7, %v6188_v3, %v4350_v4  ;;  %v6242_v35 = vld [vmem:[%s7054_s12 + $0x84] sm:$0xf]  ;;  %vm2788_vm8 = vcmask 60416  }
 0x10e   : > { %v6570_v11 = vpop.f32.mrf.mxu0  ;;  %v8507_v49 = vpop.f32.mrf.mxu1  ;;  %v8537_v36 = vsel %vm7218_vm7, %v6288_v31, %v5133_v22  ;;  %v5135_v50 = vrot.slane %v5133_v22, 4  ;;  %v4756_v31 = vshrl.u32 %v8469_v62, 16  ;;  %vm5546_vm9 = vcmask 57344  }
 0x10f   : > { %9707 = vst [vmem:[#allocation3_spill] sm:$0xff] %v8507_v49  ;;  %v8511_v39 = vadd.f32 %v6570_v11, %v8218_v34  ;;  %v4352_v11 = vrot.slane %v4350_v4, 4  ;;  %v4752_v4 = vshll.u32 %v8469_v62, 16 }
 0x110   : > { %v991_v20 = vpop.f32.mrf.mxu0  ;;  %v8523_v53 = vpop.f32.mrf.mxu1 }
 0x111   : > { %9708 = vst [vmem:[#allocation4_spill] sm:$0xff] %v8523_v53  ;;  %v8529_v29 = vadd.f32 %v991_v20, %v8236_v33  ;;  %v4745_v20 = vrot.slane %v4743_v40, 4  ;;  %v4748_v53 = vrot.slane %v4746_v56, 5  ;;  %v6244_v56 = vld [vmem:[%s7054_s12 + $0x8c] sm:$0x1]  ;;  %v6936_v33 = vld [vmem:[%s7054_s12 + $0x9c] sm:$0xff]  }
 0x112   : > { %6799 = vmatmul.mubr.msk.bf16.vlgmr.msra.gmra.mxu1 %vm515_vm2, %v6934_v63  ;;  %v6571_v34 = vpop.f32.mrf.mxu0  ;;  %v8544_v13 = vpop.f32.mrf.mxu1  ;;  %v4762_v63 = vshll.u32 %v8497_v18, 16 }
 0x113   : > { %9709 = vst [vmem:[#allocation5_spill] sm:$0xff] %v8544_v13  ;;  %6781 = vmatmul.mubr.msk.bf16.vlgmr.msra.gmra.mxu0 %vm515_vm2, %v6191_v43  ;;  %6833 = vmatpush3.bf16.msra.mxu1 %v5237_v21  ;;  %v8549_v3 = vadd.f32 %v6571_v34, %v8249_v32  ;;  %v5140_v43 = vrot.slane %v8540_v0, 5  ;;  %v4749_v21 = vor.u32 %v4748_v53, %v4745_v20  ;;  %v4767_v34 = vshrl.u32 %v6242_v35, 16 }
 0x114   : > { %6815 = vmatpush3.bf16.msra.mxu0 %v8400_v7  ;;  %6802 = vmatprep.mubr.msk.bf16.mxu1 %vm515_vm2, %v6935_v58  ;;  %v994_v22 = vpop.f32.mrf.mxu0  ;;  %v8556_v40 = vpop.f32.mrf.mxu1  ;;  %v8561_v32 = vadd.f32 %v8324_v24, %v8417_v59  ;;  %v9712_v7 = vrot.slane %v8311_v27, 5  ;;  %v4754_v53 = vrot.slane %v4752_v4, 5  ;;  %v4758_v20 = vrot.slane %v4756_v31, 4  ;;  %v6282_v4 = vld [vmem:[%s7054_s12 + $0x90] sm:$0xe] }
 0x115   : > { %9710 = vst [vmem:[#allocation6_spill] sm:$0xff] %v8556_v40  ;;  %6784 = vmatprep.mubr.msk.bf16.mxu0 %vm515_vm2, %v6192_v54  ;;  %v8565_v62 = vadd.f32 %v994_v22, %v8275_v10  ;;  %v4750_v59 = vrot.slane %v4749_v21, 4  ;;  %v4764_v54 = vrot.slane %v4762_v63, 5  ;;  %v4770_v10 = vshll.u32 %v6242_v35, 16  ;;  %v6937_v22 = vld [vmem:[%s7054_s12 + $0xa8] sm:$0xff]  }
 0x116   : > { %9711 = vst [vmem:[#allocation7_spill] sm:$0xff] %v8561_v32  ;;  %v8571_v58 = vsel %vm7218_vm7, %v4352_v11, %v9712_v7  ;;  %v6574_v40 = vpop.f32.mrf.mxu0  ;;  %v8575_v24 = vpop.f32.mrf.mxu1  ;;  %v4769_v32 = vrot.slane %v4767_v34, 4  ;;  %v4759_v13 = vor.u32 %v4758_v20, %v4754_v53  ;;  %v4776_v11 = vshll.u32 %v8540_v0, 16  ;;  %v8591_v35 = vld [vmem:[%s7054_s12 + $0x94] sm:$0xf] }
 0x117   : > { %9713 = vst [vmem:[#allocation8_spill] sm:$0xff] %v8575_v24  ;;  %v8579_v27 = vadd.f32 %v6574_v40, %v8304_v61  ;;  %v4780_v7 = vshrl.u32 %v8540_v0, 16  ;;  %v5142_v48 = vrot.slane %v5140_v43, 4  ;;  %v5143_v24 = vrot.slane %v6244_v56, 5 }
 0x118   : > { %v1007_v31 = vpop.f32.mrf.mxu0  ;;  %v8584_v49 = vpop.f32.mrf.mxu1  ;;  %v4772_v21 = vrot.slane %v4770_v10, 5  ;;  %v8588_v63 = vadd.f32 %v8339_v46, %v8428_v14  ;;  %v4760_v40 = vrot.slane %v4759_v13, 4  ;;  %v8596_v34 = vrot.slane %v4776_v11, 5 }
 0x119   : > { %9714 = vst [vmem:[#allocation9_spill] sm:$0xff] %v8584_v49  ;;  %v8594_v61 = vadd.f32 %v1007_v31, %v8316_v15  ;;  %v4782_v0 = vrot.slane %v4780_v7, 4  ;;  %v9716_v49 = vrot.slane %v8497_v18, 5  ;;  %v6290_v15 = vrot.slane %v6282_v4, 9  ;;  %v8657_v7 = vld [vmem:[%s7054_s12 + $0x9c] sm:$0xe] }
 0x11a   : > { %9715 = vst [vmem:[#allocation10_spill] sm:$0xff] %v8588_v63  ;;  %6803 = vmatmul.mubr.msk.bf16.gmra.mxu1 %vm515_vm2, %v6936_v33  ;;  %v6575_v20 = vpop.f32.mrf.mxu0  ;;  %v8605_v46 = vpop.f32.mrf.mxu1  ;;  %v4773_v14 = vor.u32 %v4772_v21, %v4769_v32  ;;  %v4786_v63 = vshll.u32 %v6244_v56, 16  ;;  %v9717_v13 = vcombine.low %v8436_v52, %v8462_v2  ;;  %v4755_v18 = vsel %vm7105_vm4, %v4750_v59, %v4754_v53  ;;  %v6245_v4 = vld [vmem:[%s7054_s12 + $0x90] sm:$0xf]  ;;  %v6938_v31 = vld [vmem:[%s7054_s12 + $0xb4] sm:$0xff]  }
 0x11b   : > { %v8603_v10 = vsel %vm7218_vm7, %v5135_v50, %v9716_v49  ;;  %6806 = vmatprep.mubr.msk.bf16.mxu1 %vm515_vm2, %v6937_v22  ;;  %v8613_v33 = vadd.f32 %v6575_v20, %v8330_v6  ;;  %v4765_v49 = vsel %vm7105_vm4, %v4760_v40, %v4764_v54  ;;  %v8620_v50 = vld [vmem:[%s7054_s12 + $0x98] sm:$0x1]  ;;  %v5147_v52 = vrot.slane %v8591_v35, 5 }
 0x11c   : > { %6785 = vmatmul.mubr.msk.bf16.gmra.mxu0 %vm515_vm2, %v9717_v13  ;;  %v9718_v2 = vcombine.low %v8449_v23, %v8466_v25  ;;  %v1010_v6 = vpop.f32.mrf.mxu0  ;;  %v9719_v56 = vrot.slane %v8520_v47, 9  ;;  %v8635_v59 = vpop.f32.mrf.mxu1  ;;  %v8637_v54 = vrot.slane %v4773_v14, 4  ;;  %v4783_v22 = vor.u32 %v4782_v0, %v8596_v34  ;;  %v8641_v23 = vld [vmem:[%s7054_s12 + $0xa0] sm:$0xf]  ;;  %v6250_v14 = vld [vmem:[%s7054_s12 + $0xa4] sm:$0x1] }
 0x11d   : > { %v8644_v25 = vadd.f32 %v1010_v6, %v8344_v51  ;;  %v8654_v11 = vadd.f32 %v8350_v17, %v8456_v26  ;;  %v8661_v40 = vcombine.low %v4755_v18, %v4765_v49  ;;  %v8665_v0 = vrot.slane %v4786_v63, 5 }
 0x11e   : > { %6788 = vmatprep.mubr.msk.bf16.mxu0 %vm515_vm2, %v9718_v2  ;;  %v8633_v53 = vsel %vm7218_vm7, %v9719_v56, %v5140_v43  ;;  %v8650_v43 = vsel %vm7218_vm7, %v5142_v48, %v5143_v24  ;;  %v6578_v21 = vpop.f32.mrf.mxu0  ;;  %v8663_v51 = vpop.f32.mrf.mxu1  ;;  %v8669_v20 = vsel %vm7218_vm7, %v6290_v15, %v5147_v52  ;;  %v5150_v48 = vrot.slane %v8620_v50, 5  ;;  %v6939_v24 = vld [vmem:[%s7054_s12 + $0xc0] sm:$0xff]  }
 0x11f   : > { %v8674_v17 = vadd.f32 %v6578_v21, %v8354_v16  ;;  %v5149_v26 = vrot.slane %v5147_v52, 4  ;;  %v5154_v13 = vrot.slane %v8641_v23, 5  ;;  %v8680_v18 = vadd.f32 %v8357_v1, %v8489_v9  ;;  %v6248_v21 = vld [vmem:[%s7054_s12 + $0x9c] sm:$0xf] }
 0x120   : > { %v1023_v63 = vpop.f32.mrf.mxu0  ;;  %v8686_v49 = vrot.slane %v4783_v22, 4  ;;  %v8688_v2 = vpop.f32.mrf.mxu1  ;;  %v6291_v16 = vrot.slane %v8657_v7, 9  ;;  %v4791_v52 = vshrl.u32 %v6245_v4, 16  ;;  %v4794_v56 = vshll.u32 %v6245_v4, 16 }
 0x121   : > { %9720 = vst [vmem:[#allocation11_spill] sm:$0xff] %v8688_v2  ;;  %v8692_v6 = vadd.f32 %v1023_v63, %v8361_v57  ;;  %v4800_v1 = vshll.u32 %v8591_v35, 16  ;;  %v4804_v9 = vshrl.u32 %v8591_v35, 16  ;;  %v5157_v22 = vrot.slane %v6250_v14, 5 }
 0x122   : > { %6807 = vmatmul.mubr.msk.bf16.gmra.mxu1 %vm515_vm2, %v6938_v31  ;;  %v6579_v47 = vpop.f32.mrf.mxu0  ;;  %v8698_v15 = vpop.f32.mrf.mxu1  ;;  %v4793_v32 = vrot.slane %v4791_v52, 4  ;;  %v4810_v2 = vshll.u32 %v8620_v50, 16  ;;  %v8703_v7 = vadd.f32 %v8379_v19, %v8511_v39  ;;  %v9721_v57 = vcombine.low %v8476_v30, %v8482_v55 }
 0x123   : > { %6810 = vmatprep.mubr.msk.bf16.mxu1 %vm515_vm2, %v6939_v24  ;;  %v8711_v35 = vadd.f32 %v6579_v47, %v8387_v44  ;;  %v5156_v4 = vrot.slane %v5154_v13, 4  ;;  %v4796_v31 = vrot.slane %v4794_v56, 5  ;;  %v4802_v63 = vrot.slane %v4800_v1, 5  ;;  %v6940_v1 = vld [vmem:[%s7054_s12 + $0xcc] sm:$0xff]  }
 0x124   : > { %6789 = vmatmul.mubr.msk.bf16.gmra.mxu0 %vm515_vm2, %v9721_v57  ;;  %v9722_v50 = vcombine.low %v8486_v8, %v8493_v37  ;;  %v1026_v19 = vpop.f32.mrf.mxu0  ;;  %v8717_v39 = vpop.f32.mrf.mxu1  ;;  %v4806_v30 = vrot.slane %v4804_v9, 4  ;;  %v4812_v55 = vrot.slane %v4810_v2, 5  ;;  %v4815_v52 = vshrl.u32 %v6248_v21, 16 }
 0x125   : > { %9723 = vst [vmem:[#allocation12_spill] sm:$0xff] %v8717_v39  ;;  %v4818_v57 = vshll.u32 %v6248_v21, 16  ;;  %v8720_v24 = vadd.f32 %v1026_v19, %v8407_v41  ;;  %v4797_v44 = vor.u32 %v4796_v31, %v4793_v32  ;;  %v4824_v47 = vshll.u32 %v8641_v23, 16  ;;  %v8734_v39 = vld [vmem:[%s7054_s12 + $0xac] sm:$0xf] }
 0x126   : > { %6792 = vmatprep.mubr.msk.bf16.mxu0 %vm515_vm2, %v9722_v50  ;;  %v4828_v56 = vshrl.u32 %v8641_v23, 16  ;;  %v8725_v8 = vpop.f32.mrf.mxu0  ;;  %v4807_v37 = vor.u32 %v4806_v30, %v4802_v63  ;;  %v8727_v50 = vpop.f32.mrf.mxu1  ;;  %v4817_v2 = vrot.slane %v4815_v52, 4  ;;  %v4834_v21 = vshll.u32 %v6250_v14, 16 }
 0x127   : > { %9724 = vst [vmem:[#allocation13_spill] sm:$0xff] %v8727_v50  ;;  %v4820_v9 = vrot.slane %v4818_v57, 5  ;;  %v8731_v41 = vsel %vm7218_vm7, %v5149_v26, %v5150_v48  ;;  %v4798_v32 = vrot.slane %v4797_v44, 4  ;;  %v4826_v31 = vrot.slane %v4824_v47, 5  ;;  %v8749_v26 = vld [vmem:[%s7054_s12 + $0xb0] sm:$0x1] }
 0x128   : > { %v4830_v19 = vrot.slane %v4828_v56, 4  ;;  %v4789_v23 = vsel %vm7105_vm4, %v8686_v49, %v8665_v0  ;;  %v8740_v30 = vpop.f32.mrf.mxu0  ;;  %v4808_v50 = vrot.slane %v4807_v37, 4  ;;  %v8744_v14 = vadd.f32 %v8402_v38, %v8529_v29  ;;  %v8746_v48 = vpop.f32.mrf.mxu1  ;;  %v6284_v57 = vld [vmem:[%s7054_s12 + $0xa8] sm:$0xe] }
 0x129   : > { %v4821_v52 = vor.u32 %v4820_v9, %v4817_v2  ;;  %v8754_v44 = vsel %vm7218_vm7, %v6291_v16, %v5154_v13  ;;  %v8758_v0 = vsel %vm7218_vm7, %v5156_v4, %v5157_v22  ;;  %v4836_v47 = vrot.slane %v4834_v21, 5  ;;  %v8771_v22 = vld [vmem:[%s7054_s12 + $0xb8] sm:$0xf]  ;;  %v6251_v9 = vld [vmem:[%s7054_s12 + $0xa8] sm:$0xf] }
 0x12a   : > { %v4831_v49 = vor.u32 %v4830_v19, %v4826_v31  ;;  %6811 = vmatmul.mubr.msk.bf16.gmra.mxu1 %vm515_vm2, %v6940_v1  ;;  %v8761_v38 = vpop.f32.mrf.mxu0  ;;  %v4803_v29 = vsel %vm7105_vm4, %v4798_v32, %v4802_v63  ;;  %v4813_v56 = vsel %vm7105_vm4, %v4808_v50, %v4812_v55  ;;  %v5161_v13 = vrot.slane %v8734_v39, 5  ;;  %v8768_v16 = vpop.f32.mrf.mxu1  ;;  %v6285_v32 = vld [vmem:[%s7054_s12 + $0xb4] sm:$0xe] }
 0x12b   : > { %v4822_v37 = vrot.slane %v4821_v52, 4  ;;  %v9725_v4 = vcombine.low %v8533_v5, %v8571_v58  ;;  %v9726_v63 = vcombine.low %v8537_v36, %v8603_v10  ;;  %v6292_v1 = vrot.slane %v6284_v57, 9  ;;  %v6256_v10 = vld [vmem:[%s7054_s12 + $0xbc] sm:$0x1] }
 0x12c   : > { %v4832_v55 = vrot.slane %v4831_v49, 4  ;;  %v5164_v50 = vrot.slane %v8749_v26, 5  ;;  %v8784_v2 = vadd.f32 %v8412_v28, %v8549_v3  ;;  %v6298_v21 = vcombine.low %v8633_v53, %v8650_v43  ;;  %v8793_v5 = vpop.f32.mrf.mxu0  ;;  %v8797_v19 = vpop.f32.mrf.mxu1 }
 0x12d   : > { %6793 = vmatmul.mubr.msk.bf16.gmra.mxu0 %vm515_vm2, %v9725_v4  ;;  %6834 = vmatprep.mubr.msk.bf16.mxu1 %vm515_vm2, %v9726_v63  ;;  %v6299_v36 = vcombine.low %v8669_v20, %v8731_v41  ;;  %v5163_v58 = vrot.slane %v5161_v13, 4  ;;  %v9727_v28 = vsel %vm7105_vm4, %v8637_v54, %v8596_v34  ;;  %v6266_v43 = vcombine.low %v4803_v29, %v4813_v56  ;;  %v6254_v4 = vld [vmem:[%s7054_s12 + $0xb4] sm:$0xf] }
 0x12e   : > { %6816 = vmatprep.mubr.msk.bf16.mxu0 %vm515_vm2, %v8661_v40  ;;  %v6265_v3 = vcombine.low %v9727_v28, %v4789_v23  ;;  %v5168_v40 = vrot.slane %v8771_v22, 5  ;;  %v8807_v20 = vpop.f32.mrf.mxu0  ;;  %v4827_v41 = vsel %vm7105_vm4, %v4822_v37, %v4826_v31  ;;  %v4837_v52 = vsel %vm7105_vm4, %v4832_v55, %v4836_v47  ;;  %v8817_v54 = vpop.f32.mrf.mxu1 }
 0x12f   : > { %v8815_v57 = vadd.f32 %v8424_v60, %v8565_v62  ;;  %v4839_v34 = vshrl.u32 %v6251_v9, 16  ;;  %v8821_v23 = vsel %vm7218_vm7, %v6292_v1, %v5161_v13  ;;  %v8825_v49 = vsel %vm7218_vm7, %v5163_v58, %v5164_v50 }
 0x130   : > { %v6293_v29 = vrot.slane %v6285_v32, 9  ;;  %v5171_v31 = vrot.slane %v6256_v10, 5  ;;  %v8827_v56 = vpop.f32.mrf.mxu0  ;;  %v4842_v37 = vshll.u32 %v6251_v9, 16  ;;  %v4848_v60 = vshll.u32 %v8734_v39, 16  ;;  %v8832_v63 = vpop.f32.mrf.mxu1 }
 0x131   : > { %v4841_v47 = vrot.slane %v4839_v34, 4  ;;  %v4852_v62 = vshrl.u32 %v8734_v39, 16  ;;  %v6267_v55 = vcombine.low %v4827_v41, %v4837_v52  ;;  %v5170_v13 = vrot.slane %v5168_v40, 4 }
 0x132   : > { %v4858_v1 = vshll.u32 %v8749_v26, 16  ;;  %v1247_v50 = vadd.f32 %v8445_v12, %v8579_v27  ;;  %6835 = vmatmul.mubr.msk.bf16.vlgmr.msra.gmra.mxu1 %vm515_vm2, %v6298_v21  ;;  %v6301_v58 = vcombine.low %v8821_v23, %v8825_v49  ;;  %v8840_v9 = vpop.f32.mrf.mxu0  ;;  %v4844_v32 = vrot.slane %v4842_v37, 5  ;;  %v6286_v37 = vld [vmem:[%s7054_s12 + $0xc0] sm:$0xe] }
 0x133   : > { %v4850_v28 = vrot.slane %v4848_v60, 5  ;;  %v4854_v39 = vrot.slane %v4852_v62, 4  ;;  %6838 = vmatprep.mubr.msk.bf16.mxu1 %vm515_vm2, %v6299_v36  ;;  %v8846_v26 = vsel %vm7218_vm7, %v6293_v29, %v5168_v40  ;;  %v4863_v27 = vshrl.u32 %v6254_v4, 16  ;;  %v8853_v36 = vpop.f32.mrf.mxu1 }
 0x134   : > { %v4860_v12 = vrot.slane %v4858_v1, 5  ;;  %v4866_v21 = vshll.u32 %v6254_v4, 16  ;;  %v8849_v41 = vpop.f32.mrf.mxu0  ;;  %v4845_v52 = vor.u32 %v4844_v32, %v4841_v47  ;;  %v4872_v23 = vshll.u32 %v8771_v22, 16  ;;  %9728 = vst [vmem:[#allocation14_spill] sm:$0xff] %v8853_v36  ;;  %v6258_v32 = vld [vmem:[%s7054_s12 + $0xc4] sm:$0xf] }
 0x135   : > { %6817 = vmatmul.mubr.msk.bf16.vlgmr.msra.gmra.mxu0 %vm515_vm2, %v6265_v3  ;;  %v4855_v34 = vor.u32 %v4854_v39, %v4850_v28  ;;  %v4876_v3 = vshrl.u32 %v8771_v22, 16  ;;  %v8857_v40 = vsel %vm7218_vm7, %v5170_v13, %v5171_v31  ;;  %v4865_v49 = vrot.slane %v4863_v27, 4  ;;  %v9729_v31 = vld [vmem:[#allocation2_spill] sm:$0xff]  ;;  %v6259_v36 = vld [vmem:[%s7054_s12 + $0xc8] sm:$0x1] }
 0x136   : > { %6820 = vmatprep.mubr.msk.bf16.mxu0 %vm515_vm2, %v6266_v43  ;;  %v4868_v29 = vrot.slane %v4866_v21, 5  ;;  %v4882_v43 = vshll.u32 %v6256_v10, 16  ;;  %v4846_v60 = vrot.slane %v4845_v52, 4  ;;  %v6610_v47 = vpop.f32.mrf.mxu0  ;;  %v4874_v4 = vrot.slane %v4872_v23, 5  ;;  %v6287_v27 = vld [vmem:[%s7054_s12 + $0xcc] sm:$0xe] }
 0x137   : > { %v4856_v62 = vrot.slane %v4855_v34, 4  ;;  %v4878_v1 = vrot.slane %v4876_v3, 4  ;;  %v8861_v22 = vadd.f32 %v6610_v47, %v1247_v50  ;;  %v1245_v13 = vadd.f32 %v9729_v31, %v8594_v61  ;;  %v8872_v3 = vld [vmem:[%s7054_s12 + $0xd0] sm:$0xf]  ;;  %v8874_v50 = vpop.f32.mrf.mxu1  ;;  %v8879_v47 = vld [vmem:[%s7054_s12 + $0xd4] sm:$0x1] }
 0x138   : > { %v4869_v39 = vor.u32 %v4868_v29, %v4865_v49  ;;  %v4884_v53 = vrot.slane %v4882_v43, 5  ;;  %v4851_v10 = vsel %vm7105_vm4, %v4846_v60, %v4850_v28  ;;  %v1588_v34 = vpop.f32.mrf.mxu0  ;;  %v6294_v23 = vrot.slane %v6286_v37, 9  ;;  %9730 = vst [vmem:[#allocation2_spill] sm:$0xff] %v8874_v50  ;;  %v9732_v37 = vld [vmem:[#allocation3_spill] sm:$0xff] }
 0x139   : > { %v4861_v21 = vsel %vm7105_vm4, %v4856_v62, %v4860_v12  ;;  %v4879_v52 = vor.u32 %v4878_v1, %v4874_v4  ;;  %v8876_v43 = vadd.f32 %v1588_v34, %v1245_v13  ;;  %v5175_v61 = vrot.slane %v6258_v32, 5 }
 0x13a   : > { %v6268_v49 = vcombine.low %v4851_v10, %v4861_v21  ;;  %v4870_v29 = vrot.slane %v4869_v39, 4  ;;  %v9731_v28 = vcombine.low %v8754_v44, %v8758_v0  ;;  %v5178_v60 = vrot.slane %v6259_v36, 5  ;;  %v6611_v1 = vpop.f32.mrf.mxu0  ;;  %v6257_v10 = vld [vmem:[%s7054_s12 + $0xc0] sm:$0xf] }
 0x13b   : > { %v4880_v12 = vrot.slane %v4879_v52, 4  ;;  %v1248_v62 = vadd.f32 %v9732_v37, %v8613_v33  ;;  %v6295_v31 = vrot.slane %v6287_v27, 9  ;;  %v5176_v13 = vsel %vm7218_vm7, %v6294_v23, %v5175_v61  ;;  %v8903_v52 = vpop.f32.mrf.mxu1 }
 0x13c   : > { %6839 = vmatmul.mubr.msk.bf16.gmra.mxu1 %vm515_vm2, %v9731_v28  ;;  %v4875_v39 = vsel %vm7105_vm4, %v4870_v29, %v4874_v4  ;;  %v5177_v44 = vrot.slane %v5175_v61, 4  ;;  %v5182_v0 = vrot.slane %v8872_v3, 5  ;;  %v1591_v21 = vpop.f32.mrf.mxu0  ;;  %9734 = vst [vmem:[#allocation3_spill] sm:$0xff] %v8903_v52  ;;  %v6302_v34 = vcombine.low %v8846_v26, %v8857_v40 }
 0x13d   : > { %6821 = vmatmul.mubr.msk.bf16.gmra.mxu0 %vm515_vm2, %v6267_v55  ;;  %6842 = vmatprep.mubr.msk.bf16.mxu1 %vm515_vm2, %v6301_v58  ;;  %v4885_v33 = vsel %vm7105_vm4, %v4880_v12, %v4884_v53  ;;  %v8898_v27 = vadd.f32 %v6611_v1, %v1248_v62  ;;  %v5185_v55 = vrot.slane %v8879_v47, 5  ;;  %v9733_v58 = vld [vmem:[#allocation4_spill] sm:$0xff]  ;;  %v4887_v28 = vshrl.u32 %v6257_v10, 16 }
 0x13e   : > { %6824 = vmatprep.mubr.msk.bf16.mxu0 %vm515_vm2, %v6268_v49  ;;  %v1246_v4 = vadd.f32 %v9733_v58, %v8644_v25  ;;  %v6269_v23 = vcombine.low %v4875_v39, %v4885_v33  ;;  %v5179_v49 = vsel %vm7218_vm7, %v5177_v44, %v5178_v60  ;;  %v5184_v29 = vrot.slane %v5182_v0, 4  ;;  %v6614_v37 = vpop.f32.mrf.mxu0  ;;  %v6260_v25 = vld [vmem:[%s7054_s12 + $0xcc] sm:$0xf]  ;;  %v9735_v60 = vld [vmem:[#allocation5_spill] sm:$0xff] }
 0x13f   : > { %v5183_v53 = vsel %vm7218_vm7, %v6295_v31, %v5182_v0  ;;  %v4890_v12 = vshll.u32 %v6257_v10, 16  ;;  %v6303_v62 = vcombine.low %v5176_v13, %v5179_v49  ;;  %v4896_v1 = vshll.u32 %v6258_v32, 16  ;;  %v8918_v31 = vpop.f32.mrf.mxu1 }
 0x140   : > { %v8911_v61 = vadd.f32 %v1591_v21, %v1246_v4  ;;  %v4900_v58 = vshrl.u32 %v6258_v32, 16  ;;  %v4906_v52 = vshll.u32 %v6259_v36, 16  ;;  %v5186_v26 = vsel %vm7218_vm7, %v5184_v29, %v5185_v55  ;;  %v1604_v33 = vpop.f32.mrf.mxu0  ;;  %9736 = vst [vmem:[#allocation4_spill] sm:$0xff] %v8918_v31 }
 0x141   : > { %v4889_v40 = vrot.slane %v4887_v28, 4  ;;  %v4892_v39 = vrot.slane %v4890_v12, 5  ;;  %v1251_v44 = vadd.f32 %v9735_v60, %v8674_v17  ;;  %v4898_v0 = vrot.slane %v4896_v1, 5 }
 0x142   : > { %v4902_v4 = vrot.slane %v4900_v58, 4  ;;  %v4908_v10 = vrot.slane %v4906_v52, 5  ;;  %v4911_v21 = vshrl.u32 %v6260_v25, 16  ;;  %v4914_v36 = vshll.u32 %v6260_v25, 16  ;;  %v6615_v55 = vpop.f32.mrf.mxu0 }
 0x143   : > { %v4893_v13 = vor.u32 %v4892_v39, %v4889_v40  ;;  %v8921_v32 = vadd.f32 %v6614_v37, %v1251_v44  ;;  %v4920_v45 = vshll.u32 %v8872_v3, 16  ;;  %v4924_v29 = vshrl.u32 %v8872_v3, 16  ;;  %v9737_v37 = vld [vmem:[#allocation6_spill] sm:$0xff] }
 0x144   : > { %6843 = vmatmul.mubr.msk.bf16.gmra.mxu1 %vm515_vm2, %v6302_v34  ;;  %v4903_v17 = vor.u32 %v4902_v4, %v4898_v0  ;;  %v4913_v49 = vrot.slane %v4911_v21, 4  ;;  %v4930_v52 = vshll.u32 %v8879_v47, 16  ;;  %v4916_v12 = vrot.slane %v4914_v36, 5  ;;  %v8930_v25 = vpop.f32.mrf.mxu1  ;;  %v1607_v58 = vpop.f32.mrf.mxu0  ;;  %v9740_v4 = vld [vmem:[#allocation9_spill] sm:$0xff] }
 0x145   : > { %6825 = vmatmul.mubr.msk.bf16.gmra.mxu0 %vm515_vm2, %v6269_v23  ;;  %6846 = vmatprep.mubr.msk.bf16.mxu1 %vm515_vm2, %v6303_v62  ;;  %v4894_v28 = vrot.slane %v4893_v13, 4  ;;  %v4922_v34 = vrot.slane %v4920_v45, 5  ;;  %v1249_v1 = vadd.f32 %v9737_v37, %v8692_v6  ;;  %v6304_v40 = vcombine.low %v5183_v53, %v5186_v26  ;;  %v9738_v62 = vld [vmem:[#allocation8_spill] sm:$0xff] }
 0x146   : > { %v4904_v39 = vrot.slane %v4903_v17, 4  ;;  %v4926_v23 = vrot.slane %v4924_v29, 4  ;;  %v1252_v60 = vadd.f32 %v9738_v62, %v8711_v35  ;;  %v4917_v44 = vor.u32 %v4916_v12, %v4913_v49  ;;  %v8940_v13 = vpop.f32.mrf.mxu1  ;;  %v6638_v6 = vpop.f32.mrf.mxu0 }
 0x147   : > { %v4899_v3 = vsel %vm7105_vm4, %v4894_v28, %v4898_v0  ;;  %v8936_v47 = vadd.f32 %v1604_v33, %v1249_v1  ;;  %v1250_v21 = vadd.f32 %v9740_v4, %v8720_v24  ;;  %v4932_v36 = vrot.slane %v4930_v52, 5 }
 0x148   : > { %v4909_v53 = vsel %vm7105_vm4, %v4904_v39, %v4908_v10  ;;  %v4927_v26 = vor.u32 %v4926_v23, %v4922_v34  ;;  %v8944_v45 = vadd.f32 %v6615_v55, %v1252_v60  ;;  %v4918_v17 = vrot.slane %v4917_v44, 4  ;;  %v8948_v0 = vpop.f32.mrf.mxu1  ;;  %v2009_v33 = vpop.f32.mrf.mxu0 }
 0x149   : > { %9739 = vst [vmem:[#allocation5_spill] sm:$0xff] %v8936_v47  ;;  %v6270_v35 = vcombine.low %v4899_v3, %v4909_v53  ;;  %v8946_v29 = vadd.f32 %v1607_v58, %v1250_v21 }
 0x14a   : > { %9741 = vst [vmem:[#allocation6_spill] sm:$0xff] %v8944_v45  ;;  %v4928_v49 = vrot.slane %v4927_v26, 4  ;;  %v4923_v24 = vsel %vm7105_vm4, %v4918_v17, %v4922_v34  ;;  %v8954_v10 = vpop.f32.mrf.mxu1  ;;  %v6639_v52 = vpop.f32.mrf.mxu0  ;;  %v9743_v26 = vld [vmem:[#allocation7_spill] sm:$0xff]  ;;  %v9744_v17 = vld [vmem:[#allocation10_spill] sm:$0xff] }
 0x14b   : > { %9742 = vst [vmem:[#allocation8_spill] sm:$0xff] %v8946_v29  ;;  %6828 = vmatprep.mubr.msk.bf16.mxu0 %vm515_vm2, %v6270_v35 }
 0x14c   : > { %6847 = vmatmul.mubr.msk.bf16.gmra.mxu1 %vm515_vm2, %v6304_v40  ;;  %v4933_v55 = vsel %vm7105_vm4, %v4928_v49, %v4932_v36  ;;  %v8958_v12 = vpop.f32.mrf.mxu1  ;;  %v2012_v37 = vpop.f32.mrf.mxu0  ;;  %v1621_v36 = vadd.f32 %v8725_v8, %v9743_v26  ;;  %v1619_v49 = vadd.f32 %v8740_v30, %v9744_v17  ;;  %v1620_v8 = vadd.f32 %v8793_v5, %v8680_v18 }
 0x14d   : > { %v6271_v28 = vcombine.low %v4923_v24, %v4933_v55  ;;  %v1625_v5 = vadd.f32 %v8807_v20, %v8703_v7 }
 0x14e   : > { %v8961_v1 = vpop.f32.mrf.mxu1  ;;  %v6642_v58 = vpop.f32.mrf.mxu0  ;;  %v1875_v31 = vadd.f32 %v8605_v46, %v1621_v36  ;;  %v1873_v30 = vadd.f32 %v8635_v59, %v1619_v49 }
 0x14f   : > { %6829 = vmatmul.mubr.msk.bf16.gmra.mxu0 %vm515_vm2, %v6271_v28  ;;  %v1622_v28 = vadd.f32 %v8761_v38, %v8654_v11 }
 0x150   : > { %v8963_v40 = vpop.f32.mrf.mxu1  ;;  %v8965_v39 = vpop.f32.mrf.mxu0  ;;  %v2074_v26 = vadd.f32 %v6638_v6, %v1875_v31  ;;  %v2072_v50 = vadd.f32 %v2009_v33, %v1873_v30 }
 0x151   : > { %v1876_v11 = vadd.f32 %v8663_v51, %v1622_v28  ;;  %v1624_v28 = vadd.f32 %v8849_v41, %v8815_v57 }
 0x152   : > { %v8967_v34 = vpop.f32.mrf.mxu1  ;;  %v8969_v23 = vpop.f32.mrf.mxu0  ;;  %v2456_v18 = vadd.f32 %v8930_v25, %v2074_v26  ;;  %v2454_v33 = vadd.f32 %v8940_v13, %v2072_v50  ;;  %v1623_v25 = vadd.f32 %v8827_v56, %v8744_v14  ;;  %v1626_v13 = vadd.f32 %v8840_v9, %v8784_v2  ;;  %v9749_v26 = vld [vmem:[#allocation12_spill] sm:$0xff] }
 0x153   : > { %v2075_v36 = vadd.f32 %v6639_v52, %v1876_v11  ;;  %v9750_v11 = vld [vmem:[#allocation13_spill] sm:$0xff] }
 0x154   : > { %v8973_v42 = vpop.f32.mrf.mxu0  ;;  %v1877_v2 = vadd.f32 %v9749_v26, %v1623_v25 }
 0x155   : > { %v8971_v62 = vpop.f32.mrf.mxu1  ;;  %v2457_v50 = vadd.f32 %v8948_v0, %v2075_v36  ;;  %v1880_v36 = vadd.f32 %v9750_v11, %v1626_v13 }
 0x156   : > { %v8977_v3 = vpop.f32.mrf.mxu0 }
 0x157   : > { %v8975_v60 = vpop.f32.mrf.mxu1 }
 0x158   : > { %v8981_v4 = vpop.f32.mrf.mxu0 }
 0x159   : > { %v8979_v44 = vpop.f32.mrf.mxu1 }
 0x15a   : > { %v8985_v53 = vpop.f32.mrf.mxu0 }
 0x15b   : > { %v8983_v21 = vpop.f32.mrf.mxu1 }
 0x15c   : > { %v8989_v35 = vpop.f32.mrf.mxu0 }
 0x15e   : > { %v8995_v55 = vpop.f32.mrf.mxu0 }
 0x15f   : > { %v8993_v24 = vpop.f32.mrf.mxu1 }
 0x160   : > { %9745 = vst [vmem:[#allocation9_spill] sm:$0xff] %v8993_v24  ;;  %v9002_v45 = vpop.f32.mrf.mxu0 }
 0x161   : > { %v9000_v29 = vpop.f32.mrf.mxu1  ;;  %9747 = vst [vmem:[#allocation10_spill] sm:$0xff] %v9002_v45 }
 0x162   : > { %9746 = vst [vmem:[#allocation7_spill] sm:$0xff] %v9000_v29  ;;  %v9009_v24 = vpop.f32.mrf.mxu0  ;;  %v9748_v29 = vld [vmem:[#allocation11_spill] sm:$0xff] }
 0x163   : > { %v9007_v17 = vpop.f32.mrf.mxu1  ;;  %v1874_v45 = vadd.f32 %v9748_v29, %v1620_v8 }
 0x164   : > { %v9014_v46 = vpop.f32.mrf.mxu0 }
 0x165   : > { %v9012_v38 = vpop.f32.mrf.mxu1  ;;  %v2073_v31 = vadd.f32 %v2012_v37, %v1874_v45  ;;  %v1879_v37 = vadd.f32 %v8698_v15, %v1625_v5  ;;  %v1878_v5 = vadd.f32 %v8746_v48, %v1624_v28  ;;  %v1883_v28 = vadd.f32 %v8768_v16, %v8861_v22 }
 0x166   : > { %v1881_v16 = vadd.f32 %v8797_v19, %v8876_v43 }
 0x167   : > { %v9017_v47 = vpop.f32.mrf.mxu1  ;;  %v6674_v59 = vpop.f32.mrf.mxu0  ;;  %v2455_v49 = vadd.f32 %v8954_v10, %v2073_v31  ;;  %v2078_v8 = vadd.f32 %v6642_v58, %v1879_v37  ;;  %v2076_v10 = vadd.f32 %v8965_v39, %v1877_v2 }
 0x168   : > { %v9025_v51 = vadd.f32 %v6674_v59, %v2456_v18  ;;  %v2079_v59 = vadd.f32 %v8969_v23, %v1880_v36 }
 0x169   : > { %v9023_v6 = vpop.f32.mrf.mxu1  ;;  %v2645_v29 = vpop.f32.mrf.mxu0  ;;  %v2458_v13 = vadd.f32 %v8961_v1, %v2076_v10 }
 0x16a   : > { %v6334_v7 = vpack.c.bf16 %v9025_v51, %v9025_v51  ;;  %v9039_v45 = vadd.f32 %v2645_v29, %v2454_v33  ;;  %v2808_v31 = vsel %vm515_vm2, %v9025_v51, 0.0  ;;  %v2460_v33 = vadd.f32 %v8958_v12, %v2078_v8 }
 0x16b   : > { %v9037_v20 = vpop.f32.mrf.mxu1  ;;  %v6675_v52 = vpop.f32.mrf.mxu0 }
 0x16c   : > { %2791 = vst.msk [vmem:[%s9031_s14 + $0x8] sm:$0xf] %vm2788_vm8, %v6334_v7  ;;  %v6332_v14 = vpack.c.bf16 %v9039_v45, %v9039_v45  ;;  %v9049_v56 = vadd.f32 %v6675_v52, %v2457_v50  ;;  %v2805_v57 = vsel %vm515_vm2, %v9039_v45, 0.0  ;;  %v2077_v7 = vadd.f32 %v8973_v42, %v1878_v5 }
 0x16d   : > { %v2648_v0 = vpop.f32.mrf.mxu0  ;;  %v9057_v15 = vpop.f32.mrf.mxu1  ;;  %v2461_v42 = vadd.f32 %v8963_v40, %v2079_v59  ;;  %v2082_v40 = vadd.f32 %v8977_v3, %v1883_v28 }
 0x16e   : > { %2789 = vst.msk [vmem:[%s9031_s14] sm:$0xf] %vm2788_vm8, %v6332_v14  ;;  %v6335_v9 = vpack.c.bf16 %v9049_v56, %v9049_v56  ;;  %v9061_v30 = vadd.f32 %v2648_v0, %v2455_v49  ;;  %v2810_v50 = vsel %vm515_vm2, %v9049_v56, 0.0  ;;  %v2459_v2 = vadd.f32 %v8967_v34, %v2077_v7 }
 0x16f   : > { %v1884_v34 = vadd.f32 %v8817_v54, %v8898_v27  ;;  %v2464_v54 = vadd.f32 %v8971_v62, %v2082_v40  ;;  %v9754_v40 = vld [vmem:[#allocation10_spill] sm:$0xff] }
 0x170   : > { %2792 = vst.msk [vmem:[%s9031_s14 + $0xc] sm:$0xf] %vm2788_vm8, %v6335_v9  ;;  %v6333_v41 = vpack.c.bf16 %v9061_v30, %v9061_v30  ;;  %v2806_v58 = vsel %vm515_vm2, %v9061_v30, 0.0 }
 0x171   : > { %v2807_v18 = vadd.f32 %v2806_v58, %v2805_v57  ;;  %v2080_v57 = vadd.f32 %v8981_v4, %v1881_v16  ;;  %v1882_v58 = vadd.f32 %v8832_v63, %v8911_v61 }
 0x172   : > { %v9077_v39 = vpop.f32.mrf.mxu1  ;;  %2790 = vst.msk [vmem:[%s9031_s14 + $0x4] sm:$0xf] %vm2788_vm8, %v6333_v41  ;;  %v2083_v41 = vadd.f32 %v8985_v53, %v1884_v34 }
 0x173   : > { %v2809_v29 = vadd.f32 %v2808_v31, %v2807_v18  ;;  %v6678_v25 = vpop.f32.mrf.mxu0  ;;  %v2081_v5 = vadd.f32 %v8989_v35, %v1882_v58  ;;  %v2462_v61 = vadd.f32 %v8975_v60, %v2080_v57 }
 0x174   : > { %v9085_v23 = vpop.f32.mrf.mxu1  ;;  %v9087_v48 = vadd.f32 %v6678_v25, %v2460_v33  ;;  %v2465_v35 = vadd.f32 %v8979_v44, %v2083_v41  ;;  %v9758_v41 = vld [vmem:[#allocation4_spill] sm:$0xff] }
 0x175   : > { %v2661_v52 = vpop.f32.mrf.mxu0  ;;  %v2811_v37 = vadd.f32 %v2810_v50, %v2809_v29  ;;  %v9751_v50 = vld [vmem:[#allocation14_spill] sm:$0xff] }
 0x176   : > { %v6338_v12 = vpack.c.bf16 %v9087_v48, %v9087_v48  ;;  %v9092_v14 = vpop.f32.mrf.mxu1  ;;  %v9094_v49 = vadd.f32 %v2661_v52, %v2458_v13  ;;  %v2816_v4 = vsel %vm515_vm2, %v9087_v48, 0.0  ;;  %v1887_v13 = vadd.f32 %v9751_v50, %v8921_v32  ;;  %v9753_v32 = vld [vmem:[#allocation2_spill] sm:$0xff] }
 0x177   : > { %v6679_v0 = vpop.f32.mrf.mxu0 }
 0x178   : > { %2795 = vst.msk [vmem:[%s9031_s14 + $0x18] sm:$0xf] %vm2788_vm8, %v6338_v12  ;;  %v6336_v1 = vpack.c.bf16 %v9094_v49, %v9094_v49  ;;  %v2812_v8 = vsel %vm515_vm2, %v9094_v49, 0.0  ;;  %v9105_v26 = vadd.f32 %v6679_v0, %v2461_v42  ;;  %v9113_v22 = vpop.f32.mrf.mxu1  ;;  %v2463_v42 = vadd.f32 %v8983_v21, %v2081_v5  ;;  %v9755_v21 = vld [vmem:[#allocation6_spill] sm:$0xff] }
 0x179   : > { %v2813_v9 = vadd.f32 %v2812_v8, %v2811_v37  ;;  %v2664_v11 = vpop.f32.mrf.mxu0  ;;  %v2086_v44 = vadd.f32 %v8995_v55, %v1887_v13 }
 0x17a   : > { %2793 = vst.msk [vmem:[%s9031_s14 + $0x10] sm:$0xf] %vm2788_vm8, %v6336_v1  ;;  %v6339_v36 = vpack.c.bf16 %v9105_v26, %v9105_v26  ;;  %v9117_v10 = vadd.f32 %v2664_v11, %v2459_v2  ;;  %v2818_v53 = vsel %vm515_vm2, %v9105_v26, 0.0  ;;  %v9752_v1 = vld [vmem:[#allocation5_spill] sm:$0xff] }
 0x17b   : > { %v1885_v8 = vadd.f32 %v9753_v32, %v9752_v1 }
 0x17c   : > { %2796 = vst.msk [vmem:[%s9031_s14 + $0x1c] sm:$0xf] %vm2788_vm8, %v6339_v36  ;;  %v6337_v3 = vpack.c.bf16 %v9117_v10, %v9117_v10  ;;  %v2814_v19 = vsel %vm515_vm2, %v9117_v10, 0.0  ;;  %v9756_v36 = vld [vmem:[#allocation3_spill] sm:$0xff] }
 0x17d   : > { %v2815_v43 = vadd.f32 %v2814_v19, %v2813_v9  ;;  %v2084_v16 = vadd.f32 %v9754_v40, %v1885_v8  ;;  %v1888_v57 = vadd.f32 %v9756_v36, %v9755_v21 }
 0x17e   : > { %v9133_v18 = vpop.f32.mrf.mxu1  ;;  %2794 = vst.msk [vmem:[%s9031_s14 + $0x14] sm:$0xf] %vm2788_vm8, %v6337_v3 }
 0x17f   : > { %v2817_v27 = vadd.f32 %v2816_v4, %v2815_v43  ;;  %v6682_v59 = vpop.f32.mrf.mxu0  ;;  %v2087_v19 = vadd.f32 %v9009_v24, %v1888_v57  ;;  %v9757_v43 = vld [vmem:[#allocation8_spill] sm:$0xff] }
 0x180   : > { %v9141_v31 = vpop.f32.mrf.mxu1  ;;  %v9143_v63 = vadd.f32 %v6682_v59, %v2464_v54  ;;  %v1886_v58 = vadd.f32 %v9758_v41, %v9757_v43 }
 0x181   : > { %v2677_v33 = vpop.f32.mrf.mxu0  ;;  %v2819_v29 = vadd.f32 %v2818_v53, %v2817_v27  ;;  %v9759_v27 = vld [vmem:[#allocation9_spill] sm:$0xff] }
 0x182   : > { %v6342_v62 = vpack.c.bf16 %v9143_v63, %v9143_v63  ;;  %v9148_v25 = vpop.f32.mrf.mxu1  ;;  %v9150_v7 = vadd.f32 %v2677_v33, %v2462_v61  ;;  %v2824_v4 = vsel %vm515_vm2, %v9143_v63, 0.0  ;;  %v2468_v59 = vadd.f32 %v9759_v27, %v2086_v44 }
 0x183   : > { %v6683_v52 = vpop.f32.mrf.mxu0  ;;  %v2085_v61 = vadd.f32 %v9014_v46, %v1886_v58  ;;  %v2469_v46 = vadd.f32 %v9007_v17, %v2087_v19 }
 0x184   : > { %2799 = vst.msk [vmem:[%s9031_s14 + $0x28] sm:$0xf] %vm2788_vm8, %v6342_v62  ;;  %v6340_v60 = vpack.c.bf16 %v9150_v7, %v9150_v7  ;;  %v2820_v37 = vsel %vm515_vm2, %v9150_v7, 0.0  ;;  %v9161_v12 = vadd.f32 %v6683_v52, %v2465_v35  ;;  %v9169_v2 = vpop.f32.mrf.mxu1  ;;  %v9760_v62 = vld [vmem:[#allocation7_spill] sm:$0xff] }
 0x185   : > { %v2821_v28 = vadd.f32 %v2820_v37, %v2819_v29  ;;  %v2680_v0 = vpop.f32.mrf.mxu0  ;;  %v2466_v35 = vadd.f32 %v9760_v62, %v2084_v16  ;;  %v2467_v32 = vadd.f32 %v9012_v38, %v2085_v61 }
 0x186   : > { %2797 = vst.msk [vmem:[%s9031_s14 + $0x20] sm:$0xf] %vm2788_vm8, %v6340_v60  ;;  %v6343_v9 = vpack.c.bf16 %v9161_v12, %v9161_v12  ;;  %v9173_v11 = vadd.f32 %v2680_v0, %v2463_v42  ;;  %v2826_v24 = vsel %vm515_vm2, %v9161_v12, 0.0 }
 0x188   : > { %2800 = vst.msk [vmem:[%s9031_s14 + $0x2c] sm:$0xf] %vm2788_vm8, %v6343_v9  ;;  %v6341_v55 = vpack.c.bf16 %v9173_v11, %v9173_v11  ;;  %v2822_v34 = vsel %vm515_vm2, %v9173_v11, 0.0 }
 0x189   : > { %v2823_v3 = vadd.f32 %v2822_v34, %v2821_v28 }
 0x18a   : > { %v9189_v54 = vpop.f32.mrf.mxu1  ;;  %2798 = vst.msk [vmem:[%s9031_s14 + $0x24] sm:$0xf] %vm2788_vm8, %v6341_v55 }
 0x18b   : > { %v2825_v5 = vadd.f32 %v2824_v4, %v2823_v3  ;;  %v6686_v53 = vpop.f32.mrf.mxu0 }
 0x18c   : > { %v9197_v33 = vpop.f32.mrf.mxu1  ;;  %v9199_v29 = vadd.f32 %v6686_v53, %v2468_v59 }
 0x18d   : > { %v2693_v50 = vpop.f32.mrf.mxu0  ;;  %v2827_v13 = vadd.f32 %v2826_v24, %v2825_v5 }
 0x18e   : > { %v6346_v52 = vpack.c.bf16 %v9199_v29, %v9199_v29  ;;  %v9204_v60 = vpop.f32.mrf.mxu1  ;;  %v9206_v37 = vadd.f32 %v2693_v50, %v2466_v35  ;;  %v2832_v19 = vsel %vm515_vm2, %v9199_v29, 0.0 }
 0x18f   : > { %v6687_v42 = vpop.f32.mrf.mxu0 }
 0x190   : > { %2803 = vst.msk [vmem:[%s9031_s14 + $0x38] sm:$0xf] %vm2788_vm8, %v6346_v52  ;;  %v6344_v28 = vpack.c.bf16 %v9206_v37, %v9206_v37  ;;  %v2828_v0 = vsel %vm515_vm2, %v9206_v37, 0.0  ;;  %v9215_v44 = vpop.f32.mrf.mxu1  ;;  %v9217_v1 = vadd.f32 %v6687_v42, %v2469_v46 }
 0x191   : > { %v2829_v8 = vadd.f32 %v2828_v0, %v2827_v13  ;;  %v2696_v9 = vpop.f32.mrf.mxu0 }
 0x192   : > { %2801 = vst.msk [vmem:[%s9031_s14 + $0x30] sm:$0xf] %vm2788_vm8, %v6344_v28  ;;  %v6347_v17 = vpack.c.bf16 %v9217_v1, %v9217_v1  ;;  %v6728_v40 = vpop.f32.mrf.mxu1  ;;  %v9224_v16 = vadd.f32 %v2696_v9, %v2467_v32  ;;  %v2834_v59 = vsel %vm515_vm2, %v9217_v1, 0.0 }
 0x193   : > { %v6710_v21 = vpop.f32.mrf.mxu0 }
 0x194   : > { %2804 = vst.msk [vmem:[%s9031_s14 + $0x3c] sm:$0xf] %vm2788_vm8, %v6347_v17  ;;  %v6345_v36 = vpack.c.bf16 %v9224_v16, %v9224_v16  ;;  %v2830_v38 = vsel %vm515_vm2, %v9224_v16, 0.0  ;;  %v3609_v57 = vpop.f32.mrf.mxu1  ;;  %v3389_v55 = vadd.f32 %v6710_v21, %v9017_v47 }
 0x195   : > { %v2831_v34 = vadd.f32 %v2830_v38, %v2829_v8  ;;  %v3380_v3 = vpop.f32.mrf.mxu0 }
 0x196   : > { %2802 = vst.msk [vmem:[%s9031_s14 + $0x34] sm:$0xf] %vm2788_vm8, %v6345_v36  ;;  %v6729_v43 = vpop.f32.mrf.mxu1  ;;  %v3381_v41 = vadd.f32 %v3380_v3, %v9023_v6  ;;  %v9238_v58 = vadd.f32 %v6728_v40, %v3389_v55 }
 0x197   : > { %v2833_v4 = vadd.f32 %v2832_v19, %v2831_v34  ;;  %v6711_v27 = vpop.f32.mrf.mxu0 }
 0x198   : > { %v3612_v5 = vpop.f32.mrf.mxu1  ;;  %v3392_v47 = vadd.f32 %v6711_v27, %v9037_v20  ;;  %v9243_v53 = vadd.f32 %v3609_v57, %v3381_v41 }
 0x199   : > { %v2835_v61 = vadd.f32 %v2834_v59, %v2833_v4  ;;  %v3383_v24 = vpop.f32.mrf.mxu0 }
 0x19a   : > { %v6732_v62 = vpop.f32.mrf.mxu1  ;;  %v3384_v35 = vadd.f32 %v3383_v24, %v9057_v15  ;;  %v9246_v50 = vadd.f32 %v6729_v43, %v3392_v47 }
 0x19b   : > { %v2836_v6 = vrot.slane %v2835_v61, 4  ;;  %v6714_v13 = vpop.f32.mrf.mxu0 }
 0x19c   : > { %v3625_v52 = vpop.f32.mrf.mxu1  ;;  %v3405_v46 = vadd.f32 %v6714_v13, %v9077_v39  ;;  %v9249_v42 = vadd.f32 %v3612_v5, %v3384_v35 }
 0x19d   : > { %v2837_v28 = vadd.f32 %v2836_v6, %v2835_v61  ;;  %v3396_v0 = vpop.f32.mrf.mxu0 }
 0x19e   : > { %v6733_v32 = vpop.f32.mrf.mxu1  ;;  %v3397_v20 = vadd.f32 %v3396_v0, %v9085_v23  ;;  %v9252_v8 = vadd.f32 %v6732_v62, %v3405_v46 }
 0x19f   : > { %v2838_v9 = vrot.slane %v2837_v28, 2  ;;  %v6715_v17 = vpop.f32.mrf.mxu0 }
 0x1a0   : > { %v3628_v40 = vpop.f32.mrf.mxu1  ;;  %v3408_v15 = vadd.f32 %v6715_v17, %v9092_v14  ;;  %v9255_v21 = vadd.f32 %v3625_v52, %v3397_v20 }
 0x1a1   : > { %v2839_v36 = vadd.f32 %v2838_v9, %v2837_v28  ;;  %v3399_v38 = vpop.f32.mrf.mxu0 }
 0x1a2   : > { %v6736_v57 = vpop.f32.mrf.mxu1  ;;  %v3400_v39 = vadd.f32 %v3399_v38, %v9113_v22  ;;  %v9258_v55 = vadd.f32 %v6733_v32, %v3408_v15 }
 0x1a3   : > { %v2840_v34 = vrot.slane %v2839_v36, 1  ;;  %v6718_v3 = vpop.f32.mrf.mxu0 }
 0x1a4   : > { %v3641_v19 = vpop.f32.mrf.mxu1  ;;  %v3421_v23 = vadd.f32 %v6718_v3, %v9133_v18  ;;  %v9261_v43 = vadd.f32 %v3628_v40, %v3400_v39 }
 0x1a5   : > { %v2841_v41 = vadd.f32 %v2840_v34, %v2839_v36  ;;  %v3412_v4 = vpop.f32.mrf.mxu0 }
 0x1a6   : > { %v6737_v27 = vpop.f32.mrf.mxu1  ;;  %v3413_v14 = vadd.f32 %v3412_v4, %v9141_v31  ;;  %v9264_v59 = vadd.f32 %v6736_v57, %v3421_v23 }
 0x1a7   : > { %v9266_v5 = vmul.f32 0.0078125, %v2841_v41  ;;  %v6719_v47 = vpop.f32.mrf.mxu0 }
 0x1a8   : > { %v3644_v22 = vpop.f32.mrf.mxu1  ;;  %v3424_v61 = vadd.f32 %v6719_v47, %v9148_v25  ;;  %v9269_v24 = vadd.f32 %v3641_v19, %v3413_v14 }
 0x1a9   : > { %9761 = vst [vmem:[#allocation11_spill] sm:$0xff] %v9266_v5  ;;  %v2843_v18 = vsub.f32 %v9039_v45, %v9266_v5  ;;  %v2844_v62 = vsub.f32 %v9061_v30, %v9266_v5  ;;  %v2845_v35 = vsub.f32 %v9025_v51, %v9266_v5  ;;  %v2846_v31 = vsub.f32 %v9049_v56, %v9266_v5  ;;  %v3415_v6 = vpop.f32.mrf.mxu0 }
 0x1aa   : > { %v2847_v13 = vsub.f32 %v9094_v49, %v9266_v5  ;;  %v2848_v25 = vsub.f32 %v9117_v10, %v9266_v5  ;;  %v2849_v52 = vsub.f32 %v9087_v48, %v9266_v5  ;;  %v2850_v45 = vsub.f32 %v9105_v26, %v9266_v5  ;;  %v6740_v30 = vpop.f32.mrf.mxu1 }
 0x1ab   : > { %v2851_v51 = vsub.f32 %v9150_v7, %v9266_v5  ;;  %v2852_v56 = vsub.f32 %v9173_v11, %v9266_v5  ;;  %v2853_v46 = vsub.f32 %v9143_v63, %v9266_v5  ;;  %v9295_v49 = vsub.f32 %v9161_v12, %v9266_v5  ;;  %v6722_v10 = vpop.f32.mrf.mxu0 }
 0x1ac   : > { %v9299_v48 = vsub.f32 %v9206_v37, %v9266_v5  ;;  %v9303_v26 = vsub.f32 %v9224_v16, %v9266_v5  ;;  %v9307_v7 = vsub.f32 %v9199_v29, %v9266_v5  ;;  %v9311_v63 = vsub.f32 %v9217_v1, %v9266_v5  ;;  %v3657_v11 = vpop.f32.mrf.mxu1 }
 0x1ad   : > { %v2859_v12 = vmul.f32 %v2843_v18, %v2843_v18  ;;  %v2860_v28 = vmul.f32 %v2844_v62, %v2844_v62  ;;  %v3428_v0 = vpop.f32.mrf.mxu0  ;;  %v2861_v20 = vmul.f32 %v2845_v35, %v2845_v35  ;;  %v2862_v17 = vmul.f32 %v2846_v31, %v2846_v31 }
 0x1ae   : > { %v6741_v32 = vpop.f32.mrf.mxu1  ;;  %v2863_v38 = vmul.f32 %v2847_v13, %v2847_v13  ;;  %v2864_v3 = vmul.f32 %v2848_v25, %v2848_v25  ;;  %v3416_v23 = vadd.f32 %v3415_v6, %v9169_v2  ;;  %v3437_v41 = vadd.f32 %v6722_v10, %v9189_v54 }
 0x1af   : > { %v6723_v37 = vpop.f32.mrf.mxu0  ;;  %v2875_v16 = vsel %vm515_vm2, %v2859_v12, 0.0  ;;  %v2876_v40 = vsel %vm515_vm2, %v2860_v28, 0.0  ;;  %v2878_v1 = vsel %vm515_vm2, %v2861_v20, 0.0  ;;  %v2880_v19 = vsel %vm515_vm2, %v2862_v17, 0.0 }
 0x1b0   : > { %v3660_v9 = vpop.f32.mrf.mxu1  ;;  %v2877_v29 = vadd.f32 %v2876_v40, %v2875_v16  ;;  %v3429_v47 = vadd.f32 %v3428_v0, %v9197_v33  ;;  %v3440_v18 = vadd.f32 %v6723_v37, %v9204_v60  ;;  %v2865_v31 = vmul.f32 %v2849_v52, %v2849_v52 }
 0x1b1   : > { %v3431_v15 = vpop.f32.mrf.mxu0  ;;  %v2882_v13 = vsel %vm515_vm2, %v2863_v38, 0.0  ;;  %v9335_v12 = vadd.f32 %v6737_v27, %v3424_v61  ;;  %v9337_v2 = vadd.f32 %v3644_v22, %v3416_v23  ;;  %v9341_v10 = vadd.f32 %v6740_v30, %v3437_v41 }
 0x1b2   : > { %v9315_v36 = vpop.f32.mrf.mxu1  ;;  %v2879_v39 = vadd.f32 %v2878_v1, %v2877_v29  ;;  %v3432_v62 = vadd.f32 %v3431_v15, %v9215_v44  ;;  %v9343_v33 = vadd.f32 %v3657_v11, %v3429_v47  ;;  %v2866_v60 = vmul.f32 %v2850_v45, %v2850_v45 }
 0x1b3   : > { %v9318_v57 = vpop.f32.mrf.mxu0  ;;  %9762 = vst [vmem:[#allocation12_spill] sm:$0xff] %v9341_v10  ;;  %v2884_v44 = vsel %vm515_vm2, %v2864_v3, 0.0  ;;  %v9348_v52 = vadd.f32 %v6741_v32, %v3440_v18  ;;  %v2867_v22 = vmul.f32 %v2851_v51, %v2851_v51  ;;  %v2886_v20 = vsel %vm515_vm2, %v2865_v31, 0.0 }
 0x1b4   : > { %v9320_v34 = vpop.f32.mrf.mxu1  ;;  %v2881_v14 = vadd.f32 %v2880_v19, %v2879_v39  ;;  %9763 = vst [vmem:[#allocation13_spill] sm:$0xff] %v9343_v33  ;;  %v9350_v0 = vadd.f32 %v3660_v9, %v3432_v62  ;;  %v2868_v45 = vmul.f32 %v2852_v56, %v2852_v56  ;;  %v2888_v17 = vsel %vm515_vm2, %v2866_v60, 0.0 }
 0x1b5   : > { %v9325_v4 = vpop.f32.mrf.mxu0  ;;  %9764 = vst [vmem:[#allocation14_spill] sm:$0xff] %v9348_v52  ;;  %v2869_v9 = vmul.f32 %v2853_v46, %v2853_v46  ;;  %v2890_v15 = vsel %vm515_vm2, %v2867_v22, 0.0  ;;  %v2870_v1 = vmul.f32 %v9295_v49, %v9295_v49  ;;  %v2871_v46 = vmul.f32 %v9299_v48, %v9299_v48 }
 0x1b6   : > { %v9330_v35 = vpop.f32.mrf.mxu1  ;;  %v2883_v54 = vadd.f32 %v2882_v13, %v2881_v14  ;;  %9765 = vst [vmem:[#allocation5_spill] sm:$0xff] %v9350_v0  ;;  %v2892_v56 = vsel %vm515_vm2, %v2868_v45, 0.0  ;;  %v2872_v49 = vmul.f32 %v9303_v26, %v9303_v26  ;;  %v2873_v48 = vmul.f32 %v9307_v7, %v9307_v7 }
 0x1b7   : > { %v9333_v25 = vpop.f32.mrf.mxu0  ;;  %v2894_v23 = vsel %vm515_vm2, %v2869_v9, 0.0  ;;  %v2896_v18 = vsel %vm515_vm2, %v2870_v1, 0.0  ;;  %v2874_v26 = vmul.f32 %v9311_v63, %v9311_v63  ;;  %v3870_v33 = vadd.f32 %v9325_v4, %v9243_v53 }
 0x1b8   : > { %v9339_v6 = vpop.f32.mrf.mxu1  ;;  %v2885_v27 = vadd.f32 %v2884_v44, %v2883_v54  ;;  %v2898_v54 = vsel %vm515_vm2, %v2871_v46, 0.0  ;;  %v2900_v22 = vsel %vm515_vm2, %v2872_v49, 0.0 }
 0x1b9   : > { %v9346_v28 = vpop.f32.mrf.mxu0 }
 0x1ba   : > { %v9352_v61 = vpop.f32.mrf.mxu1  ;;  %v2887_v30 = vadd.f32 %v2886_v20, %v2885_v27 }
 0x1bb   : > { %v9355_v37 = vpop.f32.mrf.mxu0 }
 0x1bc   : > { %v9357_v11 = vpop.f32.mrf.mxu1  ;;  %v2889_v32 = vadd.f32 %v2888_v17, %v2887_v30  ;;  %v2902_v17 = vsel %vm515_vm2, %v2873_v48, 0.0 }
 0x1bd   : > { %v9360_v16 = vpop.f32.mrf.mxu0 }
 0x1be   : > { %v9362_v40 = vpop.f32.mrf.mxu1  ;;  %v2891_v51 = vadd.f32 %v2890_v15, %v2889_v32  ;;  %v2904_v15 = vsel %vm515_vm2, %v2874_v26, 0.0 }
 0x1bf   : > { %v9365_v29 = vpop.f32.mrf.mxu0 }
 0x1c0   : > { %v9367_v38 = vpop.f32.mrf.mxu1  ;;  %v2893_v3 = vadd.f32 %v2892_v56, %v2891_v51 }
 0x1c1   : > { %v9372_v39 = vpop.f32.mrf.mxu0 }
 0x1c2   : > { %v9374_v19 = vpop.f32.mrf.mxu1  ;;  %v2895_v14 = vadd.f32 %v2894_v23, %v2893_v3 }
 0x1c3   : > { %v9379_v41 = vpop.f32.mrf.mxu0 }
 0x1c4   : > { %v9381_v47 = vpop.f32.mrf.mxu1  ;;  %v2897_v31 = vadd.f32 %v2896_v18, %v2895_v14 }
 0x1c5   : > { %v9386_v62 = vpop.f32.mrf.mxu0 }
 0x1c6   : > { %v9388_v13 = vpop.f32.mrf.mxu1  ;;  %v2899_v44 = vadd.f32 %v2898_v54, %v2897_v31 }
 0x1c7   : > { %v9393_v60 = vpop.f32.mrf.mxu0 }
 0x1c8   : > { %v9395_v27 = vpop.f32.mrf.mxu1  ;;  %v2901_v30 = vadd.f32 %v2900_v22, %v2899_v44 }
 0x1c9   : > { %v9400_v20 = vpop.f32.mrf.mxu0 }
 0x1ca   : > { %v9402_v45 = vpop.f32.mrf.mxu1  ;;  %v2903_v32 = vadd.f32 %v2902_v17, %v2901_v30 }
 0x1cb   : > { %9766 = vst [vmem:[#allocation2_spill] sm:$0xff] %v9402_v45  ;;  %v9405_v7 = vpop.f32.mrf.mxu0 }
 0x1cc   : > { %9767 = vst [vmem:[#allocation10_spill] sm:$0xff] %v9405_v7  ;;  %v9407_v9 = vpop.f32.mrf.mxu1  ;;  %v9412_v1 = vadd.f32 %v2904_v15, %v2903_v32 }
 0x1cd   : > { %9768 = vst [vmem:[#allocation6_spill] sm:$0xff] %v9407_v9  ;;  %v9410_v51 = vpop.f32.mrf.mxu0 }
 0x1ce   : > { %9769 = vst [vmem:[#allocation3_spill] sm:$0xff] %v9410_v51  ;;  %9770 = vst [vmem:[#allocation8_spill] sm:$0xff] %v9412_v1  ;;  %v9414_v63 = vpop.f32.mrf.mxu1 }
 0x1cf   : > { %9771 = vst [vmem:[#allocation4_spill] sm:$0xff] %v9414_v63  ;;  %v9416_v56 = vpop.f32.mrf.mxu0 }
 0x1d0   : > { %9772 = vst [vmem:[#allocation9_spill] sm:$0xff] %v9416_v56  ;;  %v9418_v3 = vpop.f32.mrf.mxu1  ;;  %v3872_v56 = vadd.f32 %v9318_v57, %v9238_v58  ;;  %v3871_v58 = vadd.f32 %v9346_v28, %v9249_v42  ;;  %v3874_v42 = vadd.f32 %v9360_v16, %v9255_v21  ;;  %v3875_v21 = vadd.f32 %v9372_v39, %v9261_v43 }
 0x1d1   : > { %9773 = vst [vmem:[#allocation7_spill] sm:$0xff] %v9418_v3  ;;  %v9420_v46 = vpop.f32.mrf.mxu0 }
 0x1d2   : > { %9774 = vst [vmem:[#allocation15_spill] sm:$0xff] %v9420_v46  ;;  %v6800_v23 = vpop.f32.mrf.mxu1  ;;  %v4252_v28 = vadd.f32 %v9339_v6, %v3871_v58  ;;  %v4255_v6 = vadd.f32 %v9357_v11, %v3874_v42 }
 0x1d3   : > { %v6782_v14 = vpop.f32.mrf.mxu0 }
 0x1d4   : > { %v4639_v49 = vpop.f32.mrf.mxu1 }
 0x1d5   : > { %v4441_v18 = vpop.f32.mrf.mxu0 }
 0x1d6   : > { %v6801_v31 = vpop.f32.mrf.mxu1 }
 0x1d7   : > { %v6783_v48 = vpop.f32.mrf.mxu0 }
 0x1d8   : > { %v4642_v54 = vpop.f32.mrf.mxu1 }
 0x1d9   : > { %v4444_v44 = vpop.f32.mrf.mxu0 }
 0x1da   : > { %v9422_v26 = vpop.f32.mrf.mxu1 }
 0x1dc   : > { %v6786_v22 = vpop.f32.mrf.mxu0  ;;  %v9424_v30 = vpop.f32.mrf.mxu1 }
 0x1de   : > { %v4457_v17 = vpop.f32.mrf.mxu0  ;;  %v9426_v32 = vpop.f32.mrf.mxu1 }
 0x1df   : > { %v4508_v39 = vadd.f32 %v4457_v17, %v4255_v6  ;;  %v3881_v17 = vadd.f32 %v9393_v60, %v9335_v12  ;;  %v3879_v12 = vadd.f32 %v9400_v20, %v9337_v2 }
 0x1e0   : > { %v6787_v15 = vpop.f32.mrf.mxu0  ;;  %v9428_v1 = vpop.f32.mrf.mxu1 }
 0x1e2   : > { %v9430_v5 = vpop.f32.mrf.mxu0  ;;  %v9432_v3 = vpop.f32.mrf.mxu1 }
 0x1e3   : > { %9775 = vst [vmem:[#allocation16_spill] sm:$0xff] %v9432_v3 }
 0x1e4   : > { %v9434_v63 = vpop.f32.mrf.mxu0  ;;  %v9436_v9 = vpop.f32.mrf.mxu1 }
 0x1e5   : > { %9776 = vst [vmem:[#allocation17_spill] sm:$0xff] %v9436_v9  ;;  %v3873_v9 = vadd.f32 %v9333_v25, %v9246_v50 }
 0x1e6   : > { %v9438_v46 = vpop.f32.mrf.mxu0  ;;  %v9440_v0 = vpop.f32.mrf.mxu1 }
 0x1e7   : > { %9777 = vst [vmem:[#allocation18_spill] sm:$0xff] %v9440_v0  ;;  %v4253_v0 = vadd.f32 %v9315_v36, %v3872_v56  ;;  %v4254_v36 = vadd.f32 %v9330_v35, %v3873_v9 }
 0x1e8   : > { %v9442_v45 = vpop.f32.mrf.mxu0  ;;  %v9446_v52 = vpop.f32.mrf.mxu1 }
 0x1e9   : > { %9778 = vst [vmem:[#allocation19_spill] sm:$0xff] %v9446_v52  ;;  %v4506_v52 = vadd.f32 %v6782_v14, %v4253_v0  ;;  %v3877_v14 = vadd.f32 %v9365_v29, %v9258_v55  ;;  %v3880_v29 = vadd.f32 %v9379_v41, %v9264_v59 }
 0x1ea   : > { %v9448_v51 = vpop.f32.mrf.mxu0  ;;  %v9452_v7 = vpop.f32.mrf.mxu1 }
 0x1eb   : > { %9779 = vst [vmem:[#allocation20_spill] sm:$0xff] %v9448_v51  ;;  %9780 = vst [vmem:[#allocation21_spill] sm:$0xff] %v9452_v7  ;;  %v4251_v51 = vadd.f32 %v9320_v34, %v3870_v33  ;;  %v3876_v7 = vadd.f32 %v9355_v37, %v9252_v8  ;;  %v4507_v34 = vadd.f32 %v6783_v48, %v4254_v36 }
 0x1ec   : > { %v9459_v3 = vpop.f32.mrf.mxu1  ;;  %v4704_v56 = vadd.f32 %v6800_v23, %v4506_v52 }
 0x1ed   : > { %v9454_v10 = vpop.f32.mrf.mxu0  ;;  %v4504_v50 = vadd.f32 %v4441_v18, %v4251_v51  ;;  %v4257_v37 = vadd.f32 %v9352_v61, %v3876_v7  ;;  %v4705_v55 = vadd.f32 %v6801_v31, %v4507_v34  ;;  %v3878_v61 = vadd.f32 %v9386_v62, %v9269_v24 }
 0x1ee   : > { %v9466_v53 = vpop.f32.mrf.mxu1  ;;  %v4258_v7 = vadd.f32 %v9362_v40, %v3877_v14 }
 0x1ef   : > { %v9463_v57 = vpop.f32.mrf.mxu0  ;;  %9781 = vst [vmem:[#allocation22_spill] sm:$0xff] %v9466_v53  ;;  %v4505_v53 = vadd.f32 %v4444_v44, %v4252_v28  ;;  %v4702_v51 = vadd.f32 %v4639_v49, %v4504_v50  ;;  %v4510_v18 = vadd.f32 %v6786_v22, %v4257_v37  ;;  %v4256_v50 = vadd.f32 %v9367_v38, %v3875_v21 }
 0x1f0   : > { %v9473_v25 = vpop.f32.mrf.mxu1  ;;  %v4511_v31 = vadd.f32 %v6787_v15, %v4258_v7  ;;  %v4261_v38 = vadd.f32 %v9374_v19, %v3880_v29 }
 0x1f1   : > { %v9468_v4 = vpop.f32.mrf.mxu0  ;;  %v4703_v43 = vadd.f32 %v4642_v54, %v4505_v53  ;;  %v4708_v54 = vadd.f32 %v9422_v26, %v4510_v18  ;;  %v4509_v15 = vadd.f32 %v9430_v5, %v4256_v50  ;;  %v4259_v53 = vadd.f32 %v9381_v47, %v3878_v61 }
 0x1f2   : > { %v6836_v33 = vpop.f32.mrf.mxu1  ;;  %v4514_v5 = vadd.f32 %v9434_v63, %v4261_v38  ;;  %v4709_v60 = vadd.f32 %v9426_v32, %v4511_v31  ;;  %v9786_v31 = vld [vmem:[#allocation17_spill] sm:$0xff] }
 0x1f3   : > { %v9478_v0 = vpop.f32.mrf.mxu0  ;;  %v4512_v63 = vadd.f32 %v9438_v46, %v4259_v53  ;;  %v4707_v32 = vadd.f32 %v9428_v1, %v4509_v15  ;;  %v9782_v1 = vld [vmem:[#allocation16_spill] sm:$0xff]  ;;  %v9788_v15 = vld [vmem:[#allocation3_spill] sm:$0xff] }
 0x1f4   : > { %v5273_v35 = vpop.f32.mrf.mxu1 }
 0x1f5   : > { %v6818_v8 = vpop.f32.mrf.mxu0  ;;  %v4710_v50 = vadd.f32 %v9786_v31, %v4512_v63 }
 0x1f6   : > { %v5085_v9 = vadd.f32 %v6818_v8, %v4704_v56  ;;  %v6837_v52 = vpop.f32.mrf.mxu1  ;;  %v4262_v8 = vadd.f32 %v9388_v13, %v3881_v17  ;;  %v4260_v13 = vadd.f32 %v9395_v27, %v3879_v12  ;;  %v9787_v17 = vld [vmem:[#allocation13_spill] sm:$0xff] }
 0x1f7   : > { %v5020_v16 = vpop.f32.mrf.mxu0  ;;  %v3882_v38 = vadd.f32 %v9788_v15, %v9787_v17 }
 0x1f8   : > { %v9486_v48 = vadd.f32 %v6836_v33, %v5085_v9  ;;  %v5083_v23 = vadd.f32 %v5020_v16, %v4702_v51  ;;  %v5276_v22 = vpop.f32.mrf.mxu1  ;;  %v4706_v33 = vadd.f32 %v9424_v30, %v4508_v39  ;;  %v4515_v46 = vadd.f32 %v9442_v45, %v4262_v8  ;;  %v9783_v45 = vld [vmem:[#allocation12_spill] sm:$0xff]  ;;  %v9793_v8 = vld [vmem:[#allocation19_spill] sm:$0xff] }
 0x1f9   : > { %v6819_v49 = vpop.f32.mrf.mxu0  ;;  %v9785_v39 = vld [vmem:[#allocation20_spill] sm:$0xff] }
 0x1fa   : > { %v6350_v11 = vpack.c.bf16 %v9486_v48, %v9486_v48  ;;  %v9495_v44 = vadd.f32 %v5273_v35, %v5083_v23  ;;  %v5086_v58 = vadd.f32 %v6819_v49, %v4705_v55  ;;  %v5435_v9 = vsel %vm515_vm2, %v9486_v48, 0.0 }
 0x1fb   : > { %v5023_v59 = vpop.f32.mrf.mxu0  ;;  %v4712_v23 = vadd.f32 %v9782_v1, %v4514_v5 }
 0x1fc   : > { %5418 = vst.msk [vmem:[%s9031_s14 + $0x48] sm:$0xf] %vm2788_vm8, %v6350_v11  ;;  %v6348_v24 = vpack.c.bf16 %v9495_v44, %v9495_v44  ;;  %v9502_v40 = vadd.f32 %v6837_v52, %v5086_v58  ;;  %v6840_v41 = vpop.f32.mrf.mxu1  ;;  %v5084_v62 = vadd.f32 %v5023_v59, %v4703_v43  ;;  %v5432_v19 = vsel %vm515_vm2, %v9495_v44, 0.0  ;;  %v9784_v43 = vld [vmem:[#allocation10_spill] sm:$0xff] }
 0x1fd   : > { %v6822_v36 = vpop.f32.mrf.mxu0  ;;  %v3884_v27 = vadd.f32 %v9784_v43, %v9783_v45  ;;  %v4513_v11 = vadd.f32 %v9785_v39, %v4260_v13  ;;  %v9797_v39 = vld [vmem:[#allocation4_spill] sm:$0xff] }
 0x1fe   : > { %5416 = vst.msk [vmem:[%s9031_s14 + $0x40] sm:$0xf] %vm2788_vm8, %v6348_v24  ;;  %v6351_v42 = vpack.c.bf16 %v9502_v40, %v9502_v40  ;;  %v9514_v28 = vadd.f32 %v5276_v22, %v5084_v62  ;;  %v5289_v34 = vpop.f32.mrf.mxu1  ;;  %v5089_v26 = vadd.f32 %v6822_v36, %v4708_v54  ;;  %v5437_v55 = vsel %vm515_vm2, %v9502_v40, 0.0 }
 0x1ff   : > { %v5036_v47 = vpop.f32.mrf.mxu0 }
 0x200   : > { %5419 = vst.msk [vmem:[%s9031_s14 + $0x4c] sm:$0xf] %vm2788_vm8, %v6351_v42  ;;  %v6349_v56 = vpack.c.bf16 %v9514_v28, %v9514_v28  ;;  %v5433_v30 = vsel %vm515_vm2, %v9514_v28, 0.0  ;;  %v9529_v14 = vadd.f32 %v6840_v41, %v5089_v26  ;;  %v6841_v2 = vpop.f32.mrf.mxu1  ;;  %v5087_v20 = vadd.f32 %v5036_v47, %v4706_v33  ;;  %v9789_v42 = vld [vmem:[#allocation18_spill] sm:$0xff] }
 0x201   : > { %v5434_v37 = vadd.f32 %v5433_v30, %v5432_v19  ;;  %v6823_v35 = vpop.f32.mrf.mxu0  ;;  %v9790_v47 = vld [vmem:[#allocation14_spill] sm:$0xff] }
 0x202   : > { %5417 = vst.msk [vmem:[%s9031_s14 + $0x44] sm:$0xf] %vm2788_vm8, %v6349_v56  ;;  %v6354_v51 = vpack.c.bf16 %v9529_v14, %v9529_v14  ;;  %v9540_v21 = vadd.f32 %v5289_v34, %v5087_v20  ;;  %v5292_v6 = vpop.f32.mrf.mxu1  ;;  %v5090_v16 = vadd.f32 %v6823_v35, %v4709_v60  ;;  %v4713_v34 = vadd.f32 %v9789_v42, %v4515_v46  ;;  %v9791_v60 = vld [vmem:[#allocation9_spill] sm:$0xff]  ;;  %v9792_v30 = vld [vmem:[#allocation2_spill] sm:$0xff]  ;;  %v9795_v46 = vld [vmem:[#allocation15_spill] sm:$0xff] }
 0x203   : > { %v5436_v18 = vadd.f32 %v5435_v9, %v5434_v37  ;;  %v5039_v52 = vpop.f32.mrf.mxu0  ;;  %v3885_v56 = vadd.f32 %v9791_v60, %v9790_v47  ;;  %v4711_v37 = vadd.f32 %v9793_v8, %v4513_v11  ;;  %v5443_v35 = vsel %vm515_vm2, %v9529_v14, 0.0 }
 0x204   : > { %5422 = vst.msk [vmem:[%s9031_s14 + $0x58] sm:$0xf] %vm2788_vm8, %v6354_v51  ;;  %v6352_v29 = vpack.c.bf16 %v9540_v21, %v9540_v21  ;;  %v9551_v61 = vadd.f32 %v6841_v2, %v5090_v16  ;;  %v6844_v7 = vpop.f32.mrf.mxu1  ;;  %v5088_v49 = vadd.f32 %v5039_v52, %v4707_v32  ;;  %v5439_v59 = vsel %vm515_vm2, %v9540_v21, 0.0  ;;  %v9794_v16 = vld [vmem:[#allocation5_spill] sm:$0xff]  ;;  %v9796_v52 = vld [vmem:[#allocation6_spill] sm:$0xff] }
 0x205   : > { %v5438_v22 = vadd.f32 %v5437_v55, %v5436_v18  ;;  %v6826_v58 = vpop.f32.mrf.mxu0  ;;  %v4265_v2 = vadd.f32 %v9792_v30, %v3884_v27  ;;  %v3883_v13 = vadd.f32 %v9795_v46, %v9794_v16  ;;  %v4263_v1 = vadd.f32 %v9796_v52, %v3882_v38  ;;  %v9800_v30 = vld [vmem:[#allocation22_spill] sm:$0xff] }
 0x206   : > { %5420 = vst.msk [vmem:[%s9031_s14 + $0x50] sm:$0xf] %vm2788_vm8, %v6352_v29  ;;  %v6355_v24 = vpack.c.bf16 %v9551_v61, %v9551_v61  ;;  %v9563_v41 = vadd.f32 %v5292_v6, %v5088_v49  ;;  %v5305_v62 = vpop.f32.mrf.mxu1  ;;  %v5093_v54 = vadd.f32 %v6826_v58, %v4712_v23  ;;  %v5445_v29 = vsel %vm515_vm2, %v9551_v61, 0.0 }
 0x207   : > { %v5440_v53 = vadd.f32 %v5439_v59, %v5438_v22  ;;  %v5052_v36 = vpop.f32.mrf.mxu0  ;;  %v4518_v18 = vadd.f32 %v9454_v10, %v4265_v2  ;;  %v4516_v27 = vadd.f32 %v9463_v57, %v4263_v1  ;;  %v4266_v11 = vadd.f32 %v9797_v39, %v3885_v56 }
 0x208   : > { %5423 = vst.msk [vmem:[%s9031_s14 + $0x5c] sm:$0xf] %vm2788_vm8, %v6355_v24  ;;  %v6353_v26 = vpack.c.bf16 %v9563_v41, %v9563_v41  ;;  %v5441_v33 = vsel %vm515_vm2, %v9563_v41, 0.0  ;;  %v9574_v12 = vadd.f32 %v6844_v7, %v5093_v54  ;;  %v6845_v5 = vpop.f32.mrf.mxu1  ;;  %v5091_v19 = vadd.f32 %v5052_v36, %v4710_v50  ;;  %v9798_v50 = vld [vmem:[#allocation7_spill] sm:$0xff] }
 0x209   : > { %v5442_v20 = vadd.f32 %v5441_v33, %v5440_v53  ;;  %v6827_v63 = vpop.f32.mrf.mxu0  ;;  %v4264_v59 = vadd.f32 %v9798_v50, %v3883_v13  ;;  %v4519_v57 = vadd.f32 %v9468_v4, %v4266_v11 }
 0x20a   : > { %5421 = vst.msk [vmem:[%s9031_s14 + $0x54] sm:$0xf] %vm2788_vm8, %v6353_v26  ;;  %v6358_v32 = vpack.c.bf16 %v9574_v12, %v9574_v12  ;;  %v9586_v9 = vadd.f32 %v5305_v62, %v5091_v19  ;;  %v5308_v51 = vpop.f32.mrf.mxu1  ;;  %v5094_v6 = vadd.f32 %v6827_v63, %v4713_v34  ;;  %v9799_v62 = vld [vmem:[#allocation21_spill] sm:$0xff]  ;;  %v4714_v26 = vadd.f32 %v9459_v3, %v4516_v27 }
 0x20b   : > { %v5444_v23 = vadd.f32 %v5443_v35, %v5442_v20  ;;  %v5055_v55 = vpop.f32.mrf.mxu0  ;;  %v4716_v54 = vadd.f32 %v9799_v62, %v4518_v18  ;;  %v4517_v36 = vadd.f32 %v9478_v0, %v4264_v59  ;;  %v5451_v33 = vsel %vm515_vm2, %v9574_v12, 0.0 }
 0x20c   : > { %5426 = vst.msk [vmem:[%s9031_s14 + $0x68] sm:$0xf] %vm2788_vm8, %v6358_v32  ;;  %v6356_v7 = vpack.c.bf16 %v9586_v9, %v9586_v9  ;;  %v9598_v49 = vadd.f32 %v6845_v5, %v5094_v6  ;;  %v6848_v45 = vpop.f32.mrf.mxu1  ;;  %v5092_v43 = vadd.f32 %v5055_v55, %v4711_v37  ;;  %v5447_v22 = vsel %vm515_vm2, %v9586_v9, 0.0 }
 0x20d   : > { %v5446_v10 = vadd.f32 %v5445_v29, %v5444_v23  ;;  %v4717_v0 = vadd.f32 %v9800_v30, %v4519_v57  ;;  %v4715_v8 = vadd.f32 %v9473_v25, %v4517_v36 }
 0x20e   : > { %5424 = vst.msk [vmem:[%s9031_s14 + $0x60] sm:$0xf] %vm2788_vm8, %v6356_v7  ;;  %v6359_v58 = vpack.c.bf16 %v9598_v49, %v9598_v49  ;;  %v9608_v31 = vadd.f32 %v5308_v51, %v5092_v43  ;;  %v5321_v38 = vpop.f32.mrf.mxu1  ;;  %v5453_v60 = vsel %vm515_vm2, %v9598_v49, 0.0 }
 0x20f   : > { %v5448_v24 = vadd.f32 %v5447_v22, %v5446_v10  ;;  %v6830_v53 = vpop.f32.mrf.mxu0 }
 0x210   : > { %5427 = vst.msk [vmem:[%s9031_s14 + $0x6c] sm:$0xf] %vm2788_vm8, %v6359_v58  ;;  %v6357_v17 = vpack.c.bf16 %v9608_v31, %v9608_v31  ;;  %v5449_v15 = vsel %vm515_vm2, %v9608_v31, 0.0  ;;  %v5097_v34 = vadd.f32 %v6830_v53, %v4716_v54  ;;  %v6849_v56 = vpop.f32.mrf.mxu1 }
 0x211   : > { %v5450_v42 = vadd.f32 %v5449_v15, %v5448_v24  ;;  %v5068_v4 = vpop.f32.mrf.mxu0 }
 0x212   : > { %5425 = vst.msk [vmem:[%s9031_s14 + $0x64] sm:$0xf] %vm2788_vm8, %v6357_v17  ;;  %v5350_v19 = vadd.f32 %v6848_v45, %v5097_v34  ;;  %v5095_v47 = vadd.f32 %v5068_v4, %v4714_v26  ;;  %v5324_v46 = vpop.f32.mrf.mxu1 }
 0x213   : > { %v5452_v5 = vadd.f32 %v5451_v33, %v5450_v42  ;;  %v6831_v2 = vpop.f32.mrf.mxu0 }
 0x214   : > { %v6362_v20 = vpack.c.bf16 %v5350_v19, %v5350_v19  ;;  %v5348_v3 = vadd.f32 %v5321_v38, %v5095_v47  ;;  %v5098_v37 = vadd.f32 %v6831_v2, %v4717_v0  ;;  %v5459_v55 = vsel %vm515_vm2, %v5350_v19, 0.0 }
 0x215   : > { %v5454_v63 = vadd.f32 %v5453_v60, %v5452_v5  ;;  %v5071_v35 = vpop.f32.mrf.mxu0  ;;  %v9801_v5 = vld [vmem:[#allocation11_spill] sm:$0xff] }
 0x216   : > { %5430 = vst.msk [vmem:[%s9031_s14 + $0x78] sm:$0xf] %vm2788_vm8, %v6362_v20  ;;  %v6360_v32 = vpack.c.bf16 %v5348_v3, %v5348_v3  ;;  %v5455_v51 = vsel %vm515_vm2, %v5348_v3, 0.0  ;;  %v5096_v6 = vadd.f32 %v5071_v35, %v4715_v8  ;;  %v5351_v13 = vadd.f32 %v6849_v56, %v5098_v37 }
 0x217   : > { %v5456_v16 = vadd.f32 %v5455_v51, %v5454_v63 }
 0x218   : > { %5428 = vst.msk [vmem:[%s9031_s14 + $0x70] sm:$0xf] %vm2788_vm8, %v6360_v32  ;;  %v5349_v18 = vadd.f32 %v5324_v46, %v5096_v6  ;;  %v6363_v52 = vpack.c.bf16 %v5351_v13, %v5351_v13  ;;  %v5461_v7 = vsel %vm515_vm2, %v5351_v13, 0.0 }
 0x21a   : > { %v6361_v1 = vpack.c.bf16 %v5349_v18, %v5349_v18  ;;  %v5457_v23 = vsel %vm515_vm2, %v5349_v18, 0.0  ;;  %5431 = vst.msk [vmem:[%s9031_s14 + $0x7c] sm:$0xf] %vm2788_vm8, %v6363_v52 }
 0x21b   : > { %v5458_v25 = vadd.f32 %v5457_v23, %v5456_v16 }
 0x21c   : > { %5429 = vst.msk [vmem:[%s9031_s14 + $0x74] sm:$0xf] %vm2788_vm8, %v6361_v1 }
 0x21d   : > { %v5460_v29 = vadd.f32 %v5459_v55, %v5458_v25 }
 0x21f   : > { %v5462_v45 = vadd.f32 %v5461_v7, %v5460_v29 }
 0x221   : > { %v5463_v43 = vrot.slane %v5462_v45, 4 }
 0x223   : > { %v5464_v27 = vadd.f32 %v5463_v43, %v5462_v45  ;;  %v9802_v45 = vld [vmem:[#allocation8_spill] sm:$0xff] }
 0x224   : > { %v2906_v43 = vrot.slane %v9802_v45, 4 }
 0x225   : > { %v5465_v10 = vrot.slane %v5464_v27, 2 }
 0x227   : > { %v5466_v39 = vadd.f32 %v5465_v10, %v5464_v27 }
 0x229   : > { %v5467_v11 = vrot.slane %v5466_v39, 1 }
 0x22b   : > { %v5468_v22 = vadd.f32 %v5467_v11, %v5466_v39 }
 0x22d   : > { %v5469_v58 = vmul.f32 0.0078125, %v5468_v22 }
 0x22f   : > { %v5470_v50 = vsub.f32 %v9495_v44, %v5469_v58  ;;  %v5471_v59 = vsub.f32 %v9514_v28, %v5469_v58  ;;  %v5472_v24 = vsub.f32 %v9486_v48, %v5469_v58  ;;  %v5473_v62 = vsub.f32 %v9502_v40, %v5469_v58 }
 0x230   : > { %v5474_v54 = vsub.f32 %v9540_v21, %v5469_v58  ;;  %v5475_v57 = vsub.f32 %v9563_v41, %v5469_v58  ;;  %v5476_v17 = vsub.f32 %v9529_v14, %v5469_v58  ;;  %v5477_v15 = vsub.f32 %v9551_v61, %v5469_v58 }
 0x231   : > { %v5478_v38 = vsub.f32 %v9586_v9, %v5469_v58  ;;  %v5479_v53 = vsub.f32 %v9608_v31, %v5469_v58  ;;  %v5480_v44 = vsub.f32 %v9574_v12, %v5469_v58  ;;  %v5481_v28 = vsub.f32 %v9598_v49, %v5469_v58 }
 0x232   : > { %v5482_v36 = vsub.f32 %v5348_v3, %v5469_v58  ;;  %v5483_v48 = vsub.f32 %v5349_v18, %v5469_v58  ;;  %v5484_v42 = vsub.f32 %v5350_v19, %v5469_v58  ;;  %v5485_v40 = vsub.f32 %v5351_v13, %v5469_v58 }
 0x233   : > { %v5486_v34 = vmul.f32 %v5470_v50, %v5470_v50  ;;  %v5487_v21 = vmul.f32 %v5471_v59, %v5471_v59  ;;  %v5488_v41 = vmul.f32 %v5472_v24, %v5472_v24  ;;  %v5489_v26 = vmul.f32 %v5473_v62, %v5473_v62 }
 0x234   : > { %v5490_v33 = vmul.f32 %v5474_v54, %v5474_v54  ;;  %v5491_v4 = vmul.f32 %v5475_v57, %v5475_v57  ;;  %v5539_v19 = vsub.f32 %v5469_v58, %v9801_v5  ;;  %v5492_v60 = vmul.f32 %v5476_v17, %v5476_v17 }
 0x235   : > { %v5502_v14 = vsel %vm515_vm2, %v5486_v34, 0.0  ;;  %v5503_v61 = vsel %vm515_vm2, %v5487_v21, 0.0  ;;  %v5505_v31 = vsel %vm515_vm2, %v5488_v41, 0.0  ;;  %v5507_v49 = vsel %vm515_vm2, %v5489_v26, 0.0 }
 0x236   : > { %v5504_v9 = vadd.f32 %v5503_v61, %v5502_v14  ;;  %v5509_v56 = vsel %vm515_vm2, %v5490_v33, 0.0  ;;  %v5540_v30 = vmul.f32 0.5, %v5539_v19  ;;  %v5493_v2 = vmul.f32 %v5477_v15, %v5477_v15 }
 0x237   : > { %v5511_v20 = vsel %vm515_vm2, %v5491_v4, 0.0  ;;  %v5494_v8 = vmul.f32 %v5478_v38, %v5478_v38  ;;  %v5513_v37 = vsel %vm515_vm2, %v5492_v60, 0.0  ;;  %v5495_v32 = vmul.f32 %v5479_v53, %v5479_v53 }
 0x238   : > { %v5506_v12 = vadd.f32 %v5505_v31, %v5504_v9  ;;  %v5541_v3 = vadd.f32 %v5540_v30, %v9801_v5  ;;  %v5515_v51 = vsel %vm515_vm2, %v5493_v2, 0.0  ;;  %v5496_v16 = vmul.f32 %v5480_v44, %v5480_v44 }
 0x239   : > { %v5517_v46 = vsel %vm515_vm2, %v5494_v8, 0.0  ;;  %v5497_v18 = vmul.f32 %v5481_v28, %v5481_v28  ;;  %v5519_v52 = vsel %vm515_vm2, %v5495_v32, 0.0  ;;  %v5498_v23 = vmul.f32 %v5482_v36, %v5482_v36 }
 0x23a   : > { %v5508_v47 = vadd.f32 %v5507_v49, %v5506_v12  ;;  %5547 = vst.msk [vmem:[%s261_s21] sm:$0x1] %vm5546_vm9, %v5541_v3  ;;  %v5521_v25 = vsel %vm515_vm2, %v5496_v16, 0.0  ;;  %v5499_v29 = vmul.f32 %v5483_v48, %v5483_v48  ;;  %v5500_v10 = vmul.f32 %v5484_v42, %v5484_v42 }
 0x23b   : > { %v5523_v7 = vsel %vm515_vm2, %v5497_v18, 0.0  ;;  %v5525_v39 = vsel %vm515_vm2, %v5498_v23, 0.0  ;;  %v5501_v22 = vmul.f32 %v5485_v40, %v5485_v40  ;;  %v2907_v50 = vadd.f32 %v2906_v43, %v9802_v45 }
 0x23c   : > { %v5510_v0 = vadd.f32 %v5509_v56, %v5508_v47  ;;  %v5527_v58 = vsel %vm515_vm2, %v5499_v29, 0.0  ;;  %v5529_v24 = vsel %vm515_vm2, %v5500_v10, 0.0  ;;  %v5543_v42 = vmul.f32 %v5539_v19, %v5539_v19 }
 0x23d   : > { %v5531_v54 = vsel %vm515_vm2, %v5501_v22, 0.0  ;;  %v2908_v57 = vrot.slane %v2907_v50, 2 }
 0x23e   : > { %v5512_v63 = vadd.f32 %v5511_v20, %v5510_v0  ;;  %v5544_v41 = vmul.f32 64.0, %v5543_v42 }
 0x23f   : > { %v2909_v38 = vadd.f32 %v2908_v57, %v2907_v50 }
 0x240   : > { %v5514_v35 = vadd.f32 %v5513_v37, %v5512_v63 }
 0x241   : > { %v2910_v28 = vrot.slane %v2909_v38, 1 }
 0x242   : > { %v5516_v6 = vadd.f32 %v5515_v51, %v5514_v35 }
 0x243   : > { %v2911_v40 = vadd.f32 %v2910_v28, %v2909_v38 }
 0x244   : > { %v5518_v13 = vadd.f32 %v5517_v46, %v5516_v6 }
 0x246   : > { %v5520_v1 = vadd.f32 %v5519_v52, %v5518_v13 }
 0x248   : > { %v5522_v55 = vadd.f32 %v5521_v25, %v5520_v1 }
 0x24a   : > { %v5524_v27 = vadd.f32 %v5523_v7, %v5522_v55 }
 0x24c   : > { %v5526_v11 = vadd.f32 %v5525_v39, %v5524_v27 }
 0x24e   : > { %v5528_v59 = vadd.f32 %v5527_v58, %v5526_v11 }
 0x250   : > { %v5530_v62 = vadd.f32 %v5529_v24, %v5528_v59 }
 0x252   : > { %v5532_v17 = vadd.f32 %v5531_v54, %v5530_v62 }
 0x254   : > { %v5533_v15 = vrot.slane %v5532_v17, 4 }
 0x256   : > { %v5534_v53 = vadd.f32 %v5533_v15, %v5532_v17 }
 0x258   : > { %v5535_v44 = vrot.slane %v5534_v53, 2 }
 0x25a   : > { %v5536_v36 = vadd.f32 %v5535_v44, %v5534_v53 }
 0x25c   : > { %v5537_v48 = vrot.slane %v5536_v36, 1 }
 0x25e   : > { %v5538_v34 = vadd.f32 %v5537_v48, %v5536_v36 }
 0x260   : > { %v5542_v21 = vadd.f32 %v5538_v34, %v2911_v40 }
 0x262   : > { %v5545_v26 = vadd.f32 %v5544_v41, %v5542_v21 }
 0x264   : > { %5548 = vst.msk [vmem:[%s267_s24] sm:$0x1] %vm5546_vm9, %v5545_v26 }
 0x265 PF: > { %s15_s17 = sadd.s32 1, %s6963_s17   ;;  %s9803_s15 = smov %s6959_s16 }
 0x266   : > { %p12_p5 = scmp.ge.s32.totalorder %s15_s17, 4   ;;  %s9804_s16 = smov %s9806_s18 }
 0x268   :  { %14 = sbr.rel (!%p12_p5) target bundleno = 2 (0x2), region = 98 }

</bundles_post_ra>
